<compile_context>
chip_gen: v5e
topology: v5e:2x2
jax: 0.10.0
libtpu: 0.0.40
codegen_flags: <defaults>
</compile_context>

<pallas_src>
import functools
import math

import jax
import jax.numpy as jnp
from jax.experimental import pallas as pl
from jax.experimental.pallas import tpu as pltpu


# ----------------------------------------------------------------------------
# Kernel: one ResidualAttentionBlock applied to TB batch elements.
# ----------------------------------------------------------------------------
def _block_kernel(x_ref, ln1g_ref, ln1b_ref, wqkv_ref, bqkv_ref, wo_ref, bo_ref,
                  ln2g_ref, ln2b_ref, wfc_ref, bfc_ref, wproj_ref, bproj_ref,
                  o_ref, *, n_head):
    TB, N, D = x_ref.shape
    R = TB * N                       # rows fed to the MXU
    hd = D // n_head
    mm = wqkv_ref.dtype              # MXU operand dtype (bf16 by default)

    def layer_norm_f32(v32, g, b):
        # fp16-safe LayerNorm: stats in f32; result stays f32 (no round-trip).
        mu = jnp.mean(v32, axis=-1, keepdims=True)
        c = v32 - mu
        var = jnp.mean(c * c, axis=-1, keepdims=True)
        return c * jax.lax.rsqrt(var + 1e-5) * g + b

    # Residual stream in f32, flattened to (TB*N, D) rows.
    xf = x_ref[...].reshape(R, D).astype(jnp.float32)

    # ---- ln_1 + fused QKV projection: one (R, D) @ (D, 3D) matmul ----------
    xn = layer_norm_f32(xf, ln1g_ref[...], ln1b_ref[...])
    qkv = jnp.dot(xn.astype(mm), wqkv_ref[...],
                  preferred_element_type=jnp.float32) + bqkv_ref[...]

    # ---- head split: one reshape + axis swap (in f32), no per-head slices --
    def to_heads(t2d):                               # (R, D) f32 -> (TB*H, N, hd)
        t = t2d.reshape(TB, N, n_head, hd)
        t = jnp.swapaxes(t, 1, 2)                    # (TB, H, N, hd)
        return t.reshape(TB * n_head, N, hd).astype(mm)

    q_h = to_heads(qkv[:, 0 * D:1 * D])              # scale already folded in
    k_h = to_heads(qkv[:, 1 * D:2 * D])
    v_h = to_heads(qkv[:, 2 * D:3 * D])

    # ---- attention, batched over TB*H heads --------------------------------
    # TODO(synk): for N >= ~256 on v7x, block over keys with an online-softmax
    #             accumulator instead of the full (TB*H, N, N) f32 tensor.
    s = jnp.einsum('hqc,hkc->hqk', q_h, k_h, preferred_element_type=jnp.float32)
    s = s - jnp.max(s, axis=-1, keepdims=True)
    p = jnp.exp(s)
    p = p * pl.reciprocal(jnp.sum(p, axis=-1, keepdims=True), approx=True)
    ctx = jnp.einsum('hqk,hkc->hqc', p.astype(mm), v_h,
                     preferred_element_type=jnp.float32)          # (TB*H, N, hd)

    # ---- head merge + single full-K output projection ----------------------
    ctx = jnp.swapaxes(ctx.reshape(TB, n_head, N, hd), 1, 2).reshape(R, D)
    attn = jnp.dot(ctx.astype(mm), wo_ref[...],
                   preferred_element_type=jnp.float32) + bo_ref[...]
    xf = xf + attn

    # ---- ln_2 + MLP with QuickGELU ------------------------------------------
    xn2 = layer_norm_f32(xf, ln2g_ref[...], ln2b_ref[...])
    h1 = jnp.dot(xn2.astype(mm), wfc_ref[...],
                 preferred_element_type=jnp.float32) + bfc_ref[...]
    h1 = h1 * jax.nn.sigmoid(1.702 * h1)             # QuickGELU
    h2 = jnp.dot(h1.astype(mm), wproj_ref[...],
                 preferred_element_type=jnp.float32) + bproj_ref[...]
    xf = xf + h2

    o_ref[...] = xf.reshape(TB, N, D).astype(o_ref.dtype)


# ----------------------------------------------------------------------------
# Sizing helpers
# ----------------------------------------------------------------------------
def _physical_vmem_bytes():
    try:
        return int(pltpu.get_tpu_info().vmem_capacity_bytes)
    except Exception:
        return 64 << 20          # conservative (v7x-sized) fallback


def _vmem_limit_bytes(tb, N, D, n_head, x_itemsize, w_itemsize,
                      single_buffer_weights):
    R = tb * N
    hd = D // n_head
    w_buf = 1 if single_buffer_weights else 2
    weight_bytes = w_buf * (12 * D * D) * w_itemsize + 16 * D * 4   # + biases/LN
    act_bytes = 4 * (8 * R * D                 # residual / LN / ctx / attn temps
                     + R * 3 * D               # fused qkv
                     + 3 * tb * n_head * N * hd
                     + 2 * tb * n_head * N * N  # scores + probs
                     + 2 * R * 4 * D)          # h1 + gelu
    io_bytes = 2 * 2 * R * D * x_itemsize      # double-buffered x / out blocks
    est = int(1.4 * (weight_bytes + act_bytes + io_bytes)) + (4 << 20)
    cap = int(0.85 * _physical_vmem_bytes())
    return max(min(est, cap), min(32 << 20, cap))


def _choose_tb(B, N, n_head):
    """Batch elements per grid step: fill the MXU M dim (multiple of 256 is
    also a multiple of 128 -> fine on v5e) while keeping f32 scores modest."""
    target_rows = 256
    tb = min(B, max(1, (target_rows + N - 1) // N))
    while tb > 1 and 8 * tb * n_head * N * N > (16 << 20):   # scores+probs f32
        tb -= 1
    return tb


# ----------------------------------------------------------------------------
# pallas_call wrapper for one block
# ----------------------------------------------------------------------------
def residual_block_apply(x_bnd, params, n_head, tb, single_buffer_weights):
    """x_bnd: (B, N, D) with B % tb == 0. Applies one residual attention block."""
    B, N, D = x_bnd.shape
    assert D % n_head == 0 and B % tb == 0

    x_spec = pl.BlockSpec((tb, N, D), lambda b: (b, 0, 0))
    out_spec = pl.BlockSpec((tb, N, D), lambda b: (b, 0, 0))

    # Weights: constant index_map -> fetched once, resident in VMEM. On v7x
    # (64 MiB) avoid double-buffering them with pipeline_mode=pl.Buffered(1).
    w_specs = []
    for p in params:
        nd = p.ndim
        idx = lambda b, _nd=nd: (0,) * _nd
        if single_buffer_weights:
            w_specs.append(pl.BlockSpec(p.shape, idx, pipeline_mode=pl.Buffered(1)))
        else:
            w_specs.append(pl.BlockSpec(p.shape, idx))

    kern = functools.partial(_block_kernel, n_head=n_head)
    vmem_limit = _vmem_limit_bytes(tb, N, D, n_head, x_bnd.dtype.itemsize,
                                   params[2].dtype.itemsize, single_buffer_weights)
    return pl.pallas_call(
        kern,
        out_shape=jax.ShapeDtypeStruct((B, N, D), x_bnd.dtype),
        grid=(B // tb,),
        in_specs=[x_spec] + w_specs,
        out_specs=out_spec,
        compiler_params=pltpu.CompilerParams(
            dimension_semantics=("parallel",),
            vmem_limit_bytes=vmem_limit),
    )(x_bnd, *params)


# ----------------------------------------------------------------------------
# Parameters
# ----------------------------------------------------------------------------
def init_block_params(key, d_model):
    """Deterministic synthetic f32 parameters for one ResidualAttentionBlock.
    Weights are laid out (in, out) so the kernel computes x @ W."""
    keys = jax.random.split(key, 4)
    std = 0.02
    f32 = jnp.float32
    ln1g = jnp.ones((1, d_model), f32)
    ln1b = jnp.zeros((1, d_model), f32)
    wqkv = jax.random.normal(keys[0], (d_model, 3 * d_model), f32) * std
    bqkv = jnp.zeros((1, 3 * d_model), f32)
    wo = jax.random.normal(keys[1], (d_model, d_model), f32) * std
    bo = jnp.zeros((1, d_model), f32)
    ln2g = jnp.ones((1, d_model), f32)
    ln2b = jnp.zeros((1, d_model), f32)
    wfc = jax.random.normal(keys[2], (d_model, 4 * d_model), f32) * std
    bfc = jnp.zeros((1, 4 * d_model), f32)
    wproj = jax.random.normal(keys[3], (4 * d_model, d_model), f32) * std
    bproj = jnp.zeros((1, d_model), f32)
    return (ln1g, ln1b, wqkv, bqkv, wo, bo, ln2g, ln2b, wfc, bfc, wproj, bproj)


def prepare_block_params(raw, n_head, compute_dtype=jnp.bfloat16):
    """One-time weight transform: fold the 1/sqrt(hd) query scale into the Q
    rows of wqkv/bqkv, cast the big matmul weights to the MXU operand dtype
    (bf16 by default), keep biases and LN params in f32."""
    (ln1g, ln1b, wqkv, bqkv, wo, bo, ln2g, ln2b, wfc, bfc, wproj, bproj) = raw
    D = wo.shape[0]
    scale = 1.0 / math.sqrt(D // n_head)
    wqkv = wqkv.at[:, :D].multiply(scale)
    bqkv = bqkv.at[:, :D].multiply(scale)
    f32 = jnp.float32
    return (ln1g.astype(f32), ln1b.astype(f32),
            wqkv.astype(compute_dtype), bqkv.astype(f32),
            wo.astype(compute_dtype), bo.astype(f32),
            ln2g.astype(f32), ln2b.astype(f32),
            wfc.astype(compute_dtype), bfc.astype(f32),
            wproj.astype(compute_dtype), bproj.astype(f32))


# ----------------------------------------------------------------------------
# Full transformer forward (seq-first layout, like CLIP / PyTorch)
# ----------------------------------------------------------------------------
def transformer_forward(x_nbd, prepared_params, n_head, tb, single_buffer_weights):
    N, B, D = x_nbd.shape
    x = jnp.transpose(x_nbd, (1, 0, 2))                    # -> (B, N, D)
    pad = (-B) % tb
    if pad:
        x = jnp.concatenate([x, jnp.zeros((pad, N, D), x.dtype)], axis=0)
    for params in prepared_params:
        x = residual_block_apply(x, params, n_head, tb, single_buffer_weights)
    if pad:
        x = x[:B]
    return jnp.transpose(x, (1, 0, 2))                     # back to (N, B, D)


# ----------------------------------------------------------------------------
# Pure-JAX f32 reference (matches the PyTorch forward for the non-adapter path)
# ----------------------------------------------------------------------------
def reference_forward(x_nbd, raw_params, n_head):
    x = x_nbd.astype(jnp.float32)
    N, B, D = x.shape
    hd = D // n_head
    scale = 1.0 / math.sqrt(hd)

    def ln(v, g, b):
        mu = v.mean(-1, keepdims=True)
        c = v - mu
        var = (c * c).mean(-1, keepdims=True)
        return c * jax.lax.rsqrt(var + 1e-5) * g + b

    for (ln1g, ln1b, wqkv, bqkv, wo, bo, ln2g, ln2b,
         wfc, bfc, wproj, bproj) in raw_params:
        xn = ln(x, ln1g[0], ln1b[0])
        qkv = xn @ wqkv + bqkv[0]
        q, k, v = qkv[..., :D] * scale, qkv[..., D:2 * D], qkv[..., 2 * D:]
        qh = q.reshape(N, B, n_head, hd)
        kh = k.reshape(N, B, n_head, hd)
        vh = v.reshape(N, B, n_head, hd)
        s = jnp.einsum('qbhc,kbhc->bhqk', qh, kh)
        p = jax.nn.softmax(s, axis=-1)
        ctx = jnp.einsum('bhqk,kbhc->qbhc', p, vh).reshape(N, B, D)
        x = x + ctx @ wo + bo[0]
        xn2 = ln(x, ln2g[0], ln2b[0])
        h1 = xn2 @ wfc + bfc[0]
        h1 = h1 * jax.nn.sigmoid(1.702 * h1)
        x = x + h1 @ wproj + bproj[0]
    return x


# ----------------------------------------------------------------------------
if __name__ == "__main__":
    # Small shapes: seq=8, batch=2, width=32, heads=4, layers=2
    N, B, D, heads, layers = 8, 2, 32, 4, 2

    key = jax.random.PRNGKey(0)
    kx, kp = jax.random.split(key)
    x = jax.random.normal(kx, (N, B, D), jnp.float32)

    pkeys = jax.random.split(kp, layers)
    raw_params = [init_block_params(pkeys[i], D) for i in range(layers)]
    # bf16 MXU operands / half weight VMEM; math stays f32 where it matters.
    prepared = [prepare_block_params(p, heads, jnp.bfloat16) for p in raw_params]

    tb = _choose_tb(B, N, heads)
    fwd = jax.jit(transformer_forward, static_argnums=(2, 3, 4))

    try:
        out = fwd(x, prepared, heads, tb, True)
        out = jax.block_until_ready(out)
    except Exception:
        # Fallback if single-buffered weight specs (pl.Buffered(1)) are not
        # supported by this jax build.
        out = fwd(x, prepared, heads, tb, False)
        out = jax.block_until_ready(out)

    assert out.shape == (N, B, D)
    assert out.dtype == jnp.float32
    assert bool(jnp.isfinite(out).all())

    # Loose numerical check vs. pure-JAX f32 reference (bf16 MXU operands and
    # approx-reciprocal softmax => not bit-exact; rtol~1e-2 class deviation).
    ref = reference_forward(x, raw_params, heads)
    max_err = float(jnp.max(jnp.abs(out - ref)))
    assert max_err < 5e-2, f"max abs err too large: {max_err}"

    print("KERNEL_OK")
</pallas_src>

<mosaic_0001>
module attributes {stable_mosaic.version = 11 : i64} {
  func.func @_block_kernel(%arg0: i32, %arg1: memref<2x8x32xf32, #tpu.memory_space<vmem>>, %arg2: memref<1x32xf32, #tpu.memory_space<vmem>>, %arg3: memref<1x32xf32, #tpu.memory_space<vmem>>, %arg4: memref<32x96xbf16, #tpu.memory_space<vmem>>, %arg5: memref<1x96xf32, #tpu.memory_space<vmem>>, %arg6: memref<32x32xbf16, #tpu.memory_space<vmem>>, %arg7: memref<1x32xf32, #tpu.memory_space<vmem>>, %arg8: memref<1x32xf32, #tpu.memory_space<vmem>>, %arg9: memref<1x32xf32, #tpu.memory_space<vmem>>, %arg10: memref<32x128xbf16, #tpu.memory_space<vmem>>, %arg11: memref<1x128xf32, #tpu.memory_space<vmem>>, %arg12: memref<128x32xbf16, #tpu.memory_space<vmem>>, %arg13: memref<1x32xf32, #tpu.memory_space<vmem>>, %arg14: memref<2x8x32xf32, #tpu.memory_space<vmem>>) attributes {dimension_semantics = [#tpu.dimension_semantics<parallel>], iteration_bounds = array<i64: 1>, scalar_prefetch = 0 : i64, scratch_operands = 0 : i64, tpu.core_type = #tpu.core_type<tc>, window_params = [{transform_indices = @transform_0, window_bounds = array<i64: 2, 8, 32>}, {pipeline_mode = #tpu.pipeline_mode<synchronous>, transform_indices = @transform_1, window_bounds = array<i64: 1, 32>}, {pipeline_mode = #tpu.pipeline_mode<synchronous>, transform_indices = @transform_2, window_bounds = array<i64: 1, 32>}, {pipeline_mode = #tpu.pipeline_mode<synchronous>, transform_indices = @transform_3, window_bounds = array<i64: 32, 96>}, {pipeline_mode = #tpu.pipeline_mode<synchronous>, transform_indices = @transform_4, window_bounds = array<i64: 1, 96>}, {pipeline_mode = #tpu.pipeline_mode<synchronous>, transform_indices = @transform_5, window_bounds = array<i64: 32, 32>}, {pipeline_mode = #tpu.pipeline_mode<synchronous>, transform_indices = @transform_6, window_bounds = array<i64: 1, 32>}, {pipeline_mode = #tpu.pipeline_mode<synchronous>, transform_indices = @transform_7, window_bounds = array<i64: 1, 32>}, {pipeline_mode = #tpu.pipeline_mode<synchronous>, transform_indices = @transform_8, window_bounds = array<i64: 1, 32>}, {pipeline_mode = #tpu.pipeline_mode<synchronous>, transform_indices = @transform_9, window_bounds = array<i64: 32, 128>}, {pipeline_mode = #tpu.pipeline_mode<synchronous>, transform_indices = @transform_10, window_bounds = array<i64: 1, 128>}, {pipeline_mode = #tpu.pipeline_mode<synchronous>, transform_indices = @transform_11, window_bounds = array<i64: 128, 32>}, {pipeline_mode = #tpu.pipeline_mode<synchronous>, transform_indices = @transform_12, window_bounds = array<i64: 1, 32>}, {transform_indices = @transform_13, window_bounds = array<i64: 2, 8, 32>}]} {
    %c0 = arith.constant 0 : index
    %c0_0 = arith.constant 0 : index
    %c0_1 = arith.constant 0 : index
    %0 = vector.load %arg1[%c0, %c0_0, %c0_1] : memref<2x8x32xf32, #tpu.memory_space<vmem>>, vector<2x8x32xf32>
    %1 = vector.shape_cast %0 : vector<2x8x32xf32> to vector<16x32xf32>
    %c0_2 = arith.constant 0 : index
    %c0_3 = arith.constant 0 : index
    %2 = vector.load %arg2[%c0_2, %c0_3] : memref<1x32xf32, #tpu.memory_space<vmem>>, vector<1x32xf32>
    %c0_4 = arith.constant 0 : index
    %c0_5 = arith.constant 0 : index
    %3 = vector.load %arg3[%c0_4, %c0_5] : memref<1x32xf32, #tpu.memory_space<vmem>>, vector<1x32xf32>
    %cst = arith.constant dense<0.000000e+00> : vector<16xf32>
    %4 = vector.multi_reduction <add>, %1, %cst [1] : vector<16x32xf32> to vector<16xf32>
    %5 = vector.shape_cast %4 : vector<16xf32> to vector<16x1xf32>
    %cst_6 = arith.constant 3.200000e+01 : f32
    %6 = vector.broadcast %cst_6 : f32 to vector<16x1xf32>
    %7 = arith.divf %5, %6 : vector<16x1xf32>
    %8 = vector.broadcast %7 : vector<16x1xf32> to vector<16x32xf32>
    %9 = arith.subf %1, %8 : vector<16x32xf32>
    %10 = arith.mulf %9, %9 : vector<16x32xf32>
    %cst_7 = arith.constant dense<0.000000e+00> : vector<16xf32>
    %11 = vector.multi_reduction <add>, %10, %cst_7 [1] : vector<16x32xf32> to vector<16xf32>
    %12 = vector.shape_cast %11 : vector<16xf32> to vector<16x1xf32>
    %cst_8 = arith.constant 3.200000e+01 : f32
    %13 = vector.broadcast %cst_8 : f32 to vector<16x1xf32>
    %14 = arith.divf %12, %13 : vector<16x1xf32>
    %cst_9 = arith.constant 9.99999974E-6 : f32
    %15 = vector.broadcast %cst_9 : f32 to vector<16x1xf32>
    %16 = arith.addf %14, %15 : vector<16x1xf32>
    %17 = math.rsqrt %16 : vector<16x1xf32>
    %18 = vector.broadcast %17 : vector<16x1xf32> to vector<16x32xf32>
    %19 = arith.mulf %9, %18 : vector<16x32xf32>
    %20 = vector.broadcast %2 : vector<1x32xf32> to vector<16x32xf32>
    %21 = arith.mulf %19, %20 : vector<16x32xf32>
    %22 = vector.broadcast %3 : vector<1x32xf32> to vector<16x32xf32>
    %23 = arith.addf %21, %22 : vector<16x32xf32>
    %24 = arith.truncf %23 : vector<16x32xf32> to vector<16x32xbf16>
    %c0_10 = arith.constant 0 : index
    %c0_11 = arith.constant 0 : index
    %25 = vector.load %arg4[%c0_10, %c0_11] : memref<32x96xbf16, #tpu.memory_space<vmem>>, vector<32x96xbf16>
    %cst_12 = arith.constant dense<0.000000e+00> : vector<16x96xf32>
    %26 = tpu.matmul %24, %25, %cst_12 {dimension_numbers = #tpu.dot_dimension_numbers<[1], [0], [0], [1], [0, 0, 1, 1], [], []>} : vector<16x32xbf16>, vector<32x96xbf16>, vector<16x96xf32> -> vector<16x96xf32>
    %c0_13 = arith.constant 0 : index
    %c0_14 = arith.constant 0 : index
    %27 = vector.load %arg5[%c0_13, %c0_14] : memref<1x96xf32, #tpu.memory_space<vmem>>, vector<1x96xf32>
    %28 = vector.broadcast %27 : vector<1x96xf32> to vector<16x96xf32>
    %29 = arith.addf %26, %28 : vector<16x96xf32>
    %30 = vector.extract_strided_slice %29 {offsets = [0, 0], sizes = [16, 32], strides = [1, 1]} : vector<16x96xf32> to vector<16x32xf32>
    %31 = vector.shape_cast %30 : vector<16x32xf32> to vector<2x8x4x8xf32>
    %32 = tpu.transpose %31, [0, 2, 1, 3] : vector<2x8x4x8xf32> -> vector<2x4x8x8xf32>
    %33 = vector.shape_cast %32 : vector<2x4x8x8xf32> to vector<8x8x8xf32>
    %34 = arith.truncf %33 : vector<8x8x8xf32> to vector<8x8x8xbf16>
    %35 = vector.extract_strided_slice %29 {offsets = [0, 32], sizes = [16, 32], strides = [1, 1]} : vector<16x96xf32> to vector<16x32xf32>
    %36 = vector.shape_cast %35 : vector<16x32xf32> to vector<2x8x4x8xf32>
    %37 = tpu.transpose %36, [0, 2, 1, 3] : vector<2x8x4x8xf32> -> vector<2x4x8x8xf32>
    %38 = vector.shape_cast %37 : vector<2x4x8x8xf32> to vector<8x8x8xf32>
    %39 = arith.truncf %38 : vector<8x8x8xf32> to vector<8x8x8xbf16>
    %40 = vector.extract_strided_slice %29 {offsets = [0, 64], sizes = [16, 32], strides = [1, 1]} : vector<16x96xf32> to vector<16x32xf32>
    %41 = vector.shape_cast %40 : vector<16x32xf32> to vector<2x8x4x8xf32>
    %42 = tpu.transpose %41, [0, 2, 1, 3] : vector<2x8x4x8xf32> -> vector<2x4x8x8xf32>
    %43 = vector.shape_cast %42 : vector<2x4x8x8xf32> to vector<8x8x8xf32>
    %44 = arith.truncf %43 : vector<8x8x8xf32> to vector<8x8x8xbf16>
    "tpu.trace_start"() <{level = 10 : i32, message = "hqc,hkc->hqk"}> : () -> ()
    %cst_15 = arith.constant dense<0.000000e+00> : vector<8x8x8xf32>
    %45 = tpu.matmul %34, %39, %cst_15 {dimension_numbers = #tpu.dot_dimension_numbers<[2], [2], [1], [1], [0, 0, 0, 1, 1, 1], [0], [0]>} : vector<8x8x8xbf16>, vector<8x8x8xbf16>, vector<8x8x8xf32> -> vector<8x8x8xf32>
    "tpu.trace_stop"() : () -> ()
    %cst_16 = arith.constant dense<0xFF800000> : vector<8x8xf32>
    %46 = vector.multi_reduction <maximumf>, %45, %cst_16 [2] : vector<8x8x8xf32> to vector<8x8xf32>
    %47 = vector.shape_cast %46 : vector<8x8xf32> to vector<8x8x1xf32>
    %48 = vector.broadcast %47 : vector<8x8x1xf32> to vector<8x8x8xf32>
    %49 = arith.subf %45, %48 : vector<8x8x8xf32>
    %50 = math.exp %49 : vector<8x8x8xf32>
    %cst_17 = arith.constant dense<0.000000e+00> : vector<8x8xf32>
    %51 = vector.multi_reduction <add>, %50, %cst_17 [2] : vector<8x8x8xf32> to vector<8x8xf32>
    %52 = vector.shape_cast %51 : vector<8x8xf32> to vector<8x8x1xf32>
    %53 = tpu.reciprocal %52 {approx = true} : vector<8x8x1xf32> -> vector<8x8x1xf32>
    %54 = vector.broadcast %53 : vector<8x8x1xf32> to vector<8x8x8xf32>
    %55 = arith.mulf %50, %54 : vector<8x8x8xf32>
    %56 = arith.truncf %55 : vector<8x8x8xf32> to vector<8x8x8xbf16>
    "tpu.trace_start"() <{level = 10 : i32, message = "hqk,hkc->hqc"}> : () -> ()
    %cst_18 = arith.constant dense<0.000000e+00> : vector<8x8x8xf32>
    %57 = tpu.matmul %56, %44, %cst_18 {dimension_numbers = #tpu.dot_dimension_numbers<[2], [1], [1], [2], [0, 0, 0, 1, 1, 2], [0], [0]>} : vector<8x8x8xbf16>, vector<8x8x8xbf16>, vector<8x8x8xf32> -> vector<8x8x8xf32>
    "tpu.trace_stop"() : () -> ()
    %58 = vector.shape_cast %57 : vector<8x8x8xf32> to vector<2x4x8x8xf32>
    %59 = tpu.transpose %58, [0, 2, 1, 3] : vector<2x4x8x8xf32> -> vector<2x8x4x8xf32>
    %60 = vector.shape_cast %59 : vector<2x8x4x8xf32> to vector<16x32xf32>
    %61 = arith.truncf %60 : vector<16x32xf32> to vector<16x32xbf16>
    %c0_19 = arith.constant 0 : index
    %c0_20 = arith.constant 0 : index
    %62 = vector.load %arg6[%c0_19, %c0_20] : memref<32x32xbf16, #tpu.memory_space<vmem>>, vector<32x32xbf16>
    %cst_21 = arith.constant dense<0.000000e+00> : vector<16x32xf32>
    %63 = tpu.matmul %61, %62, %cst_21 {dimension_numbers = #tpu.dot_dimension_numbers<[1], [0], [0], [1], [0, 0, 1, 1], [], []>} : vector<16x32xbf16>, vector<32x32xbf16>, vector<16x32xf32> -> vector<16x32xf32>
    %c0_22 = arith.constant 0 : index
    %c0_23 = arith.constant 0 : index
    %64 = vector.load %arg7[%c0_22, %c0_23] : memref<1x32xf32, #tpu.memory_space<vmem>>, vector<1x32xf32>
    %65 = vector.broadcast %64 : vector<1x32xf32> to vector<16x32xf32>
    %66 = arith.addf %63, %65 : vector<16x32xf32>
    %67 = arith.addf %1, %66 : vector<16x32xf32>
    %c0_24 = arith.constant 0 : index
    %c0_25 = arith.constant 0 : index
    %68 = vector.load %arg8[%c0_24, %c0_25] : memref<1x32xf32, #tpu.memory_space<vmem>>, vector<1x32xf32>
    %c0_26 = arith.constant 0 : index
    %c0_27 = arith.constant 0 : index
    %69 = vector.load %arg9[%c0_26, %c0_27] : memref<1x32xf32, #tpu.memory_space<vmem>>, vector<1x32xf32>
    %cst_28 = arith.constant dense<0.000000e+00> : vector<16xf32>
    %70 = vector.multi_reduction <add>, %67, %cst_28 [1] : vector<16x32xf32> to vector<16xf32>
    %71 = vector.shape_cast %70 : vector<16xf32> to vector<16x1xf32>
    %cst_29 = arith.constant 3.200000e+01 : f32
    %72 = vector.broadcast %cst_29 : f32 to vector<16x1xf32>
    %73 = arith.divf %71, %72 : vector<16x1xf32>
    %74 = vector.broadcast %73 : vector<16x1xf32> to vector<16x32xf32>
    %75 = arith.subf %67, %74 : vector<16x32xf32>
    %76 = arith.mulf %75, %75 : vector<16x32xf32>
    %cst_30 = arith.constant dense<0.000000e+00> : vector<16xf32>
    %77 = vector.multi_reduction <add>, %76, %cst_30 [1] : vector<16x32xf32> to vector<16xf32>
    %78 = vector.shape_cast %77 : vector<16xf32> to vector<16x1xf32>
    %cst_31 = arith.constant 3.200000e+01 : f32
    %79 = vector.broadcast %cst_31 : f32 to vector<16x1xf32>
    %80 = arith.divf %78, %79 : vector<16x1xf32>
    %cst_32 = arith.constant 9.99999974E-6 : f32
    %81 = vector.broadcast %cst_32 : f32 to vector<16x1xf32>
    %82 = arith.addf %80, %81 : vector<16x1xf32>
    %83 = math.rsqrt %82 : vector<16x1xf32>
    %84 = vector.broadcast %83 : vector<16x1xf32> to vector<16x32xf32>
    %85 = arith.mulf %75, %84 : vector<16x32xf32>
    %86 = vector.broadcast %68 : vector<1x32xf32> to vector<16x32xf32>
    %87 = arith.mulf %85, %86 : vector<16x32xf32>
    %88 = vector.broadcast %69 : vector<1x32xf32> to vector<16x32xf32>
    %89 = arith.addf %87, %88 : vector<16x32xf32>
    %90 = arith.truncf %89 : vector<16x32xf32> to vector<16x32xbf16>
    %c0_33 = arith.constant 0 : index
    %c0_34 = arith.constant 0 : index
    %91 = vector.load %arg10[%c0_33, %c0_34] : memref<32x128xbf16, #tpu.memory_space<vmem>>, vector<32x128xbf16>
    %cst_35 = arith.constant dense<0.000000e+00> : vector<16x128xf32>
    %92 = tpu.matmul %90, %91, %cst_35 {dimension_numbers = #tpu.dot_dimension_numbers<[1], [0], [0], [1], [0, 0, 1, 1], [], []>} : vector<16x32xbf16>, vector<32x128xbf16>, vector<16x128xf32> -> vector<16x128xf32>
    %c0_36 = arith.constant 0 : index
    %c0_37 = arith.constant 0 : index
    %93 = vector.load %arg11[%c0_36, %c0_37] : memref<1x128xf32, #tpu.memory_space<vmem>>, vector<1x128xf32>
    %94 = vector.broadcast %93 : vector<1x128xf32> to vector<16x128xf32>
    %95 = arith.addf %92, %94 : vector<16x128xf32>
    %cst_38 = arith.constant 1.702000e+00 : f32
    %96 = vector.broadcast %cst_38 : f32 to vector<16x128xf32>
    %97 = arith.mulf %96, %95 : vector<16x128xf32>
    %98 = arith.negf %97 : vector<16x128xf32>
    %99 = math.exp %98 : vector<16x128xf32>
    %cst_39 = arith.constant 1.000000e+00 : f32
    %100 = vector.broadcast %cst_39 : f32 to vector<16x128xf32>
    %101 = arith.addf %100, %99 : vector<16x128xf32>
    %102 = arith.divf %100, %101 : vector<16x128xf32>
    %103 = arith.mulf %95, %102 : vector<16x128xf32>
    %104 = arith.truncf %103 : vector<16x128xf32> to vector<16x128xbf16>
    %c0_40 = arith.constant 0 : index
    %c0_41 = arith.constant 0 : index
    %105 = vector.load %arg12[%c0_40, %c0_41] : memref<128x32xbf16, #tpu.memory_space<vmem>>, vector<128x32xbf16>
    %cst_42 = arith.constant dense<0.000000e+00> : vector<16x32xf32>
    %106 = tpu.matmul %104, %105, %cst_42 {dimension_numbers = #tpu.dot_dimension_numbers<[1], [0], [0], [1], [0, 0, 1, 1], [], []>} : vector<16x128xbf16>, vector<128x32xbf16>, vector<16x32xf32> -> vector<16x32xf32>
    %c0_43 = arith.constant 0 : index
    %c0_44 = arith.constant 0 : index
    %107 = vector.load %arg13[%c0_43, %c0_44] : memref<1x32xf32, #tpu.memory_space<vmem>>, vector<1x32xf32>
    %108 = vector.broadcast %107 : vector<1x32xf32> to vector<16x32xf32>
    %109 = arith.addf %106, %108 : vector<16x32xf32>
    %110 = arith.addf %67, %109 : vector<16x32xf32>
    %111 = vector.shape_cast %110 : vector<16x32xf32> to vector<2x8x32xf32>
    %c0_45 = arith.constant 0 : index
    %c0_46 = arith.constant 0 : index
    %c0_47 = arith.constant 0 : index
    %112 = vector.load %arg14[%c0_45, %c0_46, %c0_47] : memref<2x8x32xf32, #tpu.memory_space<vmem>>, vector<2x8x32xf32>
    tpu.vector_store %arg14[%c0_45, %c0_46, %c0_47], %111 {strides = array<i32>} : memref<2x8x32xf32, #tpu.memory_space<vmem>>, vector<2x8x32xf32>,
    return
  }
  func.func @transform_0(%arg0: i32) -> (i32, i32, i32) {
    %c0_i32 = arith.constant 0 : i32
    %c0_i32_0 = arith.constant 0 : i32
    %c0_i32_1 = arith.constant 0 : i32
    return %arg0, %c0_i32, %c0_i32_0 : i32, i32, i32
  }
  func.func @transform_1(%arg0: i32) -> (i32, i32) {
    %c0_i32 = arith.constant 0 : i32
    %c0_i32_0 = arith.constant 0 : i32
    %c0_i32_1 = arith.constant 0 : i32
    return %c0_i32, %c0_i32_0 : i32, i32
  }
  func.func @transform_2(%arg0: i32) -> (i32, i32) {
    %c0_i32 = arith.constant 0 : i32
    %c0_i32_0 = arith.constant 0 : i32
    %c0_i32_1 = arith.constant 0 : i32
    return %c0_i32, %c0_i32_0 : i32, i32
  }
  func.func @transform_3(%arg0: i32) -> (i32, i32) {
    %c0_i32 = arith.constant 0 : i32
    %c0_i32_0 = arith.constant 0 : i32
    %c0_i32_1 = arith.constant 0 : i32
    return %c0_i32, %c0_i32_0 : i32, i32
  }
  func.func @transform_4(%arg0: i32) -> (i32, i32) {
    %c0_i32 = arith.constant 0 : i32
    %c0_i32_0 = arith.constant 0 : i32
    %c0_i32_1 = arith.constant 0 : i32
    return %c0_i32, %c0_i32_0 : i32, i32
  }
  func.func @transform_5(%arg0: i32) -> (i32, i32) {
    %c0_i32 = arith.constant 0 : i32
    %c0_i32_0 = arith.constant 0 : i32
    %c0_i32_1 = arith.constant 0 : i32
    return %c0_i32, %c0_i32_0 : i32, i32
  }
  func.func @transform_6(%arg0: i32) -> (i32, i32) {
    %c0_i32 = arith.constant 0 : i32
    %c0_i32_0 = arith.constant 0 : i32
    %c0_i32_1 = arith.constant 0 : i32
    return %c0_i32, %c0_i32_0 : i32, i32
  }
  func.func @transform_7(%arg0: i32) -> (i32, i32) {
    %c0_i32 = arith.constant 0 : i32
    %c0_i32_0 = arith.constant 0 : i32
    %c0_i32_1 = arith.constant 0 : i32
    return %c0_i32, %c0_i32_0 : i32, i32
  }
  func.func @transform_8(%arg0: i32) -> (i32, i32) {
    %c0_i32 = arith.constant 0 : i32
    %c0_i32_0 = arith.constant 0 : i32
    %c0_i32_1 = arith.constant 0 : i32
    return %c0_i32, %c0_i32_0 : i32, i32
  }
  func.func @transform_9(%arg0: i32) -> (i32, i32) {
    %c0_i32 = arith.constant 0 : i32
    %c0_i32_0 = arith.constant 0 : i32
    %c0_i32_1 = arith.constant 0 : i32
    return %c0_i32, %c0_i32_0 : i32, i32
  }
  func.func @transform_10(%arg0: i32) -> (i32, i32) {
    %c0_i32 = arith.constant 0 : i32
    %c0_i32_0 = arith.constant 0 : i32
    %c0_i32_1 = arith.constant 0 : i32
    return %c0_i32, %c0_i32_0 : i32, i32
  }
  func.func @transform_11(%arg0: i32) -> (i32, i32) {
    %c0_i32 = arith.constant 0 : i32
    %c0_i32_0 = arith.constant 0 : i32
    %c0_i32_1 = arith.constant 0 : i32
    return %c0_i32, %c0_i32_0 : i32, i32
  }
  func.func @transform_12(%arg0: i32) -> (i32, i32) {
    %c0_i32 = arith.constant 0 : i32
    %c0_i32_0 = arith.constant 0 : i32
    %c0_i32_1 = arith.constant 0 : i32
    return %c0_i32, %c0_i32_0 : i32, i32
  }
  func.func @transform_13(%arg0: i32) -> (i32, i32, i32) {
    %c0_i32 = arith.constant 0 : i32
    %c0_i32_0 = arith.constant 0 : i32
    %c0_i32_1 = arith.constant 0 : i32
    return %arg0, %c0_i32, %c0_i32_0 : i32, i32, i32
  }
}

module attributes {stable_mosaic.version = 11 : i64} {
  func.func @_block_kernel(%arg0: i32, %arg1: memref<2x8x32xf32, #tpu.memory_space<vmem>>, %arg2: memref<1x32xf32, #tpu.memory_space<vmem>>, %arg3: memref<1x32xf32, #tpu.memory_space<vmem>>, %arg4: memref<32x96xbf16, #tpu.memory_space<vmem>>, %arg5: memref<1x96xf32, #tpu.memory_space<vmem>>, %arg6: memref<32x32xbf16, #tpu.memory_space<vmem>>, %arg7: memref<1x32xf32, #tpu.memory_space<vmem>>, %arg8: memref<1x32xf32, #tpu.memory_space<vmem>>, %arg9: memref<1x32xf32, #tpu.memory_space<vmem>>, %arg10: memref<32x128xbf16, #tpu.memory_space<vmem>>, %arg11: memref<1x128xf32, #tpu.memory_space<vmem>>, %arg12: memref<128x32xbf16, #tpu.memory_space<vmem>>, %arg13: memref<1x32xf32, #tpu.memory_space<vmem>>, %arg14: memref<2x8x32xf32, #tpu.memory_space<vmem>>) attributes {dimension_semantics = [#tpu.dimension_semantics<parallel>], iteration_bounds = array<i64: 1>, scalar_prefetch = 0 : i64, scratch_operands = 0 : i64, tpu.core_type = #tpu.core_type<tc>, window_params = [{transform_indices = @transform_0, window_bounds = array<i64: 2, 8, 32>}, {pipeline_mode = #tpu.pipeline_mode<synchronous>, transform_indices = @transform_1, window_bounds = array<i64: 1, 32>}, {pipeline_mode = #tpu.pipeline_mode<synchronous>, transform_indices = @transform_2, window_bounds = array<i64: 1, 32>}, {pipeline_mode = #tpu.pipeline_mode<synchronous>, transform_indices = @transform_3, window_bounds = array<i64: 32, 96>}, {pipeline_mode = #tpu.pipeline_mode<synchronous>, transform_indices = @transform_4, window_bounds = array<i64: 1, 96>}, {pipeline_mode = #tpu.pipeline_mode<synchronous>, transform_indices = @transform_5, window_bounds = array<i64: 32, 32>}, {pipeline_mode = #tpu.pipeline_mode<synchronous>, transform_indices = @transform_6, window_bounds = array<i64: 1, 32>}, {pipeline_mode = #tpu.pipeline_mode<synchronous>, transform_indices = @transform_7, window_bounds = array<i64: 1, 32>}, {pipeline_mode = #tpu.pipeline_mode<synchronous>, transform_indices = @transform_8, window_bounds = array<i64: 1, 32>}, {pipeline_mode = #tpu.pipeline_mode<synchronous>, transform_indices = @transform_9, window_bounds = array<i64: 32, 128>}, {pipeline_mode = #tpu.pipeline_mode<synchronous>, transform_indices = @transform_10, window_bounds = array<i64: 1, 128>}, {pipeline_mode = #tpu.pipeline_mode<synchronous>, transform_indices = @transform_11, window_bounds = array<i64: 128, 32>}, {pipeline_mode = #tpu.pipeline_mode<synchronous>, transform_indices = @transform_12, window_bounds = array<i64: 1, 32>}, {transform_indices = @transform_13, window_bounds = array<i64: 2, 8, 32>}]} {
    %c0 = arith.constant 0 : index
    %c0_0 = arith.constant 0 : index
    %c0_1 = arith.constant 0 : index
    %0 = vector.load %arg1[%c0, %c0_0, %c0_1] : memref<2x8x32xf32, #tpu.memory_space<vmem>>, vector<2x8x32xf32>
    %1 = vector.shape_cast %0 : vector<2x8x32xf32> to vector<16x32xf32>
    %c0_2 = arith.constant 0 : index
    %c0_3 = arith.constant 0 : index
    %2 = vector.load %arg2[%c0_2, %c0_3] : memref<1x32xf32, #tpu.memory_space<vmem>>, vector<1x32xf32>
    %c0_4 = arith.constant 0 : index
    %c0_5 = arith.constant 0 : index
    %3 = vector.load %arg3[%c0_4, %c0_5] : memref<1x32xf32, #tpu.memory_space<vmem>>, vector<1x32xf32>
    %cst = arith.constant dense<0.000000e+00> : vector<16xf32>
    %4 = vector.multi_reduction <add>, %1, %cst [1] : vector<16x32xf32> to vector<16xf32>
    %5 = vector.shape_cast %4 : vector<16xf32> to vector<16x1xf32>
    %cst_6 = arith.constant 3.200000e+01 : f32
    %6 = vector.broadcast %cst_6 : f32 to vector<16x1xf32>
    %7 = arith.divf %5, %6 : vector<16x1xf32>
    %8 = vector.broadcast %7 : vector<16x1xf32> to vector<16x32xf32>
    %9 = arith.subf %1, %8 : vector<16x32xf32>
    %10 = arith.mulf %9, %9 : vector<16x32xf32>
    %cst_7 = arith.constant dense<0.000000e+00> : vector<16xf32>
    %11 = vector.multi_reduction <add>, %10, %cst_7 [1] : vector<16x32xf32> to vector<16xf32>
    %12 = vector.shape_cast %11 : vector<16xf32> to vector<16x1xf32>
    %cst_8 = arith.constant 3.200000e+01 : f32
    %13 = vector.broadcast %cst_8 : f32 to vector<16x1xf32>
    %14 = arith.divf %12, %13 : vector<16x1xf32>
    %cst_9 = arith.constant 9.99999974E-6 : f32
    %15 = vector.broadcast %cst_9 : f32 to vector<16x1xf32>
    %16 = arith.addf %14, %15 : vector<16x1xf32>
    %17 = math.rsqrt %16 : vector<16x1xf32>
    %18 = vector.broadcast %17 : vector<16x1xf32> to vector<16x32xf32>
    %19 = arith.mulf %9, %18 : vector<16x32xf32>
    %20 = vector.broadcast %2 : vector<1x32xf32> to vector<16x32xf32>
    %21 = arith.mulf %19, %20 : vector<16x32xf32>
    %22 = vector.broadcast %3 : vector<1x32xf32> to vector<16x32xf32>
    %23 = arith.addf %21, %22 : vector<16x32xf32>
    %24 = arith.truncf %23 : vector<16x32xf32> to vector<16x32xbf16>
    %c0_10 = arith.constant 0 : index
    %c0_11 = arith.constant 0 : index
    %25 = vector.load %arg4[%c0_10, %c0_11] : memref<32x96xbf16, #tpu.memory_space<vmem>>, vector<32x96xbf16>
    %cst_12 = arith.constant dense<0.000000e+00> : vector<16x96xf32>
    %26 = tpu.matmul %24, %25, %cst_12 {dimension_numbers = #tpu.dot_dimension_numbers<[1], [0], [0], [1], [0, 0, 1, 1], [], []>} : vector<16x32xbf16>, vector<32x96xbf16>, vector<16x96xf32> -> vector<16x96xf32>
    %c0_13 = arith.constant 0 : index
    %c0_14 = arith.constant 0 : index
    %27 = vector.load %arg5[%c0_13, %c0_14] : memref<1x96xf32, #tpu.memory_space<vmem>>, vector<1x96xf32>
    %28 = vector.broadcast %27 : vector<1x96xf32> to vector<16x96xf32>
    %29 = arith.addf %26, %28 : vector<16x96xf32>
    %30 = vector.extract_strided_slice %29 {offsets = [0, 0], sizes = [16, 32], strides = [1, 1]} : vector<16x96xf32> to vector<16x32xf32>
    %31 = vector.shape_cast %30 : vector<16x32xf32> to vector<2x8x4x8xf32>
    %32 = tpu.transpose %31, [0, 2, 1, 3] : vector<2x8x4x8xf32> -> vector<2x4x8x8xf32>
    %33 = vector.shape_cast %32 : vector<2x4x8x8xf32> to vector<8x8x8xf32>
    %34 = arith.truncf %33 : vector<8x8x8xf32> to vector<8x8x8xbf16>
    %35 = vector.extract_strided_slice %29 {offsets = [0, 32], sizes = [16, 32], strides = [1, 1]} : vector<16x96xf32> to vector<16x32xf32>
    %36 = vector.shape_cast %35 : vector<16x32xf32> to vector<2x8x4x8xf32>
    %37 = tpu.transpose %36, [0, 2, 1, 3] : vector<2x8x4x8xf32> -> vector<2x4x8x8xf32>
    %38 = vector.shape_cast %37 : vector<2x4x8x8xf32> to vector<8x8x8xf32>
    %39 = arith.truncf %38 : vector<8x8x8xf32> to vector<8x8x8xbf16>
    %40 = vector.extract_strided_slice %29 {offsets = [0, 64], sizes = [16, 32], strides = [1, 1]} : vector<16x96xf32> to vector<16x32xf32>
    %41 = vector.shape_cast %40 : vector<16x32xf32> to vector<2x8x4x8xf32>
    %42 = tpu.transpose %41, [0, 2, 1, 3] : vector<2x8x4x8xf32> -> vector<2x4x8x8xf32>
    %43 = vector.shape_cast %42 : vector<2x4x8x8xf32> to vector<8x8x8xf32>
    %44 = arith.truncf %43 : vector<8x8x8xf32> to vector<8x8x8xbf16>
    "tpu.trace_start"() <{level = 10 : i32, message = "hqc,hkc->hqk"}> : () -> ()
    %cst_15 = arith.constant dense<0.000000e+00> : vector<8x8x8xf32>
    %45 = tpu.matmul %34, %39, %cst_15 {dimension_numbers = #tpu.dot_dimension_numbers<[2], [2], [1], [1], [0, 0, 0, 1, 1, 1], [0], [0]>} : vector<8x8x8xbf16>, vector<8x8x8xbf16>, vector<8x8x8xf32> -> vector<8x8x8xf32>
    "tpu.trace_stop"() : () -> ()
    %cst_16 = arith.constant dense<0xFF800000> : vector<8x8xf32>
    %46 = vector.multi_reduction <maximumf>, %45, %cst_16 [2] : vector<8x8x8xf32> to vector<8x8xf32>
    %47 = vector.shape_cast %46 : vector<8x8xf32> to vector<8x8x1xf32>
    %48 = vector.broadcast %47 : vector<8x8x1xf32> to vector<8x8x8xf32>
    %49 = arith.subf %45, %48 : vector<8x8x8xf32>
    %50 = math.exp %49 : vector<8x8x8xf32>
    %cst_17 = arith.constant dense<0.000000e+00> : vector<8x8xf32>
    %51 = vector.multi_reduction <add>, %50, %cst_17 [2] : vector<8x8x8xf32> to vector<8x8xf32>
    %52 = vector.shape_cast %51 : vector<8x8xf32> to vector<8x8x1xf32>
    %53 = tpu.reciprocal %52 {approx = true} : vector<8x8x1xf32> -> vector<8x8x1xf32>
    %54 = vector.broadcast %53 : vector<8x8x1xf32> to vector<8x8x8xf32>
    %55 = arith.mulf %50, %54 : vector<8x8x8xf32>
    %56 = arith.truncf %55 : vector<8x8x8xf32> to vector<8x8x8xbf16>
    "tpu.trace_start"() <{level = 10 : i32, message = "hqk,hkc->hqc"}> : () -> ()
    %cst_18 = arith.constant dense<0.000000e+00> : vector<8x8x8xf32>
    %57 = tpu.matmul %56, %44, %cst_18 {dimension_numbers = #tpu.dot_dimension_numbers<[2], [1], [1], [2], [0, 0, 0, 1, 1, 2], [0], [0]>} : vector<8x8x8xbf16>, vector<8x8x8xbf16>, vector<8x8x8xf32> -> vector<8x8x8xf32>
    "tpu.trace_stop"() : () -> ()
    %58 = vector.shape_cast %57 : vector<8x8x8xf32> to vector<2x4x8x8xf32>
    %59 = tpu.transpose %58, [0, 2, 1, 3] : vector<2x4x8x8xf32> -> vector<2x8x4x8xf32>
    %60 = vector.shape_cast %59 : vector<2x8x4x8xf32> to vector<16x32xf32>
    %61 = arith.truncf %60 : vector<16x32xf32> to vector<16x32xbf16>
    %c0_19 = arith.constant 0 : index
    %c0_20 = arith.constant 0 : index
    %62 = vector.load %arg6[%c0_19, %c0_20] : memref<32x32xbf16, #tpu.memory_space<vmem>>, vector<32x32xbf16>
    %cst_21 = arith.constant dense<0.000000e+00> : vector<16x32xf32>
    %63 = tpu.matmul %61, %62, %cst_21 {dimension_numbers = #tpu.dot_dimension_numbers<[1], [0], [0], [1], [0, 0, 1, 1], [], []>} : vector<16x32xbf16>, vector<32x32xbf16>, vector<16x32xf32> -> vector<16x32xf32>
    %c0_22 = arith.constant 0 : index
    %c0_23 = arith.constant 0 : index
    %64 = vector.load %arg7[%c0_22, %c0_23] : memref<1x32xf32, #tpu.memory_space<vmem>>, vector<1x32xf32>
    %65 = vector.broadcast %64 : vector<1x32xf32> to vector<16x32xf32>
    %66 = arith.addf %63, %65 : vector<16x32xf32>
    %67 = arith.addf %1, %66 : vector<16x32xf32>
    %c0_24 = arith.constant 0 : index
    %c0_25 = arith.constant 0 : index
    %68 = vector.load %arg8[%c0_24, %c0_25] : memref<1x32xf32, #tpu.memory_space<vmem>>, vector<1x32xf32>
    %c0_26 = arith.constant 0 : index
    %c0_27 = arith.constant 0 : index
    %69 = vector.load %arg9[%c0_26, %c0_27] : memref<1x32xf32, #tpu.memory_space<vmem>>, vector<1x32xf32>
    %cst_28 = arith.constant dense<0.000000e+00> : vector<16xf32>
    %70 = vector.multi_reduction <add>, %67, %cst_28 [1] : vector<16x32xf32> to vector<16xf32>
    %71 = vector.shape_cast %70 : vector<16xf32> to vector<16x1xf32>
    %cst_29 = arith.constant 3.200000e+01 : f32
    %72 = vector.broadcast %cst_29 : f32 to vector<16x1xf32>
    %73 = arith.divf %71, %72 : vector<16x1xf32>
    %74 = vector.broadcast %73 : vector<16x1xf32> to vector<16x32xf32>
    %75 = arith.subf %67, %74 : vector<16x32xf32>
    %76 = arith.mulf %75, %75 : vector<16x32xf32>
    %cst_30 = arith.constant dense<0.000000e+00> : vector<16xf32>
    %77 = vector.multi_reduction <add>, %76, %cst_30 [1] : vector<16x32xf32> to vector<16xf32>
    %78 = vector.shape_cast %77 : vector<16xf32> to vector<16x1xf32>
    %cst_31 = arith.constant 3.200000e+01 : f32
    %79 = vector.broadcast %cst_31 : f32 to vector<16x1xf32>
    %80 = arith.divf %78, %79 : vector<16x1xf32>
    %cst_32 = arith.constant 9.99999974E-6 : f32
    %81 = vector.broadcast %cst_32 : f32 to vector<16x1xf32>
    %82 = arith.addf %80, %81 : vector<16x1xf32>
    %83 = math.rsqrt %82 : vector<16x1xf32>
    %84 = vector.broadcast %83 : vector<16x1xf32> to vector<16x32xf32>
    %85 = arith.mulf %75, %84 : vector<16x32xf32>
    %86 = vector.broadcast %68 : vector<1x32xf32> to vector<16x32xf32>
    %87 = arith.mulf %85, %86 : vector<16x32xf32>
    %88 = vector.broadcast %69 : vector<1x32xf32> to vector<16x32xf32>
    %89 = arith.addf %87, %88 : vector<16x32xf32>
    %90 = arith.truncf %89 : vector<16x32xf32> to vector<16x32xbf16>
    %c0_33 = arith.constant 0 : index
    %c0_34 = arith.constant 0 : index
    %91 = vector.load %arg10[%c0_33, %c0_34] : memref<32x128xbf16, #tpu.memory_space<vmem>>, vector<32x128xbf16>
    %cst_35 = arith.constant dense<0.000000e+00> : vector<16x128xf32>
    %92 = tpu.matmul %90, %91, %cst_35 {dimension_numbers = #tpu.dot_dimension_numbers<[1], [0], [0], [1], [0, 0, 1, 1], [], []>} : vector<16x32xbf16>, vector<32x128xbf16>, vector<16x128xf32> -> vector<16x128xf32>
    %c0_36 = arith.constant 0 : index
    %c0_37 = arith.constant 0 : index
    %93 = vector.load %arg11[%c0_36, %c0_37] : memref<1x128xf32, #tpu.memory_space<vmem>>, vector<1x128xf32>
    %94 = vector.broadcast %93 : vector<1x128xf32> to vector<16x128xf32>
    %95 = arith.addf %92, %94 : vector<16x128xf32>
    %cst_38 = arith.constant 1.702000e+00 : f32
    %96 = vector.broadcast %cst_38 : f32 to vector<16x128xf32>
    %97 = arith.mulf %96, %95 : vector<16x128xf32>
    %98 = arith.negf %97 : vector<16x128xf32>
    %99 = math.exp %98 : vector<16x128xf32>
    %cst_39 = arith.constant 1.000000e+00 : f32
    %100 = vector.broadcast %cst_39 : f32 to vector<16x128xf32>
    %101 = arith.addf %100, %99 : vector<16x128xf32>
    %102 = arith.divf %100, %101 : vector<16x128xf32>
    %103 = arith.mulf %95, %102 : vector<16x128xf32>
    %104 = arith.truncf %103 : vector<16x128xf32> to vector<16x128xbf16>
    %c0_40 = arith.constant 0 : index
    %c0_41 = arith.constant 0 : index
    %105 = vector.load %arg12[%c0_40, %c0_41] : memref<128x32xbf16, #tpu.memory_space<vmem>>, vector<128x32xbf16>
    %cst_42 = arith.constant dense<0.000000e+00> : vector<16x32xf32>
    %106 = tpu.matmul %104, %105, %cst_42 {dimension_numbers = #tpu.dot_dimension_numbers<[1], [0], [0], [1], [0, 0, 1, 1], [], []>} : vector<16x128xbf16>, vector<128x32xbf16>, vector<16x32xf32> -> vector<16x32xf32>
    %c0_43 = arith.constant 0 : index
    %c0_44 = arith.constant 0 : index
    %107 = vector.load %arg13[%c0_43, %c0_44] : memref<1x32xf32, #tpu.memory_space<vmem>>, vector<1x32xf32>
    %108 = vector.broadcast %107 : vector<1x32xf32> to vector<16x32xf32>
    %109 = arith.addf %106, %108 : vector<16x32xf32>
    %110 = arith.addf %67, %109 : vector<16x32xf32>
    %111 = vector.shape_cast %110 : vector<16x32xf32> to vector<2x8x32xf32>
    %c0_45 = arith.constant 0 : index
    %c0_46 = arith.constant 0 : index
    %c0_47 = arith.constant 0 : index
    %112 = vector.load %arg14[%c0_45, %c0_46, %c0_47] : memref<2x8x32xf32, #tpu.memory_space<vmem>>, vector<2x8x32xf32>
    tpu.vector_store %arg14[%c0_45, %c0_46, %c0_47], %111 {strides = array<i32>} : memref<2x8x32xf32, #tpu.memory_space<vmem>>, vector<2x8x32xf32>,
    return
  }
  func.func @transform_0(%arg0: i32) -> (i32, i32, i32) {
    %c0_i32 = arith.constant 0 : i32
    %c0_i32_0 = arith.constant 0 : i32
    %c0_i32_1 = arith.constant 0 : i32
    return %arg0, %c0_i32, %c0_i32_0 : i32, i32, i32
  }
  func.func @transform_1(%arg0: i32) -> (i32, i32) {
    %c0_i32 = arith.constant 0 : i32
    %c0_i32_0 = arith.constant 0 : i32
    %c0_i32_1 = arith.constant 0 : i32
    return %c0_i32, %c0_i32_0 : i32, i32
  }
  func.func @transform_2(%arg0: i32) -> (i32, i32) {
    %c0_i32 = arith.constant 0 : i32
    %c0_i32_0 = arith.constant 0 : i32
    %c0_i32_1 = arith.constant 0 : i32
    return %c0_i32, %c0_i32_0 : i32, i32
  }
  func.func @transform_3(%arg0: i32) -> (i32, i32) {
    %c0_i32 = arith.constant 0 : i32
    %c0_i32_0 = arith.constant 0 : i32
    %c0_i32_1 = arith.constant 0 : i32
    return %c0_i32, %c0_i32_0 : i32, i32
  }
  func.func @transform_4(%arg0: i32) -> (i32, i32) {
    %c0_i32 = arith.constant 0 : i32
    %c0_i32_0 = arith.constant 0 : i32
    %c0_i32_1 = arith.constant 0 : i32
    return %c0_i32, %c0_i32_0 : i32, i32
  }
  func.func @transform_5(%arg0: i32) -> (i32, i32) {
    %c0_i32 = arith.constant 0 : i32
    %c0_i32_0 = arith.constant 0 : i32
    %c0_i32_1 = arith.constant 0 : i32
    return %c0_i32, %c0_i32_0 : i32, i32
  }
  func.func @transform_6(%arg0: i32) -> (i32, i32) {
    %c0_i32 = arith.constant 0 : i32
    %c0_i32_0 = arith.constant 0 : i32
    %c0_i32_1 = arith.constant 0 : i32
    return %c0_i32, %c0_i32_0 : i32, i32
  }
  func.func @transform_7(%arg0: i32) -> (i32, i32) {
    %c0_i32 = arith.constant 0 : i32
    %c0_i32_0 = arith.constant 0 : i32
    %c0_i32_1 = arith.constant 0 : i32
    return %c0_i32, %c0_i32_0 : i32, i32
  }
  func.func @transform_8(%arg0: i32) -> (i32, i32) {
    %c0_i32 = arith.constant 0 : i32
    %c0_i32_0 = arith.constant 0 : i32
    %c0_i32_1 = arith.constant 0 : i32
    return %c0_i32, %c0_i32_0 : i32, i32
  }
  func.func @transform_9(%arg0: i32) -> (i32, i32) {
    %c0_i32 = arith.constant 0 : i32
    %c0_i32_0 = arith.constant 0 : i32
    %c0_i32_1 = arith.constant 0 : i32
    return %c0_i32, %c0_i32_0 : i32, i32
  }
  func.func @transform_10(%arg0: i32) -> (i32, i32) {
    %c0_i32 = arith.constant 0 : i32
    %c0_i32_0 = arith.constant 0 : i32
    %c0_i32_1 = arith.constant 0 : i32
    return %c0_i32, %c0_i32_0 : i32, i32
  }
  func.func @transform_11(%arg0: i32) -> (i32, i32) {
    %c0_i32 = arith.constant 0 : i32
    %c0_i32_0 = arith.constant 0 : i32
    %c0_i32_1 = arith.constant 0 : i32
    return %c0_i32, %c0_i32_0 : i32, i32
  }
  func.func @transform_12(%arg0: i32) -> (i32, i32) {
    %c0_i32 = arith.constant 0 : i32
    %c0_i32_0 = arith.constant 0 : i32
    %c0_i32_1 = arith.constant 0 : i32
    return %c0_i32, %c0_i32_0 : i32, i32
  }
  func.func @transform_13(%arg0: i32) -> (i32, i32, i32) {
    %c0_i32 = arith.constant 0 : i32
    %c0_i32_0 = arith.constant 0 : i32
    %c0_i32_1 = arith.constant 0 : i32
    return %arg0, %c0_i32, %c0_i32_0 : i32, i32, i32
  }
}

</mosaic_0001>

<bundles_post_ra>
// kernel: transformer_forward.2
= control target key start
LH: loop header
LB: loop body
LE: loop exit
PB: predicated region body
PF: predicated region fallthrough
CT: control target
= control target key end

     0   :  { %vm49_vm0 = vcmask 261120   ;;  %v2040_v4 = vmov 32.0   ;;  %s2042_s21 = smov 120   ;;  %v2045_v60 = vmov 1983009808   ;;  %vm170_vm8 = vcmask 1047556   ;;  %s2723_s0 = inlined_call_operand.vmem [shape: f32[2,8,32], index: 0, kind: input, shape index: {}]   ;;  %s2724_s1 = inlined_call_operand.vmem [shape: f32[1,32], index: 1, kind: input, shape index: {}]   ;;  %s2725_s2 = inlined_call_operand.vmem [shape: f32[1,32], index: 2, kind: input, shape index: {}]   ;;  %s2726_s4 = inlined_call_operand.vmem [shape: f32[1,96], index: 4, kind: input, shape index: {}]   ;;  %s2727_s3 = inlined_call_operand.vmem [shape: bf16[32,96], index: 3, kind: input, shape index: {}]   ;;  %s2728_s6 = inlined_call_operand.vmem [shape: f32[1,32], index: 6, kind: input, shape index: {}]   ;;  %s2729_s5 = inlined_call_operand.vmem [shape: bf16[32,32], index: 5, kind: input, shape index: {}]   ;;  %s2730_s7 = inlined_call_operand.vmem [shape: f32[1,32], index: 7, kind: input, shape index: {}]   ;;  %s2731_s8 = inlined_call_operand.vmem [shape: f32[1,32], index: 8, kind: input, shape index: {}]   ;;  %s2732_s10 = inlined_call_operand.vmem [shape: f32[1,128], index: 10, kind: input, shape index: {}]   ;;  %s2733_s9 = inlined_call_operand.vmem [shape: bf16[32,128], index: 9, kind: input, shape index: {}]   ;;  %s2734_s12 = inlined_call_operand.vmem [shape: f32[1,32], index: 12, kind: input, shape index: {}]   ;;  %s2735_s11 = inlined_call_operand.vmem [shape: bf16[128,32], index: 11, kind: input, shape index: {}]   ;;  %s2736_s13 = inlined_call_operand.vmem [shape: f32[2,8,32], index: 13, kind: output, shape index: {}]  }
   0x1   :  { %v45_v0 = vld [vmem:[%s2723_s0] sm:$0xff]  ;;  %v46_v2 = vld [vmem:[%s2723_s0 + $0x8] sm:$0xff]  ;;  %1988 = vrcp.f32 %v2040_v4  ;;  %v175_v61 = vunpack.c.l.s4 %v2045_v60  ;;  %v2046_v4 = vmov 1934713408   ;;  %vm902_vm9 = vcmask 64512   ;;  %s2047_s22 = smov 64  }
   0x2   :  { %v50_v1 = vsel %vm49_vm0, %v45_v0, 0.0  ;;  %v53_v3 = vsel %vm49_vm0, %v46_v2, 0.0  ;;  %v1901_v21 = vld [vmem:[%s2727_s3 + $0x8] sm:$0xff]  ;;  %v1900_v23 = vld [vmem:[%s2727_s3] sm:$0xff]  ;;  %vm1154_vm10 = vcmask 1043456   ;;  %s2048_s23 = smov 16  }
   0x3   :  { %51 = vadd.xlane.f32.xlu0 %v50_v1  ;;  %141 = vmatpush.bf16.msra.mxu0 %v1901_v21  ;;  %v1980_v42 = vld [vmem:[%s2724_s1] ss:$0 sm:$0xff]  ;;  %s2041_s1 = smov 104   ;;  %v2164_v1 = vunpack.c.0.s8 %v175_v61  ;;  %s2049_s24 = smov 24   ;;  %vm1550_vm11 = vcmask 130048   ;;  %vm1553_vm12 = vcmask 195584  }
   0x4   :  { %v1981_v47 = vld [vmem:[%s2725_s2] ss:$0 sm:$0xff]  ;;  %s2043_s2 = smov 112   ;;  %s2050_s25 = smov 8  }
   0x5   :  { %v1982_v52 = vld [vmem:[%s2726_s4] ss:$0 sm:$0xff]  ;;  %s2044_s4 = smov 96  }
   0x7   :  { %v1989_v5 = vpop.eup %1988  ;;  %142 = vmatpush.bf16.msra.mxu0 %v1900_v23 }
   0x8   :  { %v57_v6 = vmul.f32 32.0, %v1989_v5  ;;  %vm61_vm1 = vweird.f32 %v1989_v5 }
   0xa   :  { %v58_v7 = vsub.f32 1.0, %v57_v6 }
   0xb   :  { %54 = vadd.xlane.f32.xlu0 %v53_v3 }
   0xc   :  { %v59_v8 = vmul.f32 %v1989_v5, %v58_v7 }
   0xe   :  { %v60_v9 = vadd.f32 %v1989_v5, %v59_v8 }
  0x10   :  { %v2129_v10 = vsel %vm61_vm1, %v1989_v5, %v60_v9  ;;  %v199_v5 = vunpack.c.l.s4 %v2046_v4 }
  0x76   :  { %v52_v11 = vpop.xlane.xlu0 %51 }
  0x77   :  { %v63_v12 = vmul.f32 %v2129_v10, %v52_v11 }
  0x79   :  { %v65_v13 = vsub.f32 %v45_v0, %v63_v12  ;;  %v2172_v12 = vunpack.c.0.s8 %v199_v5 }
  0x7b   :  { %v67_v14 = vmul.f32 %v65_v13, %v65_v13 }
  0x7d   :  { %v69_v15 = vsel %vm49_vm0, %v67_v14, 0.0 }
  0x7e   :  { %70 = vadd.xlane.f32.xlu1 %v69_v15  ;;  %v55_v16 = vpop.xlane.xlu0 %54 }
  0x7f   :  { %v64_v17 = vmul.f32 %v2129_v10, %v55_v16 }
  0x81   :  { %v66_v18 = vsub.f32 %v46_v2, %v64_v17 }
  0x83   :  { %v68_v19 = vmul.f32 %v66_v18, %v66_v18 }
  0x85   :  { %v72_v20 = vsel %vm49_vm0, %v68_v19, 0.0 }
  0x86   :  { %73 = vadd.xlane.f32.xlu1 %v72_v20 }
  0xf1   :  { %v71_v22 = vpop.xlane.xlu1 %70 }
  0xf2   :  { %v75_v24 = vmul.f32 %v71_v22, %v2129_v10 }
  0xf4   :  { %v77_v25 = vadd.f32 1e-05, %v75_v24 }
  0xf6   :  { %1990 = vrsqrt.f32 %v77_v25  ;;  %vm85_vm3 = vweird.f32 %v77_v25 }
  0xf9   :  { %v74_v26 = vpop.xlane.xlu1 %73 }
  0xfa   :  { %v76_v27 = vmul.f32 %v74_v26, %v2129_v10 }
  0xfc   :  { %v1991_v28 = vpop.eup %1990  ;;  %v78_v29 = vadd.f32 1e-05, %v76_v27 }
  0xfd   :  { %v80_v30 = vmul.f32 %v1991_v28, %v77_v25  ;;  %vm86_vm2 = vweird.f32 %v1991_v28 }
  0xfe   :  { %1992 = vrsqrt.f32 %v78_v29  ;;  %vm87_vm4 = vmor %vm85_vm3, %vm86_vm2  ;;  %vm95_vm6 = vweird.f32 %v78_v29 }
  0xff   :  { %v81_v31 = vmul.f32 %v1991_v28, %v80_v30 }
 0x101   :  { %v82_v32 = vmul.f32 0.5, %v81_v31 }
 0x103   :  { %v83_v33 = vsub.f32 1.5, %v82_v32 }
 0x104   :  { %v1993_v34 = vpop.eup %1992 }
 0x105   :  { %v84_v35 = vmul.f32 %v1991_v28, %v83_v33  ;;  %v90_v36 = vmul.f32 %v1993_v34, %v78_v29  ;;  %vm96_vm5 = vweird.f32 %v1993_v34 }
 0x106   :  { %vm97_vm7 = vmor %vm95_vm6, %vm96_vm5 }
 0x107   :  { %v91_v37 = vmul.f32 %v1993_v34, %v90_v36  ;;  %v88_v38 = vsel %vm87_vm4, %v1991_v28, %v84_v35 }
 0x108   :  { %v99_v41 = vmul.f32 %v88_v38, %v65_v13 }
 0x109   :  { %v92_v39 = vmul.f32 0.5, %v91_v37 }
 0x10a   :  { %v104_v46 = vmul.f32 %v1980_v42, %v99_v41 }
 0x10b   :  { %v93_v40 = vsub.f32 1.5, %v92_v39 }
 0x10c   :  { %v109_v49 = vadd.f32 %v1981_v47, %v104_v46 }
 0x10d   :  { %v94_v43 = vmul.f32 %v1993_v34, %v93_v40 }
 0x10f   :  { %v98_v44 = vsel %vm97_vm7, %v1993_v34, %v94_v43 }
 0x110   :  { %v100_v45 = vmul.f32 %v98_v44, %v66_v18 }
 0x112   :  { %v105_v48 = vmul.f32 %v1980_v42, %v100_v45 }
 0x114   :  { %v110_v50 = vadd.f32 %v1981_v47, %v105_v48 }
 0x116   :  { %v111_v51 = vpack.c.bf16 %v110_v50, %v109_v49 }
 0x118   :  { %1831 = vmatmul.msk.bf16.vlgmr.msra.gmra.mxu0 %vm49_vm0, %v111_v51 }
 0x195   :  { %v144_v53 = vpop.f32.mrf.mxu0 }
 0x196   :  { %v145_v54 = vadd.f32 %v1982_v52, %v144_v53 }
 0x198   :  { %163 = vrot.lane.b32.xlu0 %v145_v54, %s2041_s1  ;;  %151 = vrot.lane.b32.xlu2 %v145_v54, %s2042_s21  ;;  %v172_v0 = vrot.slane %v145_v54, 4 }
 0x19d   :  { %v146_v55 = vpop.f32.mrf.mxu0 }
 0x19e   :  { %v2153_v56 = vadd.f32 %v1982_v52, %v146_v55 }
 0x1a0   :  { %153 = vrot.lane.b32.xlu1 %v2153_v56, %s2042_s21  ;;  %157 = vrot.lane.b32.xlu2 %v145_v54, %s2043_s2 }
 0x1a8   :  { %159 = vrot.lane.b32.xlu2 %v2153_v56, %s2043_s2 }
 0x1b0   :  { %165 = vrot.lane.b32.xlu2 %v2153_v56, %s2041_s1 }
 0x1f2   :  { %v152_v57 = vpop.permute.xlu2 %151 }
 0x1f3   :  { %v2158_v58 = vpack.i.bf16 %v152_v57, %v145_v54  ;;  %v184_v7 = vrot.slane %v152_v57, 4 }
 0x1f5   :  { %1926 = vrot.lane.b32.xlu2 %v2158_v58, %s2044_s4 }
 0x1fa   :  { %v158_v59 = vpop.permute.xlu2 %157 }
 0x1fb   :  { %v169_v63 = vrot.slane %v158_v59, 4  ;;  %v173_v2 = vsel %vm170_vm8, %v158_v59, %v172_v0 }
 0x1fc   :  { %v181_v6 = vperm.slane %v173_v2, %v2164_v1 }
 0x1fd   :  { %v171_v3 = vsel %vm170_vm8, %v169_v63, %v145_v54 }
 0x1fe   :  { %v177_v8 = vperm.slane %v171_v3, %v2164_v1  ;;  %v208_v16 = vrot.slane %v181_v6, 4 }
 0x200   :  { %v196_v20 = vrot.slane %v177_v8, 4 }
 0x202   :  { %v2162_v62 = vpop.permute.xlu2 %159 }
 0x20a   :  { %v164_v9 = vpop.permute.xlu0 %163  ;;  %v2170_v11 = vpop.permute.xlu2 %165 }
 0x20b   :  { %v182_v13 = vrot.slane %v164_v9, 4  ;;  %v185_v14 = vsel %vm170_vm8, %v164_v9, %v184_v7  ;;  %v2175_v15 = vpack.i.bf16 %v164_v9, %v158_v59  ;;  %v2180_v18 = vpack.i.bf16 %v2170_v11, %v2162_v62 }
 0x20c   :  { %v193_v17 = vperm.slane %v185_v14, %v2164_v1 }
 0x20d   :  { %v183_v19 = vsel %vm170_vm8, %v182_v13, %v152_v57  ;;  %1931 = vrot.lane.b32.xlu0 %v2175_v15, %s2044_s4  ;;  %1941 = vrot.lane.b32.xlu1 %v2180_v18, %s2044_s4 }
 0x20e   :  { %v189_v21 = vperm.slane %v183_v19, %v2164_v1  ;;  %v206_v22 = vrot.slane %v193_v17, 4  ;;  %v209_v23 = vsel %vm170_vm8, %v193_v17, %v208_v16  ;;  %v226_v16 = vrot.slane %v2162_v62, 4 }
 0x20f   :  { %v217_v24 = vperm.slane %v209_v23, %v2172_v12  ;;  %v228_v17 = vrot.slane %v2153_v56, 4 }
 0x210   :  { %v194_v25 = vrot.slane %v189_v21, 4  ;;  %v197_v26 = vsel %vm170_vm8, %v189_v21, %v196_v20  ;;  %v207_v27 = vsel %vm170_vm8, %v206_v22, %v181_v6  ;;  %v238_v20 = vrot.slane %v2170_v11, 4 }
 0x211   :  { %v205_v28 = vperm.slane %v197_v26, %v2172_v12  ;;  %v213_v29 = vperm.slane %v207_v27, %v2172_v12  ;;  %v224_v30 = vrot.slane %v217_v24, 4  ;;  %v227_v21 = vsel %vm170_vm8, %v226_v16, %v2153_v56 }
 0x212   :  { %v195_v31 = vsel %vm170_vm8, %v194_v25, %v177_v8  ;;  %v154_v32 = vpop.permute.xlu1 %153  ;;  %v229_v22 = vsel %vm170_vm8, %v2162_v62, %v228_v17  ;;  %v233_v25 = vperm.slane %v227_v21, %v2164_v1 }
 0x213   :  { %v201_v33 = vperm.slane %v195_v31, %v2172_v12  ;;  %v220_v34 = vrot.slane %v205_v28, 4  ;;  %v222_v35 = vrot.slane %v213_v29, 4  ;;  %v225_v36 = vsel %vm170_vm8, 0.0, %v224_v30 }
 0x214   :  { %v293_v37 = vsel %vm170_vm8, %v224_v30, %v213_v29  ;;  %v298_v38 = vrot.slane %v225_v36, 4  ;;  %v2201_v41 = vpack.i.bf16 %v154_v32, %v2153_v56  ;;  %v240_v19 = vrot.slane %v154_v32, 4 }
 0x215   :  { %v221_v39 = vsel %vm170_vm8, 0.0, %v220_v34  ;;  %v223_v40 = vsel %vm170_vm8, 0.0, %v222_v35  ;;  %v218_v43 = vrot.slane %v201_v33, 4  ;;  %v282_v44 = vsel %vm170_vm8, %v220_v34, %v201_v33 }
 0x216   :  { %v287_v42 = vrot.slane %v221_v39, 4  ;;  %1936 = vrot.lane.b32.xlu2 %v2201_v41, %s2044_s4  ;;  %v286_v45 = vperm.slane %v282_v44, %v2164_v1  ;;  %v297_v47 = vperm.slane %v293_v37, %v2164_v1  ;;  %v299_v48 = vsel %vm170_vm8, %v298_v38, %v223_v40 }
 0x217   :  { %v219_v46 = vsel %vm170_vm8, 0.0, %v218_v43  ;;  %v303_v51 = vperm.slane %v299_v48, %v2164_v1  ;;  %v239_v23 = vsel %vm170_vm8, %v238_v20, %v154_v32  ;;  %v241_v24 = vsel %vm170_vm8, %v2170_v11, %v240_v19 }
 0x218   :  { %v288_v49 = vsel %vm170_vm8, %v287_v42, %v219_v46  ;;  %v306_v52 = vrot.slane %v286_v45, 4  ;;  %v318_v53 = vrot.slane %v297_v47, 4  ;;  %v237_v26 = vperm.slane %v229_v22, %v2164_v1 }
 0x219   :  { %v292_v50 = vperm.slane %v288_v49, %v2164_v1  ;;  %v316_v61 = vrot.slane %v303_v51, 4  ;;  %v245_v27 = vperm.slane %v239_v23, %v2164_v1  ;;  %v249_v28 = vperm.slane %v241_v24, %v2164_v1 }
 0x21a   :  { %v319_v55 = vsel %vm170_vm8, %v303_v51, %v318_v53  ;;  %v252_v29 = vrot.slane %v233_v25, 4  ;;  %v264_v30 = vrot.slane %v237_v26, 4 }
 0x21b   :  { %v307_v54 = vsel %vm170_vm8, %v292_v50, %v306_v52  ;;  %v327_v59 = vperm.slane %v319_v55, %v2172_v12  ;;  %v304_v60 = vrot.slane %v292_v50, 4  ;;  %v317_v3 = vsel %vm170_vm8, %v316_v61, %v297_v47 }
 0x21c   :  { %v315_v57 = vperm.slane %v307_v54, %v2172_v12  ;;  %v323_v6 = vperm.slane %v317_v3, %v2172_v12  ;;  %v250_v31 = vrot.slane %v245_v27, 4  ;;  %v253_v56 = vsel %vm170_vm8, %v245_v27, %v252_v29 }
 0x21d   :  { %v332_v63 = vrot.slane %v327_v59, 4  ;;  %v305_v2 = vsel %vm170_vm8, %v304_v60, %v286_v45  ;;  %v262_v33 = vrot.slane %v249_v28, 4  ;;  %v265_v62 = vsel %vm170_vm8, %v249_v28, %v264_v30 }
 0x21e   :  { %v334_v0 = vrot.slane %v315_v57, 4  ;;  %v311_v5 = vperm.slane %v305_v2, %v2172_v12  ;;  %v328_v8 = vrot.slane %v323_v6, 4  ;;  %v251_v32 = vsel %vm170_vm8, %v250_v31, %v233_v25 }
 0x21f   :  { %v2220_v4 = vsel %vm170_vm8, %v332_v63, %v315_v57  ;;  %v261_v11 = vperm.slane %v253_v56, %v2172_v12  ;;  %v273_v34 = vperm.slane %v265_v62, %v2172_v12  ;;  %v263_v35 = vsel %vm170_vm8, %v262_v33, %v237_v26 }
 0x220   :  { %v2225_v7 = vsel %vm170_vm8, %v327_v59, %v334_v0  ;;  %v330_v9 = vrot.slane %v311_v5, 4  ;;  %v2228_v13 = vsel %vm170_vm8, %v328_v8, %v311_v5  ;;  %v257_v37 = vperm.slane %v251_v32, %v2172_v12 }
 0x221   :  { %v269_v38 = vperm.slane %v263_v35, %v2172_v12  ;;  %v276_v39 = vrot.slane %v261_v11, 4  ;;  %v280_v40 = vrot.slane %v273_v34, 4 }
 0x222   :  { %v2231_v14 = vsel %vm170_vm8, %v323_v6, %v330_v9  ;;  %v274_v42 = vrot.slane %v257_v37, 4 }
 0x223   :  { %v277_v43 = vsel %vm170_vm8, 0.0, %v276_v39  ;;  %v278_v44 = vrot.slane %v269_v38, 4  ;;  %v281_v45 = vsel %vm170_vm8, 0.0, %v280_v40  ;;  %v336_v48 = vsel %vm170_vm8, %v276_v39, %v257_v37 }
 0x224   :  { %v275_v47 = vsel %vm170_vm8, 0.0, %v274_v42  ;;  %v341_v49 = vrot.slane %v277_v43, 4  ;;  %v352_v50 = vrot.slane %v281_v45, 4  ;;  %v347_v52 = vsel %vm170_vm8, %v280_v40, %v269_v38 }
 0x225   :  { %v279_v51 = vsel %vm170_vm8, 0.0, %v278_v44  ;;  %v2262_v59 = vperm.slane %v336_v48, %v2164_v1  ;;  %v2268_v63 = vperm.slane %v347_v52, %v2164_v1 }
 0x226   :  { %v2265_v61 = vsel %vm170_vm8, %v341_v49, %v275_v47  ;;  %v2271_v0 = vsel %vm170_vm8, %v352_v50, %v279_v51 }
 0x24f   :  { %v1927_v36 = vpop.permute.xlu2 %1926 }
 0x250   :  { %v1929_v53 = vunpack.i.h.bf16 %v1927_v36  ;;  %v1928_v54 = vunpack.i.l.bf16 %v1927_v36 }
 0x252   :  { %v436_v2 = vrot.slane %v1929_v53, 4  ;;  %v424_v3 = vrot.slane %v1928_v54, 4 }
 0x270   :  { %v1937_v46 = vpop.permute.xlu2 %1936 }
 0x271   :  { %v1939_v55 = vunpack.i.h.bf16 %v1937_v46  ;;  %v1938_v57 = vunpack.i.l.bf16 %v1937_v46 }
 0x273   :  { %v492_v9 = vrot.slane %v1939_v55, 4  ;;  %v480_v16 = vrot.slane %v1938_v57, 4 }
 0x27f   :  { %v1932_v60 = vpop.permute.xlu0 %1931  ;;  %v1942_v8 = vpop.permute.xlu1 %1941 }
 0x280   :  { %v1934_v5 = vunpack.i.h.bf16 %v1932_v60  ;;  %v1933_v6 = vunpack.i.l.bf16 %v1932_v60  ;;  %v1944_v17 = vunpack.i.h.bf16 %v1942_v8  ;;  %v1943_v19 = vunpack.i.l.bf16 %v1942_v8 }
 0x282   :  { %v434_v20 = vrot.slane %v1934_v5, 4  ;;  %v422_v21 = vrot.slane %v1933_v6, 4  ;;  %v425_v22 = vsel %vm170_vm8, %v1933_v6, %v424_v3  ;;  %v437_v23 = vsel %vm170_vm8, %v1934_v5, %v436_v2 }
 0x283   :  { %v433_v24 = vperm.slane %v425_v22, %v2164_v1  ;;  %v445_v25 = vperm.slane %v437_v23, %v2164_v1  ;;  %v490_v26 = vrot.slane %v1944_v17, 4  ;;  %v478_v27 = vrot.slane %v1943_v19, 4 }
 0x284   :  { %v423_v28 = vsel %vm170_vm8, %v422_v21, %v1928_v54  ;;  %v435_v29 = vsel %vm170_vm8, %v434_v20, %v1929_v53  ;;  %v481_v30 = vsel %vm170_vm8, %v1943_v19, %v480_v16  ;;  %v493_v31 = vsel %vm170_vm8, %v1944_v17, %v492_v9 }
 0x285   :  { %v429_v56 = vperm.slane %v423_v28, %v2164_v1  ;;  %v441_v33 = vperm.slane %v435_v29, %v2164_v1  ;;  %v458_v62 = vrot.slane %v445_v25, 4  ;;  %v460_v32 = vrot.slane %v433_v24, 4 }
 0x286   :  { %v479_v11 = vsel %vm170_vm8, %v478_v27, %v1938_v57  ;;  %v489_v34 = vperm.slane %v481_v30, %v2164_v1  ;;  %v491_v35 = vsel %vm170_vm8, %v490_v26, %v1939_v55  ;;  %v501_v36 = vperm.slane %v493_v31, %v2164_v1 }
 0x287   :  { %v446_v37 = vrot.slane %v441_v33, 4  ;;  %v448_v38 = vrot.slane %v429_v56, 4  ;;  %v459_v39 = vsel %vm170_vm8, %v458_v62, %v433_v24  ;;  %v461_v40 = vsel %vm170_vm8, %v445_v25, %v460_v32 }
 0x288   :  { %v465_v42 = vperm.slane %v459_v39, %v2172_v12  ;;  %v469_v43 = vperm.slane %v461_v40, %v2172_v12  ;;  %v485_v44 = vperm.slane %v479_v11, %v2164_v1  ;;  %v497_v45 = vperm.slane %v491_v35, %v2164_v1 }
 0x289   :  { %v447_v46 = vsel %vm170_vm8, %v446_v37, %v429_v56  ;;  %v449_v47 = vsel %vm170_vm8, %v441_v33, %v448_v38  ;;  %v514_v48 = vrot.slane %v501_v36, 4  ;;  %v516_v49 = vrot.slane %v489_v34, 4 }
 0x28a   :  { %v453_v50 = vperm.slane %v447_v46, %v2172_v12  ;;  %v457_v51 = vperm.slane %v449_v47, %v2172_v12  ;;  %v474_v52 = vrot.slane %v465_v42, 4  ;;  %v476_v53 = vrot.slane %v469_v43, 4 }
 0x28b   :  { %v502_v54 = vrot.slane %v497_v45, 4  ;;  %v504_v55 = vrot.slane %v485_v44, 4  ;;  %v515_v57 = vsel %vm170_vm8, %v514_v48, %v489_v34  ;;  %v517_v60 = vsel %vm170_vm8, %v501_v36, %v516_v49 }
 0x28c   :  { %v470_v2 = vrot.slane %v453_v50, 4  ;;  %v472_v3 = vrot.slane %v457_v51, 4  ;;  %v475_v5 = vsel %vm170_vm8, 0.0, %v474_v52  ;;  %v477_v6 = vsel %vm170_vm8, 0.0, %v476_v53 }
 0x28d   :  { %v550_v8 = vrot.slane %v477_v6, 4  ;;  %v503_v9 = vsel %vm170_vm8, %v502_v54, %v485_v44  ;;  %v505_v16 = vsel %vm170_vm8, %v497_v45, %v504_v55  ;;  %v521_v17 = vperm.slane %v515_v57, %v2172_v12 }
 0x28e   :  { %v473_v19 = vsel %vm170_vm8, 0.0, %v472_v3  ;;  %v509_v20 = vperm.slane %v503_v9, %v2172_v12  ;;  %v513_v21 = vperm.slane %v505_v16, %v2172_v12  ;;  %v525_v22 = vperm.slane %v517_v60, %v2172_v12 }
 0x28f   :  { %v530_v23 = vrot.slane %v521_v17, 4  ;;  %v471_v24 = vsel %vm170_vm8, 0.0, %v470_v2  ;;  %v534_v25 = vsel %vm170_vm8, %v472_v3, %v453_v50  ;;  %v539_v26 = vrot.slane %v473_v19, 4 }
 0x290   :  { %v526_v27 = vrot.slane %v509_v20, 4  ;;  %v528_v28 = vrot.slane %v513_v21, 4  ;;  %v532_v29 = vrot.slane %v525_v22, 4  ;;  %v538_v30 = vperm.slane %v534_v25, %v2164_v1 }
 0x291   :  { %v531_v31 = vsel %vm170_vm8, 0.0, %v530_v23  ;;  %v540_v56 = vsel %vm170_vm8, %v539_v26, %v471_v24  ;;  %v545_v33 = vsel %vm170_vm8, %v476_v53, %v465_v42  ;;  %v551_v62 = vsel %vm170_vm8, %v550_v8, %v475_v5 }
 0x292   :  { %v529_v32 = vsel %vm170_vm8, 0.0, %v528_v28  ;;  %v533_v11 = vsel %vm170_vm8, 0.0, %v532_v29  ;;  %v599_v34 = vsel %vm170_vm8, %v532_v29, %v521_v17  ;;  %v544_v35 = vperm.slane %v540_v56, %v2164_v1 }
 0x293   :  { %v593_v36 = vrot.slane %v529_v32, 4  ;;  %v604_v37 = vrot.slane %v533_v11, 4  ;;  %v549_v38 = vperm.slane %v545_v33, %v2164_v1  ;;  %v555_v39 = vperm.slane %v551_v62, %v2164_v1 }
 0x294   :  { %v558_v40 = vrot.slane %v538_v30, 4  ;;  %v527_v42 = vsel %vm170_vm8, 0.0, %v526_v27  ;;  %v588_v43 = vsel %vm170_vm8, %v528_v28, %v509_v20  ;;  %v603_v44 = vperm.slane %v599_v34, %v2164_v1 }
 0x295   :  { %v570_v45 = vrot.slane %v549_v38, 4  ;;  %v592_v46 = vperm.slane %v588_v43, %v2164_v1  ;;  %v594_v47 = vsel %vm170_vm8, %v593_v36, %v527_v42  ;;  %v605_v48 = vsel %vm170_vm8, %v604_v37, %v531_v31 }
 0x296   :  { %v559_v49 = vsel %vm170_vm8, %v544_v35, %v558_v40  ;;  %v598_v50 = vperm.slane %v594_v47, %v2164_v1  ;;  %v609_v51 = vperm.slane %v605_v48, %v2164_v1  ;;  %v624_v52 = vrot.slane %v603_v44, 4 }
 0x297   :  { %v567_v53 = vperm.slane %v559_v49, %v2172_v12  ;;  %v571_v54 = vsel %vm170_vm8, %v555_v39, %v570_v45  ;;  %v612_v55 = vrot.slane %v592_v46, 4  ;;  %v556_v57 = vrot.slane %v544_v35, 4 }
 0x298   :  { %v579_v60 = vperm.slane %v571_v54, %v2172_v12  ;;  %v625_v2 = vsel %vm170_vm8, %v609_v51, %v624_v52  ;;  %v568_v3 = vrot.slane %v555_v39, 4  ;;  %v610_v5 = vrot.slane %v598_v50, 4 }
 0x299   :  { %v613_v6 = vsel %vm170_vm8, %v598_v50, %v612_v55  ;;  %v633_v8 = vperm.slane %v625_v2, %v2172_v12  ;;  %v557_v9 = vsel %vm170_vm8, %v556_v57, %v538_v30  ;;  %v586_v16 = vrot.slane %v567_v53, 4 }
 0x29a   :  { %v584_v17 = vrot.slane %v579_v60, 4  ;;  %v621_v19 = vperm.slane %v613_v6, %v2172_v12  ;;  %v563_v20 = vperm.slane %v557_v9, %v2172_v12  ;;  %v569_v21 = vsel %vm170_vm8, %v568_v3, %v549_v38 }
 0x29b   :  { %v638_v22 = vrot.slane %v633_v8, 4  ;;  %v575_v23 = vperm.slane %v569_v21, %v2172_v12  ;;  %v587_v24 = vsel %vm170_vm8, %v579_v60, %v586_v16  ;;  %v611_v25 = vsel %vm170_vm8, %v610_v5, %v592_v46 }
 0x29c   :  { %v585_v26 = vsel %vm170_vm8, %v584_v17, %v567_v53  ;;  %v640_v27 = vrot.slane %v621_v19, 4  ;;  %v645_v28 = vpack.c.bf16 %v587_v24, %v587_v24  ;;  %v617_v29 = vperm.slane %v611_v25, %v2172_v12 }
 0x29d   :  { %v644_v30 = vpack.c.bf16 %v585_v26, %v585_v26  ;;  %v639_v31 = vsel %vm170_vm8, %v638_v22, %v621_v19  ;;  %v580_v56 = vrot.slane %v575_v23, 4  ;;  %v622_v33 = vrot.slane %v609_v51, 4 }
 0x29e   :  { %v648_v62 = vpack.c.bf16 %v639_v31, %v639_v31  ;;  %v964_v32 = vsel %vm902_vm9, %v645_v28, 0  ;;  %v641_v11 = vsel %vm170_vm8, %v633_v8, %v640_v27  ;;  %v582_v34 = vrot.slane %v563_v20, 4 }
 0x29f   :  { %v945_v35 = vsel %vm902_vm9, %v644_v30, 0  ;;  %v581_v36 = vsel %vm170_vm8, %v580_v56, %v563_v20  ;;  %973 = vmatpush.bf16.xpose.msrb.mxu0 %v964_v32  ;;  %v623_v37 = vsel %vm170_vm8, %v622_v33, %v603_v44  ;;  %v649_v38 = vpack.c.bf16 %v641_v11, %v641_v11 }
 0x2a0   :  { %954 = vmatpush.bf16.xpose.msra.mxu3 %v945_v35  ;;  %v1021_v39 = vsel %vm902_vm9, %v648_v62, 0  ;;  %v642_v40 = vpack.c.bf16 %v581_v36, %v581_v36  ;;  %v629_v42 = vperm.slane %v623_v37, %v2172_v12  ;;  %v583_v43 = vsel %vm170_vm8, %v575_v23, %v582_v34 }
 0x2a1   :  { %v1040_v45 = vsel %vm902_vm9, %v649_v38, 0  ;;  %v643_v46 = vpack.c.bf16 %v583_v43, %v583_v43  ;;  %v636_v47 = vrot.slane %v617_v29, 4  ;;  %v346_v48 = vperm.slane %v2265_v61, %v2164_v1 }
 0x2a2   :  { %v907_v49 = vsel %vm902_vm9, %v642_v40, 0  ;;  %v634_v44 = vrot.slane %v629_v42, 4  ;;  %v357_v50 = vperm.slane %v2271_v0, %v2164_v1  ;;  %v360_v51 = vrot.slane %v2262_v59, 4 }
 0x2a3   :  { %916 = vmatpush.bf16.xpose.msra.mxu1 %v907_v49  ;;  %v926_v52 = vsel %vm902_vm9, %v643_v46, 0  ;;  %v637_v53 = vsel %vm170_vm8, %v629_v42, %v636_v47  ;;  %v372_v54 = vrot.slane %v2268_v63, 4  ;;  %v393_v57 = vpack.c.bf16 %v2225_v7, %v2225_v7 }
 0x2a4   :  { %v635_v55 = vsel %vm170_vm8, %v634_v44, %v617_v29  ;;  %935 = vmatpush.bf16.xpose.msra.mxu2 %v926_v52  ;;  %v647_v61 = vpack.c.bf16 %v637_v53, %v637_v53  ;;  %v392_v0 = vpack.c.bf16 %v2220_v4, %v2220_v4  ;;  %v361_v3 = vsel %vm170_vm8, %v346_v48, %v360_v51 }
 0x2a5   :  { %v646_v60 = vpack.c.bf16 %v635_v55, %v635_v55  ;;  %v370_v5 = vrot.slane %v357_v50, 4  ;;  %v373_v8 = vsel %vm170_vm8, %v357_v50, %v372_v54  ;;  %v358_v9 = vrot.slane %v346_v48, 4 }
 0x2a6   :  { %v1002_v2 = vsel %vm902_vm9, %v647_v61, 0  ;;  %1835 = vmatmul.msk.bf16.vlgmr.msrb.gmra.mxu0 %vm902_vm9, %v393_v57  ;;  %v390_v7 = vpack.c.bf16 %v2228_v13, %v2228_v13  ;;  %v391_v4 = vpack.c.bf16 %v2231_v14, %v2231_v14  ;;  %v369_v16 = vperm.slane %v361_v3, %v2172_v12 }
 0x2a7   :  { %1049 = vmatpush.bf16.xpose.msra.mxu0 %v1040_v45  ;;  %v983_v6 = vsel %vm902_vm9, %v646_v60, 0  ;;  %1834 = vmatmul.msk.bf16.vlgmr.msra.gmra.mxu3 %vm902_vm9, %v392_v0  ;;  %v381_v17 = vperm.slane %v373_v8, %v2172_v12  ;;  %v371_v19 = vsel %vm170_vm8, %v370_v5, %v2268_v63  ;;  %v359_v20 = vsel %vm170_vm8, %v358_v9, %v2262_v59 }
 0x2a8   :  { %1030 = vmatpush.bf16.xpose.msrb.mxu3 %v1021_v39  ;;  %v388_v21 = vrot.slane %v369_v16, 4  ;;  %v377_v13 = vperm.slane %v371_v19, %v2172_v12  ;;  %v365_v14 = vperm.slane %v359_v20, %v2172_v12 }
 0x2a9   :  { %v386_v22 = vrot.slane %v381_v17, 4 }
 0x2aa   :  { %1832 = vmatmul.msk.bf16.vlgmr.msra.gmra.mxu1 %vm902_vm9, %v390_v7  ;;  %v382_v23 = vrot.slane %v377_v13, 4  ;;  %v389_v24 = vsel %vm170_vm8, %v381_v17, %v388_v21  ;;  %v384_v26 = vrot.slane %v365_v14, 4 }
 0x2ab   :  { %992 = vmatpush.bf16.xpose.msrb.mxu1 %v983_v6  ;;  %1833 = vmatmul.msk.bf16.vlgmr.msra.gmra.mxu2 %vm902_vm9, %v391_v4  ;;  %v387_v25 = vsel %vm170_vm8, %v386_v22, %v369_v16  ;;  %v397_v27 = vpack.c.bf16 %v389_v24, %v389_v24 }
 0x2ac   :  { %1011 = vmatpush.bf16.xpose.msrb.mxu2 %v1002_v2  ;;  %v396_v28 = vpack.c.bf16 %v387_v25, %v387_v25  ;;  %v383_v63 = vsel %vm170_vm8, %v382_v23, %v365_v14  ;;  %v385_v59 = vsel %vm170_vm8, %v377_v13, %v384_v26 }
 0x2ad   :  { %v394_v29 = vpack.c.bf16 %v383_v63, %v383_v63  ;;  %v395_v30 = vpack.c.bf16 %v385_v59, %v385_v59 }
 0x2b6   :  { %1839 = vmatmul.msk.bf16.vlgmr.msra.gmra.mxu0 %vm902_vm9, %v397_v27 }
 0x2b7   :  { %1838 = vmatmul.msk.bf16.vlgmr.msrb.gmra.mxu3 %vm902_vm9, %v396_v28 }
 0x2ba   :  { %1836 = vmatmul.msk.bf16.vlgmr.msrb.gmra.mxu1 %vm902_vm9, %v394_v29 }
 0x2bb   :  { %1837 = vmatmul.msk.bf16.vlgmr.msrb.gmra.mxu2 %vm902_vm9, %v395_v30 }
 0x323   :  { %v975_v31 = vpop.f32.mrf.mxu0 }
 0x324   :  { %v1064_v56 = vsel %vm902_vm9, %v975_v31, -inf }
 0x325   :  { %1065 = vmax.xlane.f32.xlu0 %v1064_v56 }
 0x327   :  { %v918_v33 = vpop.f32.mrf.mxu1 }
 0x328   :  { %v1055_v62 = vsel %vm902_vm9, %v918_v33, -inf }
 0x329   :  { %1056 = vmax.xlane.f32.xlu1 %v1055_v62 }
 0x32a   :  { %v956_v32 = vpop.f32.mrf.mxu3 }
 0x32b   :  { %v977_v11 = vpop.f32.mrf.mxu0  ;;  %v1061_v34 = vsel %vm902_vm9, %v956_v32, -inf }
 0x32d   :  { %1062 = vmax.xlane.f32.xlu0 %v1061_v34 }
 0x32e   :  { %v937_v35 = vpop.f32.mrf.mxu2 }
 0x32f   :  { %v920_v36 = vpop.f32.mrf.mxu1  ;;  %v1058_v37 = vsel %vm902_vm9, %v937_v35, -inf }
 0x330   :  { %1059 = vmax.xlane.f32.xlu2 %v1058_v37 }
 0x332   :  { %v958_v38 = vpop.f32.mrf.mxu3 }
 0x333   :  { %v2401_v39 = vpop.f32.mrf.mxu0 }
 0x334   :  { %v1076_v40 = vsel %vm902_vm9, %v2401_v39, -inf }
 0x336   :  { %v939_v42 = vpop.f32.mrf.mxu2 }
 0x337   :  { %v994_v43 = vpop.f32.mrf.mxu1 }
 0x338   :  { %1077 = vmax.xlane.f32.xlu2 %v1076_v40  ;;  %v1067_v45 = vsel %vm902_vm9, %v994_v43, -inf }
 0x339   :  { %1068 = vmax.xlane.f32.xlu0 %v1067_v45 }
 0x33a   :  { %v1032_v46 = vpop.f32.mrf.mxu3 }
 0x33b   :  { %v1053_v47 = vpop.f32.mrf.mxu0  ;;  %v1073_v44 = vsel %vm902_vm9, %v1032_v46, -inf }
 0x33e   :  { %v1013_v48 = vpop.f32.mrf.mxu2 }
 0x33f   :  { %v996_v49 = vpop.f32.mrf.mxu1  ;;  %v1070_v50 = vsel %vm902_vm9, %v1013_v48, -inf }
 0x340   :  { %1074 = vmax.xlane.f32.xlu2 %v1073_v44  ;;  %1071 = vmax.xlane.f32.xlu1 %v1070_v50 }
 0x342   :  { %v1034_v51 = vpop.f32.mrf.mxu3 }
 0x346   :  { %v1015_v52 = vpop.f32.mrf.mxu2 }
 0x34d   :  { %1951 = vrot.lane.b32.xlu0 %v2175_v15, %s2047_s22 }
 0x355   :  { %1961 = vrot.lane.b32.xlu0 %v2180_v18, %s2047_s22 }
 0x358   :  { %1956 = vrot.lane.b32.xlu2 %v2201_v41, %s2047_s22 }
 0x359   :  { %1946 = vrot.lane.b32.xlu1 %v2158_v58, %s2047_s22 }
 0x398   :  { %v1066_v53 = vpop.xlane.xlu0 %1065 }
 0x399   :  { %v1082_v0 = vsub.f32 %v975_v31, %v1066_v53 }
 0x39b   :  { %v1093_v18 = vmul.f32 1.442695, %v1082_v0 }
 0x39c   :  { %v1057_v54 = vpop.xlane.xlu1 %1056 }
 0x39d   :  { %v1079_v55 = vsub.f32 %v918_v33, %v1057_v54 }
 0x39f   :  { %v1087_v61 = vmul.f32 1.442695, %v1079_v55 }
 0x3a0   :  { %v1063_v57 = vpop.xlane.xlu0 %1062 }
 0x3a1   :  { %1994 = vpow2.f32 %v1087_v61  ;;  %v1081_v60 = vsub.f32 %v956_v32, %v1063_v57 }
 0x3a3   :  { %v1091_v2 = vmul.f32 1.442695, %v1081_v60  ;;  %v1060_v3 = vpop.xlane.xlu2 %1059 }
 0x3a4   :  { %v1080_v5 = vsub.f32 %v937_v35, %v1060_v3 }
 0x3a5   :  { %1996 = vpow2.f32 %v1091_v2 }
 0x3a6   :  { %v1089_v6 = vmul.f32 1.442695, %v1080_v5 }
 0x3a7   :  { %v2412_v15 = vpop.eup %1994 }
 0x3a8   :  { %1998 = vpow2.f32 %v1089_v6  ;;  %v1103_v58 = vsel %vm902_vm9, %v2412_v15, 0.0 }
 0x3a9   :  { %1104 = vadd.xlane.f32.xlu0 %v1103_v58  ;;  %2000 = vpow2.f32 %v1093_v18 }
 0x3ab   :  { %v2416_v41 = vpop.eup %1996  ;;  %v1078_v8 = vpop.xlane.xlu2 %1077 }
 0x3ac   :  { %v1069_v9 = vpop.xlane.xlu0 %1068  ;;  %v1109_v7 = vsel %vm902_vm9, %v2416_v41, 0.0  ;;  %v1086_v24 = vsub.f32 %v2401_v39, %v1078_v8 }
 0x3ad   :  { %v1083_v4 = vsub.f32 %v994_v43, %v1069_v9  ;;  %1110 = vadd.xlane.f32.xlu1 %v1109_v7 }
 0x3ae   :  { %v2420_v16 = vpop.eup %1998  ;;  %v1101_v28 = vmul.f32 1.442695, %v1086_v24 }
 0x3af   :  { %v1095_v17 = vmul.f32 1.442695, %v1083_v4  ;;  %v1106_v19 = vsel %vm902_vm9, %v2420_v16, 0.0  ;;  %v2424_v20 = vpop.eup %2000 }
 0x3b0   :  { %1107 = vadd.xlane.f32.xlu2 %v1106_v19  ;;  %v1112_v23 = vsel %vm902_vm9, %v2424_v20, 0.0 }
 0x3b1   :  { %2002 = vpow2.f32 %v1095_v17 }
 0x3b3   :  { %v1075_v21 = vpop.xlane.xlu2 %1074  ;;  %v1072_v13 = vpop.xlane.xlu1 %1071 }
 0x3b4   :  { %v1085_v22 = vsub.f32 %v1032_v46, %v1075_v21  ;;  %v1084_v14 = vsub.f32 %v1013_v48, %v1072_v13 }
 0x3b5   :  { %1113 = vadd.xlane.f32.xlu1 %v1112_v23 }
 0x3b6   :  { %v1099_v25 = vmul.f32 1.442695, %v1085_v22  ;;  %v1097_v26 = vmul.f32 1.442695, %v1084_v14 }
 0x3b7   :  { %v2429_v27 = vpop.eup %2002 }
 0x3b8   :  { %2004 = vpow2.f32 %v1099_v25  ;;  %v1115_v63 = vsel %vm902_vm9, %v2429_v27, 0.0 }
 0x3b9   :  { %2006 = vpow2.f32 %v1097_v26 }
 0x3ba   :  { %2008 = vpow2.f32 %v1101_v28 }
 0x3bb   :  { %v1957_v33 = vpop.permute.xlu2 %1956 }
 0x3bc   :  { %v1959_v32 = vunpack.i.h.bf16 %v1957_v33  ;;  %v1958_v11 = vunpack.i.l.bf16 %v1957_v33 }
 0x3bd   :  { %1116 = vadd.xlane.f32.xlu1 %v1115_v63 }
 0x3be   :  { %v2433_v59 = vpop.eup %2004  ;;  %v744_v38 = vrot.slane %v1959_v32, 4  ;;  %v732_v39 = vrot.slane %v1958_v11, 4 }
 0x3bf   :  { %v2435_v29 = vpop.eup %2006  ;;  %v1952_v30 = vpop.permute.xlu0 %1951  ;;  %v1121_v31 = vsel %vm902_vm9, %v2433_v59, 0.0 }
 0x3c0   :  { %1122 = vadd.xlane.f32.xlu2 %v1121_v31  ;;  %v1118_v56 = vsel %vm902_vm9, %v2435_v29, 0.0  ;;  %v2441_v62 = vpop.eup %2008  ;;  %v1954_v34 = vunpack.i.h.bf16 %v1952_v30  ;;  %v1953_v35 = vunpack.i.l.bf16 %v1952_v30 }
 0x3c1   :  { %1119 = vadd.xlane.f32.xlu0 %v1118_v56  ;;  %v1124_v37 = vsel %vm902_vm9, %v2441_v62, 0.0 }
 0x3c2   :  { %v686_v48 = vrot.slane %v1954_v34, 4  ;;  %v674_v49 = vrot.slane %v1953_v35, 4 }
 0x3c7   :  { %v1962_v36 = vpop.permute.xlu0 %1961 }
 0x3c8   :  { %v1964_v40 = vunpack.i.h.bf16 %v1962_v36  ;;  %v1963_v42 = vunpack.i.l.bf16 %v1962_v36  ;;  %1125 = vadd.xlane.f32.xlu2 %v1124_v37 }
 0x3ca   :  { %v742_v43 = vrot.slane %v1964_v40, 4  ;;  %v745_v45 = vsel %vm170_vm8, %v1964_v40, %v744_v38  ;;  %v730_v46 = vrot.slane %v1963_v42, 4  ;;  %v733_v47 = vsel %vm170_vm8, %v1963_v42, %v732_v39 }
 0x3cb   :  { %v753_v44 = vperm.slane %v745_v45, %v2164_v1  ;;  %v741_v50 = vperm.slane %v733_v47, %v2164_v1  ;;  %v1947_v51 = vpop.permute.xlu1 %1946 }
 0x3cc   :  { %v743_v52 = vsel %vm170_vm8, %v742_v43, %v1959_v32  ;;  %v731_v53 = vsel %vm170_vm8, %v730_v46, %v1958_v11  ;;  %v1949_v54 = vunpack.i.h.bf16 %v1947_v51  ;;  %v1948_v55 = vunpack.i.l.bf16 %v1947_v51 }
 0x3cd   :  { %v749_v61 = vperm.slane %v743_v52, %v2164_v1  ;;  %v766_v57 = vrot.slane %v753_v44, 4  ;;  %v737_v60 = vperm.slane %v731_v53, %v2164_v1  ;;  %v768_v0 = vrot.slane %v741_v50, 4 }
 0x3ce   :  { %v688_v2 = vrot.slane %v1949_v54, 4  ;;  %v675_v3 = vsel %vm170_vm8, %v674_v49, %v1948_v55  ;;  %v676_v5 = vrot.slane %v1948_v55, 4  ;;  %v687_v6 = vsel %vm170_vm8, %v686_v48, %v1949_v54 }
 0x3cf   :  { %v754_v18 = vrot.slane %v749_v61, 4  ;;  %v756_v58 = vrot.slane %v737_v60, 4  ;;  %v767_v8 = vsel %vm170_vm8, %v766_v57, %v741_v50  ;;  %v769_v9 = vsel %vm170_vm8, %v753_v44, %v768_v0 }
 0x3d0   :  { %v773_v7 = vperm.slane %v767_v8, %v2172_v12  ;;  %v777_v4 = vperm.slane %v769_v9, %v2172_v12  ;;  %v677_v17 = vsel %vm170_vm8, %v1953_v35, %v676_v5  ;;  %v681_v19 = vperm.slane %v675_v3, %v2164_v1 }
 0x3d1   :  { %v755_v21 = vsel %vm170_vm8, %v754_v18, %v737_v60  ;;  %v757_v13 = vsel %vm170_vm8, %v749_v61, %v756_v58  ;;  %v685_v22 = vperm.slane %v677_v17, %v2164_v1  ;;  %v689_v14 = vsel %vm170_vm8, %v1954_v34, %v688_v2 }
 0x3d2   :  { %v761_v23 = vperm.slane %v755_v21, %v2172_v12  ;;  %v765_v24 = vperm.slane %v757_v13, %v2172_v12  ;;  %v782_v25 = vrot.slane %v773_v7, 4  ;;  %v784_v26 = vrot.slane %v777_v4, 4 }
 0x3d3   :  { %v693_v28 = vperm.slane %v687_v6, %v2164_v1  ;;  %v697_v63 = vperm.slane %v689_v14, %v2164_v1  ;;  %v700_v30 = vrot.slane %v681_v19, 4  ;;  %v712_v31 = vrot.slane %v685_v22, 4 }
 0x3d4   :  { %v778_v56 = vrot.slane %v761_v23, 4  ;;  %v780_v33 = vrot.slane %v765_v24, 4  ;;  %v783_v32 = vsel %vm170_vm8, 0.0, %v782_v25  ;;  %v785_v11 = vsel %vm170_vm8, 0.0, %v784_v26 }
 0x3d5   :  { %v851_v34 = vsel %vm170_vm8, %v784_v26, %v773_v7  ;;  %v856_v35 = vrot.slane %v785_v11, 4  ;;  %v698_v36 = vrot.slane %v693_v28, 4  ;;  %v701_v37 = vsel %vm170_vm8, %v693_v28, %v700_v30 }
 0x3d6   :  { %v779_v38 = vsel %vm170_vm8, 0.0, %v778_v56  ;;  %v781_v39 = vsel %vm170_vm8, 0.0, %v780_v33  ;;  %v840_v40 = vsel %vm170_vm8, %v780_v33, %v761_v23  ;;  %v709_v42 = vperm.slane %v701_v37, %v2172_v12 }
 0x3d7   :  { %v845_v43 = vrot.slane %v781_v39, 4  ;;  %v699_v45 = vsel %vm170_vm8, %v698_v36, %v681_v19  ;;  %v710_v46 = vrot.slane %v697_v63, 4  ;;  %v713_v47 = vsel %vm170_vm8, %v697_v63, %v712_v31 }
 0x3d8   :  { %v705_v48 = vperm.slane %v699_v45, %v2172_v12  ;;  %v721_v49 = vperm.slane %v713_v47, %v2172_v12  ;;  %v724_v44 = vrot.slane %v709_v42, 4  ;;  %v844_v50 = vperm.slane %v840_v40, %v2164_v1 }
 0x3d9   :  { %v711_v51 = vsel %vm170_vm8, %v710_v46, %v685_v22  ;;  %v846_v52 = vsel %vm170_vm8, %v845_v43, %v779_v38  ;;  %v855_v53 = vperm.slane %v851_v34, %v2164_v1  ;;  %v857_v54 = vsel %vm170_vm8, %v856_v35, %v783_v32 }
 0x3da   :  { %v717_v55 = vperm.slane %v711_v51, %v2172_v12  ;;  %v722_v61 = vrot.slane %v705_v48, 4  ;;  %v725_v57 = vsel %vm170_vm8, 0.0, %v724_v44  ;;  %v728_v60 = vrot.slane %v721_v49, 4 }
 0x3db   :  { %v786_v0 = vsel %vm170_vm8, %v724_v44, %v705_v48  ;;  %v791_v2 = vrot.slane %v725_v57, 4  ;;  %v850_v3 = vperm.slane %v846_v52, %v2164_v1  ;;  %v861_v5 = vperm.slane %v857_v54, %v2164_v1 }
 0x3dc   :  { %v723_v6 = vsel %vm170_vm8, 0.0, %v722_v61  ;;  %v726_v18 = vrot.slane %v717_v55, 4  ;;  %v729_v58 = vsel %vm170_vm8, 0.0, %v728_v60  ;;  %v790_v8 = vperm.slane %v786_v0, %v2164_v1 }
 0x3dd   :  { %v802_v9 = vrot.slane %v729_v58, 4  ;;  %v792_v7 = vsel %vm170_vm8, %v791_v2, %v723_v6  ;;  %v797_v4 = vsel %vm170_vm8, %v728_v60, %v717_v55  ;;  %v864_v17 = vrot.slane %v844_v50, 4 }
 0x3de   :  { %v727_v19 = vsel %vm170_vm8, 0.0, %v726_v18  ;;  %v796_v21 = vperm.slane %v792_v7, %v2164_v1  ;;  %v801_v13 = vperm.slane %v797_v4, %v2164_v1  ;;  %v810_v22 = vrot.slane %v790_v8, 4 }
 0x3df   :  { %v803_v14 = vsel %vm170_vm8, %v802_v9, %v727_v19  ;;  %v865_v23 = vsel %vm170_vm8, %v850_v3, %v864_v17  ;;  %v876_v24 = vrot.slane %v855_v53, 4  ;;  %v862_v25 = vrot.slane %v850_v3, 4 }
 0x3e0   :  { %v807_v26 = vperm.slane %v803_v14, %v2164_v1  ;;  %v811_v28 = vsel %vm170_vm8, %v796_v21, %v810_v22  ;;  %v822_v63 = vrot.slane %v801_v13, 4  ;;  %v873_v30 = vperm.slane %v865_v23, %v2172_v12 }
 0x3e1   :  { %v819_v31 = vperm.slane %v811_v28, %v2172_v12  ;;  %v877_v56 = vsel %vm170_vm8, %v861_v5, %v876_v24  ;;  %v808_v33 = vrot.slane %v796_v21, 4  ;;  %v863_v32 = vsel %vm170_vm8, %v862_v25, %v844_v50 }
 0x3e2   :  { %v823_v11 = vsel %vm170_vm8, %v807_v26, %v822_v63  ;;  %v885_v34 = vperm.slane %v877_v56, %v2172_v12  ;;  %v892_v35 = vrot.slane %v873_v30, 4  ;;  %v820_v36 = vrot.slane %v807_v26, 4 }
 0x3e3   :  { %v831_v37 = vperm.slane %v823_v11, %v2172_v12  ;;  %v838_v38 = vrot.slane %v819_v31, 4  ;;  %v809_v39 = vsel %vm170_vm8, %v808_v33, %v790_v8  ;;  %v869_v40 = vperm.slane %v863_v32, %v2172_v12 }
 0x3e4   :  { %v893_v42 = vsel %vm170_vm8, %v885_v34, %v892_v35  ;;  %v815_v43 = vperm.slane %v809_v39, %v2172_v12  ;;  %v821_v45 = vsel %vm170_vm8, %v820_v36, %v801_v13  ;;  %v874_v46 = vrot.slane %v861_v5, 4 }
 0x3e5   :  { %v839_v47 = vsel %vm170_vm8, %v831_v37, %v838_v38  ;;  %v901_v48 = vpack.c.bf16 %v893_v42, %v893_v42  ;;  %v827_v49 = vperm.slane %v821_v45, %v2172_v12  ;;  %v836_v44 = vrot.slane %v831_v37, 4 }
 0x3e6   :  { %v897_v50 = vpack.c.bf16 %v839_v47, %v839_v47  ;;  %v834_v51 = vrot.slane %v815_v43, 4  ;;  %v875_v52 = vsel %vm170_vm8, %v874_v46, %v855_v53  ;;  %v888_v54 = vrot.slane %v869_v40, 4 }
 0x3e7   :  { %v1289_v55 = vsel %vm1154_vm10, %v901_v48, 0  ;;  %v837_v61 = vsel %vm170_vm8, %v836_v44, %v819_v31  ;;  %v881_v57 = vperm.slane %v875_v52, %v2172_v12  ;;  %v890_v60 = vrot.slane %v885_v34, 4 }
 0x3e8   :  { %v1213_v0 = vsel %vm1154_vm10, %v897_v50, 0  ;;  %v835_v2 = vsel %vm170_vm8, %v827_v49, %v834_v51  ;;  %v896_v3 = vpack.c.bf16 %v837_v61, %v837_v61  ;;  %v832_v5 = vrot.slane %v827_v49, 4 }
 0x3e9   :  { %1222 = vmatpush.bf16.msrb.mxu0 %v1213_v0  ;;  %v895_v6 = vpack.c.bf16 %v835_v2, %v835_v2  ;;  %v889_v18 = vsel %vm170_vm8, %v881_v57, %v888_v54  ;;  %v891_v53 = vsel %vm170_vm8, %v890_v60, %v873_v30  ;;  %v886_v58 = vrot.slane %v881_v57, 4 }
 0x3ea   :  { %v1194_v8 = vsel %vm1154_vm10, %v896_v3, 0  ;;  %v899_v9 = vpack.c.bf16 %v889_v18, %v889_v18  ;;  %v900_v7 = vpack.c.bf16 %v891_v53, %v891_v53  ;;  %v833_v4 = vsel %vm170_vm8, %v832_v5, %v815_v43 }
 0x3eb   :  { %v1175_v17 = vsel %vm1154_vm10, %v895_v6, 0  ;;  %1203 = vmatpush.bf16.msra.mxu3 %v1194_v8  ;;  %v894_v19 = vpack.c.bf16 %v833_v4, %v833_v4  ;;  %v887_v21 = vsel %vm170_vm8, %v886_v58, %v869_v40 }
 0x3ec   :  { %1184 = vmatpush.bf16.msra.mxu2 %v1175_v17  ;;  %v1251_v13 = vsel %vm1154_vm10, %v899_v9, 0  ;;  %v1270_v22 = vsel %vm1154_vm10, %v900_v7, 0  ;;  %v898_v14 = vpack.c.bf16 %v887_v21, %v887_v21 }
 0x3ed   :  { %1298 = vmatpush.bf16.msra.mxu0 %v1289_v55  ;;  %v1156_v23 = vsel %vm1154_vm10, %v894_v19, 0 }
 0x3ee   :  { %1165 = vmatpush.bf16.msra.mxu1 %v1156_v23  ;;  %v1232_v24 = vsel %vm1154_vm10, %v898_v14, 0 }
 0x3ef   :  { %1279 = vmatpush.bf16.msrb.mxu3 %v1270_v22 }
 0x3f0   :  { %1260 = vmatpush.bf16.msrb.mxu2 %v1251_v13 }
 0x3f2   :  { %1241 = vmatpush.bf16.msrb.mxu1 %v1232_v24 }
 0x41c   :  { %v1105_v25 = vpop.xlane.xlu0 %1104 }
 0x41d   :  { %2010 = vrcp.f32 %v1105_v25 }
 0x420   :  { %v1111_v26 = vpop.xlane.xlu1 %1110 }
 0x421   :  { %2012 = vrcp.f32 %v1111_v26 }
 0x423   :  { %v2011_v28 = vpop.eup %2010  ;;  %v1108_v63 = vpop.xlane.xlu2 %1107 }
 0x424   :  { %v1135_v30 = vmul.f32 %v2011_v28, %v2412_v15  ;;  %2014 = vrcp.f32 %v1108_v63 }
 0x426   :  { %v1143_v31 = vpack.c.bf16 %v1135_v30, %v1135_v30 }
 0x427   :  { %v2013_v56 = vpop.eup %2012 }
 0x428   :  { %v1137_v33 = vmul.f32 %v2013_v56, %v2416_v41  ;;  %1840 = vmatmul.msk.bf16.vlgmr.msra.gmra.mxu1 %vm902_vm9, %v1143_v31  ;;  %v1114_v32 = vpop.xlane.xlu1 %1113 }
 0x429   :  { %2016 = vrcp.f32 %v1114_v32 }
 0x42a   :  { %v2015_v11 = vpop.eup %2014  ;;  %v1145_v34 = vpack.c.bf16 %v1137_v33, %v1137_v33 }
 0x42b   :  { %v1136_v35 = vmul.f32 %v2015_v11, %v2420_v16 }
 0x42c   :  { %1842 = vmatmul.msk.bf16.vlgmr.msra.gmra.mxu3 %vm902_vm9, %v1145_v34 }
 0x42d   :  { %v1144_v36 = vpack.c.bf16 %v1136_v35, %v1136_v35 }
 0x42f   :  { %v2017_v37 = vpop.eup %2016  ;;  %1841 = vmatmul.msk.bf16.vlgmr.msra.gmra.mxu2 %vm902_vm9, %v1144_v36 }
 0x430   :  { %v1138_v15 = vmul.f32 %v2017_v37, %v2424_v20  ;;  %v1117_v38 = vpop.xlane.xlu1 %1116 }
 0x431   :  { %2018 = vrcp.f32 %v1117_v38 }
 0x432   :  { %v1146_v39 = vpack.c.bf16 %v1138_v15, %v1138_v15 }
 0x433   :  { %v1123_v41 = vpop.xlane.xlu2 %1122 }
 0x434   :  { %2020 = vrcp.f32 %v1123_v41  ;;  %v1120_v40 = vpop.xlane.xlu0 %1119  ;;  %1843 = vmatmul.msk.bf16.vlgmr.msrb.gmra.mxu0 %vm902_vm9, %v1146_v39 }
 0x435   :  { %2022 = vrcp.f32 %v1120_v40 }
 0x437   :  { %v2019_v42 = vpop.eup %2018 }
 0x438   :  { %v1139_v16 = vmul.f32 %v2019_v42, %v2429_v27 }
 0x43a   :  { %v2021_v43 = vpop.eup %2020  ;;  %v1147_v45 = vpack.c.bf16 %v1139_v16, %v1139_v16 }
 0x43b   :  { %v2023_v46 = vpop.eup %2022  ;;  %v1141_v47 = vmul.f32 %v2021_v43, %v2433_v59  ;;  %v1126_v48 = vpop.xlane.xlu2 %1125 }
 0x43c   :  { %v1140_v20 = vmul.f32 %v2023_v46, %v2435_v29  ;;  %2024 = vrcp.f32 %v1126_v48  ;;  %1844 = vmatmul.msk.bf16.vlgmr.msrb.gmra.mxu1 %vm902_vm9, %v1147_v45 }
 0x43d   :  { %v1149_v49 = vpack.c.bf16 %v1141_v47, %v1141_v47 }
 0x43e   :  { %v1148_v44 = vpack.c.bf16 %v1140_v20, %v1140_v20 }
 0x43f   :  { %1846 = vmatmul.msk.bf16.vlgmr.msrb.gmra.mxu3 %vm902_vm9, %v1149_v49 }
 0x440   :  { %1845 = vmatmul.msk.bf16.vlgmr.msrb.gmra.mxu2 %vm902_vm9, %v1148_v44 }
 0x442   :  { %v2025_v50 = vpop.eup %2024 }
 0x443   :  { %v1142_v27 = vmul.f32 %v2025_v50, %v2441_v62 }
 0x445   :  { %v1150_v51 = vpack.c.bf16 %v1142_v27, %v1142_v27 }
 0x447   :  { %1847 = vmatmul.msk.bf16.vlgmr.msra.gmra.mxu0 %vm902_vm9, %v1150_v51 }
 0x4a5   :  { %v1167_v52 = vpop.f32.mrf.mxu1 }
 0x4a6   :  { %v1306_v54 = vrot.slane %v1167_v52, 4 }
 0x4ad   :  { %v1169_v59 = vpop.f32.mrf.mxu1 }
 0x4af   :  { %v1205_v55 = vpop.f32.mrf.mxu3 }
 0x4b0   :  { %v1304_v29 = vrot.slane %v1205_v55, 4  ;;  %v1307_v61 = vsel %vm170_vm8, %v1205_v55, %v1306_v54 }
 0x4b1   :  { %v1315_v57 = vperm.slane %v1307_v61, %v2164_v1  ;;  %v1224_v60 = vpop.f32.mrf.mxu0 }
 0x4b2   :  { %v1186_v0 = vpop.f32.mrf.mxu2  ;;  %v1305_v2 = vsel %vm170_vm8, %v1304_v29, %v1167_v52  ;;  %v1316_v3 = vrot.slane %v1224_v60, 4 }
 0x4b3   :  { %v1318_v5 = vrot.slane %v1186_v0, 4  ;;  %v1311_v62 = vperm.slane %v1305_v2, %v2164_v1  ;;  %v1342_v6 = vrot.slane %v1315_v57, 4 }
 0x4b4   :  { %v1317_v18 = vsel %vm170_vm8, %v1316_v3, %v1186_v0 }
 0x4b5   :  { %v1330_v53 = vrot.slane %v1311_v62, 4  ;;  %v1319_v58 = vsel %vm170_vm8, %v1224_v60, %v1318_v5  ;;  %v1323_v8 = vperm.slane %v1317_v18, %v2164_v1 }
 0x4b6   :  { %v1327_v9 = vperm.slane %v1319_v58, %v2164_v1 }
 0x4b7   :  { %v1328_v7 = vrot.slane %v1323_v8, 4  ;;  %v1331_v4 = vsel %vm170_vm8, %v1323_v8, %v1330_v53  ;;  %v1207_v17 = vpop.f32.mrf.mxu3 }
 0x4b8   :  { %v1339_v19 = vperm.slane %v1331_v4, %v2172_v12  ;;  %v1340_v21 = vrot.slane %v1327_v9, 4  ;;  %v1343_v13 = vsel %vm170_vm8, %v1327_v9, %v1342_v6 }
 0x4b9   :  { %v1329_v22 = vsel %vm170_vm8, %v1328_v7, %v1311_v62  ;;  %v1351_v14 = vperm.slane %v1343_v13, %v2172_v12  ;;  %v1226_v23 = vpop.f32.mrf.mxu0  ;;  %v1243_v24 = vpop.f32.mrf.mxu1 }
 0x4ba   :  { %v1335_v25 = vperm.slane %v1329_v22, %v2172_v12  ;;  %v1341_v26 = vsel %vm170_vm8, %v1340_v21, %v1315_v57  ;;  %v1354_v28 = vrot.slane %v1339_v19, 4  ;;  %v1188_v63 = vpop.f32.mrf.mxu2  ;;  %v1362_v43 = vrot.slane %v1243_v24, 4 }
 0x4bb   :  { %v1347_v30 = vperm.slane %v1341_v26, %v2172_v12  ;;  %v1358_v31 = vrot.slane %v1351_v14, 4 }
 0x4bc   :  { %v1352_v56 = vrot.slane %v1335_v25, 4  ;;  %v1355_v33 = vsel %vm170_vm8, 0.0, %v1354_v28  ;;  %v1416_v32 = vsel %vm170_vm8, %v1354_v28, %v1335_v25 }
 0x4bd   :  { %v1356_v11 = vrot.slane %v1347_v30, 4  ;;  %v1359_v34 = vsel %vm170_vm8, 0.0, %v1358_v31  ;;  %v1421_v35 = vrot.slane %v1355_v33, 4  ;;  %v1427_v36 = vsel %vm170_vm8, %v1358_v31, %v1347_v30 }
 0x4be   :  { %v1432_v37 = vrot.slane %v1359_v34, 4  ;;  %v1353_v15 = vsel %vm170_vm8, 0.0, %v1352_v56  ;;  %v1431_v41 = vperm.slane %v1427_v36, %v2164_v1  ;;  %v1420_v42 = vperm.slane %v1416_v32, %v2164_v1 }
 0x4bf   :  { %v1357_v38 = vsel %vm170_vm8, 0.0, %v1356_v11  ;;  %v1422_v39 = vsel %vm170_vm8, %v1421_v35, %v1353_v15 }
 0x4c0   :  { %v1433_v40 = vsel %vm170_vm8, %v1432_v37, %v1357_v38  ;;  %v1426_v16 = vperm.slane %v1422_v39, %v2164_v1  ;;  %v1452_v50 = vrot.slane %v1431_v41, 4  ;;  %v1440_v59 = vrot.slane %v1420_v42, 4 }
 0x4c1   :  { %v1245_v45 = vpop.f32.mrf.mxu1  ;;  %v1437_v48 = vperm.slane %v1433_v40, %v2164_v1 }
 0x4c2   :  { %v1281_v46 = vpop.f32.mrf.mxu3  ;;  %v1438_v47 = vrot.slane %v1426_v16, 4  ;;  %v1441_v6 = vsel %vm170_vm8, %v1426_v16, %v1440_v59 }
 0x4c3   :  { %v1262_v20 = vpop.f32.mrf.mxu2  ;;  %v1360_v49 = vrot.slane %v1281_v46, 4  ;;  %v1363_v44 = vsel %vm170_vm8, %v1281_v46, %v1362_v43  ;;  %v1450_v3 = vrot.slane %v1437_v48, 4  ;;  %v1453_v18 = vsel %vm170_vm8, %v1437_v48, %v1452_v50 }
 0x4c4   :  { %v1374_v27 = vrot.slane %v1262_v20, 4  ;;  %v1371_v51 = vperm.slane %v1363_v44, %v2164_v1  ;;  %v1300_v52 = vpop.f32.mrf.mxu0  ;;  %v1439_v60 = vsel %vm170_vm8, %v1438_v47, %v1420_v42  ;;  %v1449_v31 = vperm.slane %v1441_v6, %v2172_v12 }
 0x4c5   :  { %v1361_v54 = vsel %vm170_vm8, %v1360_v49, %v1243_v24  ;;  %v1372_v55 = vrot.slane %v1300_v52, 4  ;;  %v2590_v8 = vperm.slane %v1439_v60, %v2172_v12  ;;  %v1451_v9 = vsel %vm170_vm8, %v1450_v3, %v1431_v41 }
 0x4c6   :  { %v1367_v29 = vperm.slane %v1361_v54, %v2164_v1  ;;  %v1398_v61 = vrot.slane %v1371_v51, 4  ;;  %v1375_v57 = vsel %vm170_vm8, %v1300_v52, %v1374_v27  ;;  %v1457_v21 = vperm.slane %v1451_v9, %v2172_v12 }
 0x4c7   :  { %v1373_v0 = vsel %vm170_vm8, %v1372_v55, %v1262_v20  ;;  %v1383_v2 = vperm.slane %v1375_v57, %v2164_v1  ;;  %v1461_v56 = vperm.slane %v1453_v18, %v2172_v12  ;;  %v1468_v49 = vrot.slane %v1449_v31, 4 }
 0x4c8   :  { %v1386_v5 = vrot.slane %v1367_v29, 4  ;;  %v1379_v62 = vperm.slane %v1373_v0, %v2164_v1  ;;  %v1462_v28 = vrot.slane %v1457_v21, 4  ;;  %v1464_v54 = vrot.slane %v2590_v8, 4 }
 0x4c9   :  { %v1396_v53 = vrot.slane %v1383_v2, 4  ;;  %v1399_v58 = vsel %vm170_vm8, %v1383_v2, %v1398_v61  ;;  %v1466_v20 = vrot.slane %v1461_v56, 4  ;;  %v1469_v2 = vsel %vm170_vm8, %v1461_v56, %v1468_v49 }
 0x4ca   :  { %v1384_v7 = vrot.slane %v1379_v62, 4  ;;  %v1387_v4 = vsel %vm170_vm8, %v1379_v62, %v1386_v5  ;;  %v1407_v17 = vperm.slane %v1399_v58, %v2172_v12  ;;  %v1283_v19 = vpop.f32.mrf.mxu3  ;;  %v2607_v34 = vsel %vm170_vm8, %v1462_v28, %v2590_v8 }
 0x4cb   :  { %v1395_v13 = vperm.slane %v1387_v4, %v2172_v12  ;;  %v1397_v22 = vsel %vm170_vm8, %v1396_v53, %v1371_v51  ;;  %v1264_v14 = vpop.f32.mrf.mxu2  ;;  %v1467_v0 = vsel %vm170_vm8, %v1466_v20, %v1449_v31  ;;  %v1465_v58 = vsel %vm170_vm8, %v1457_v21, %v1464_v54  ;;  %v1902_v4 = vld [vmem:[%s2729_s5] sm:$0xff] }
 0x4cc   :  { %v1385_v23 = vsel %vm170_vm8, %v1384_v7, %v1367_v29  ;;  %v1403_v24 = vperm.slane %v1397_v22, %v2172_v12  ;;  %v1414_v25 = vrot.slane %v1407_v17, 4  ;;  %v1302_v26 = vpop.f32.mrf.mxu0  ;;  %v1903_v7 = vld [vmem:[%s2729_s5 + $0x8] sm:$0xff] }
 0x4cd   :  { %v1391_v63 = vperm.slane %v1385_v23, %v2172_v12  ;;  %v1410_v30 = vrot.slane %v1395_v13, 4  ;;  %1586 = vmatpush.bf16.msra.mxu1 %v1903_v7 }
 0x4ce   :  { %v1412_v33 = vrot.slane %v1403_v24, 4  ;;  %v1415_v32 = vsel %vm170_vm8, 0.0, %v1414_v25  ;;  %v1481_v11 = vsel %vm170_vm8, %v1414_v25, %v1403_v24 }
 0x4cf   :  { %v1408_v35 = vrot.slane %v1391_v63, 4  ;;  %v1411_v36 = vsel %vm170_vm8, 0.0, %v1410_v30  ;;  %v1470_v37 = vsel %vm170_vm8, %v1410_v30, %v1391_v63  ;;  %v1485_v15 = vperm.slane %v1481_v11, %v2164_v1 }
 0x4d0   :  { %v1413_v38 = vsel %vm170_vm8, 0.0, %v1412_v33  ;;  %v1475_v39 = vrot.slane %v1411_v36, 4  ;;  %v1486_v41 = vrot.slane %v1415_v32, 4  ;;  %v1474_v40 = vperm.slane %v1470_v37, %v2164_v1  ;;  %v1983_v32 = vld [vmem:[%s2728_s6] ss:$0 sm:$0xff] }
 0x4d1   :  { %v1506_v42 = vrot.slane %v1485_v15, 4  ;;  %v1409_v16 = vsel %vm170_vm8, 0.0, %v1408_v35  ;;  %1587 = vmatpush.bf16.msra.mxu1 %v1902_v4  ;;  %v2038_v36 = vld [vmem:[%s2723_s0] sm:$0xff] }
 0x4d2   :  { %v1487_v43 = vsel %vm170_vm8, %v1486_v41, %v1413_v38  ;;  %v1476_v45 = vsel %vm170_vm8, %v1475_v39, %v1409_v16  ;;  %v1494_v46 = vrot.slane %v1474_v40, 4  ;;  %v2039_v39 = vld [vmem:[%s2723_s0 + $0x8] sm:$0xff] }
 0x4d3   :  { %v1491_v47 = vperm.slane %v1487_v43, %v2164_v1  ;;  %v1480_v48 = vperm.slane %v1476_v45, %v2164_v1 }
 0x4d5   :  { %v1495_v44 = vsel %vm170_vm8, %v1480_v48, %v1494_v46  ;;  %v1507_v50 = vsel %vm170_vm8, %v1491_v47, %v1506_v42  ;;  %v1492_v27 = vrot.slane %v1480_v48, 4  ;;  %v1504_v51 = vrot.slane %v1491_v47, 4 }
 0x4d6   :  { %v1503_v52 = vperm.slane %v1495_v44, %v2172_v12  ;;  %v1515_v59 = vperm.slane %v1507_v50, %v2172_v12 }
 0x4d7   :  { %v1493_v55 = vsel %vm170_vm8, %v1492_v27, %v1474_v40  ;;  %v1505_v29 = vsel %vm170_vm8, %v1504_v51, %v1485_v15 }
 0x4d8   :  { %v1520_v61 = vrot.slane %v1515_v59, 4  ;;  %v1522_v1 = vrot.slane %v1503_v52, 4  ;;  %v1499_v57 = vperm.slane %v1493_v55, %v2172_v12  ;;  %v1511_v60 = vperm.slane %v1505_v29, %v2172_v12 }
 0x4da   :  { %v1521_v3 = vsel %vm170_vm8, %v1520_v61, %v1503_v52  ;;  %v1523_v5 = vsel %vm170_vm8, %v1515_v59, %v1522_v1  ;;  %v1516_v62 = vrot.slane %v1511_v60, 4  ;;  %v1518_v6 = vrot.slane %v1499_v57, 4  ;;  %v1905_v52 = vld [vmem:[%s2733_s9 + $0x8] sm:$0xff]  ;;  %v1904_v59 = vld [vmem:[%s2733_s9] sm:$0xff] }
 0x4db   :  { %v1970_v18 = vpack.i.bf16 %v1521_v3, %v1467_v0  ;;  %v1975_v53 = vpack.i.bf16 %v1523_v5, %v1469_v2  ;;  %1682 = vmatpush.bf16.msra.mxu2 %v1905_v52 }
 0x4dc   :  { %v1519_v8 = vsel %vm170_vm8, %v1511_v60, %v1518_v6  ;;  %v1517_v9 = vsel %vm170_vm8, %v1516_v62, %v1499_v57 }
 0x4dd   :  { %1971 = vrot.lane.b32.xlu1 %v1970_v18, %s2048_s23  ;;  %1976 = vrot.lane.b32.xlu2 %v1975_v53, %s2049_s24  ;;  %v1965_v12 = vpack.i.bf16 %v1519_v8, %v1465_v58 }
 0x4df   :  { %1966 = vrot.lane.b32.xlu0 %v1965_v12, %s2050_s25  ;;  %1683 = vmatpush.bf16.msra.mxu2 %v1904_v59  ;;  %v1985_v12 = vld [vmem:[%s2731_s8] ss:$0 sm:$0xff] }
 0x537   :  { %v1977_v19 = vpop.permute.xlu2 %1976 }
 0x538   :  { %v1979_v24 = vunpack.i.h.bf16 %v1977_v19  ;;  %v1978_v25 = vunpack.i.l.bf16 %v1977_v19 }
 0x54f   :  { %v1972_v17 = vpop.permute.xlu1 %1971 }
 0x550   :  { %v1974_v14 = vunpack.i.h.bf16 %v1972_v17  ;;  %v1973_v23 = vunpack.i.l.bf16 %v1972_v17 }
 0x551   :  { %v1967_v21 = vpop.permute.xlu0 %1966 }
 0x552   :  { %v1969_v13 = vunpack.i.h.bf16 %v1967_v21  ;;  %v1968_v22 = vunpack.i.l.bf16 %v1967_v21 }
 0x554   :  { %v1548_v26 = vsel %vm902_vm9, %v2607_v34, %v1968_v22  ;;  %v1549_v28 = vsel %vm902_vm9, %v1517_v9, %v1969_v13  ;;  %v1913_v22 = vld [vmem:[%s2735_s11 + $0x38] sm:$0xff] }
 0x555   :  { %v1551_v63 = vsel %vm1550_vm11, %v1548_v26, %v1973_v23  ;;  %v1552_v30 = vsel %vm1550_vm11, %v1549_v28, %v1974_v14  ;;  %1801 = vmatpush.bf16.msra.mxu3 %v1913_v22  ;;  %v1986_v14 = vld [vmem:[%s2732_s10] ss:$0 sm:$0xff]  ;;  %v1912_v23 = vld [vmem:[%s2735_s11 + $0x30] sm:$0xff]  ;;  %v1911_v26 = vld [vmem:[%s2735_s11 + $0x28] sm:$0xff] }
 0x556   :  { %v1554_v31 = vsel %vm1553_vm12, %v1551_v63, %v1978_v25  ;;  %v1555_v56 = vsel %vm1553_vm12, %v1552_v30, %v1979_v24  ;;  %v1910_v30 = vld [vmem:[%s2735_s11 + $0x20] sm:$0xff] }
 0x557   :  { %v1556_v33 = vpack.c.bf16 %v1555_v56, %v1554_v31 }
 0x559   :  { %1856 = vmatmul.msk.bf16.vlgmr.msra.gmra.mxu1 %vm49_vm0, %v1556_v33  ;;  %1802 = vmatpush.bf16.msra.mxu3 %v1912_v23  ;;  %v1909_v33 = vld [vmem:[%s2735_s11 + $0x18] sm:$0xff] }
 0x55d   :  { %1803 = vmatpush.bf16.msra.mxu3 %v1911_v26 }
 0x561   :  { %1804 = vmatpush.bf16.msra.mxu3 %v1910_v30 }
 0x565   :  { %1805 = vmatpush.bf16.msra.mxu3 %v1909_v33 }
 0x5d6   :  { %v1589_v11 = vpop.f32.mrf.mxu1 }
 0x5d7   :  { %v1590_v35 = vadd.f32 %v1983_v32, %v1589_v11  ;;  %v1908_v11 = vld [vmem:[%s2735_s11 + $0x10] sm:$0xff] }
 0x5d8   :  { %1806 = vmatpush.bf16.msra.mxu3 %v1908_v11 }
 0x5d9   :  { %v2651_v34 = vadd.f32 %v2038_v36, %v1590_v35 }
 0x5db   :  { %v1598_v37 = vsel %vm49_vm0, %v2651_v34, 0.0 }
 0x5dc   :  { %1599 = vadd.xlane.f32.xlu0 %v1598_v37 }
 0x5de   :  { %v1591_v15 = vpop.f32.mrf.mxu1 }
 0x5df   :  { %v1592_v38 = vadd.f32 %v1983_v32, %v1591_v15  ;;  %v1907_v15 = vld [vmem:[%s2735_s11 + $0x8] sm:$0xff] }
 0x5e0   :  { %1807 = vmatpush.bf16.msra.mxu3 %v1907_v15 }
 0x5e1   :  { %v2658_v41 = vadd.f32 %v2039_v39, %v1592_v38  ;;  %v1906_v38 = vld [vmem:[%s2735_s11] sm:$0xff] }
 0x5e3   :  { %v1601_v40 = vsel %vm49_vm0, %v2658_v41, 0.0 }
 0x5e4   :  { %1602 = vadd.xlane.f32.xlu1 %v1601_v40  ;;  %1808 = vmatpush.bf16.msra.mxu3 %v1906_v38 }
 0x64f   :  { %v1600_v42 = vpop.xlane.xlu0 %1599 }
 0x650   :  { %v1604_v16 = vmul.f32 %v1600_v42, %v2129_v10 }
 0x652   :  { %v1606_v43 = vsub.f32 %v2651_v34, %v1604_v16 }
 0x654   :  { %v1608_v45 = vmul.f32 %v1606_v43, %v1606_v43 }
 0x656   :  { %v1610_v46 = vsel %vm49_vm0, %v1608_v45, 0.0 }
 0x657   :  { %v1603_v47 = vpop.xlane.xlu1 %1602  ;;  %1611 = vadd.xlane.f32.xlu2 %v1610_v46 }
 0x658   :  { %v1605_v48 = vmul.f32 %v1603_v47, %v2129_v10 }
 0x65a   :  { %v1607_v20 = vsub.f32 %v2658_v41, %v1605_v48 }
 0x65c   :  { %v1609_v49 = vmul.f32 %v1607_v20, %v1607_v20 }
 0x65e   :  { %v1613_v44 = vsel %vm49_vm0, %v1609_v49, 0.0 }
 0x65f   :  { %1614 = vadd.xlane.f32.xlu0 %v1613_v44 }
 0x6ca   :  { %v1612_v50 = vpop.xlane.xlu2 %1611 }
 0x6cb   :  { %v1616_v27 = vmul.f32 %v1612_v50, %v2129_v10 }
 0x6cd   :  { %v1618_v51 = vadd.f32 1e-05, %v1616_v27 }
 0x6cf   :  { %2026 = vrsqrt.f32 %v1618_v51  ;;  %vm1626_vm14 = vweird.f32 %v1618_v51 }
 0x6d2   :  { %v1615_v54 = vpop.xlane.xlu0 %1614 }
 0x6d3   :  { %v1617_v55 = vmul.f32 %v1615_v54, %v2129_v10  ;;  %v1984_v10 = vld [vmem:[%s2730_s7] ss:$0 sm:$0xff] }
 0x6d5   :  { %v2027_v29 = vpop.eup %2026  ;;  %v1619_v61 = vadd.f32 1e-05, %v1617_v55 }
 0x6d6   :  { %v1621_v1 = vmul.f32 %v2027_v29, %v1618_v51  ;;  %vm1627_vm13 = vweird.f32 %v2027_v29 }
 0x6d7   :  { %2028 = vrsqrt.f32 %v1619_v61  ;;  %vm1628_vm15 = vmor %vm1626_vm14, %vm1627_vm13  ;;  %vm1636_vm2 = vweird.f32 %v1619_v61 }
 0x6d8   :  { %v1622_v57 = vmul.f32 %v2027_v29, %v1621_v1 }
 0x6da   :  { %v1623_v60 = vmul.f32 0.5, %v1622_v57 }
 0x6dc   :  { %v1624_v0 = vsub.f32 1.5, %v1623_v60 }
 0x6dd   :  { %v2029_v2 = vpop.eup %2028 }
 0x6de   :  { %v1625_v3 = vmul.f32 %v2027_v29, %v1624_v0  ;;  %v1631_v5 = vmul.f32 %v2029_v2, %v1619_v61  ;;  %vm1637_vm1 = vweird.f32 %v2029_v2 }
 0x6df   :  { %vm1638_vm3 = vmor %vm1636_vm2, %vm1637_vm1 }
 0x6e0   :  { %v1632_v62 = vmul.f32 %v2029_v2, %v1631_v5  ;;  %v1629_v6 = vsel %vm1628_vm15, %v2027_v29, %v1625_v3 }
 0x6e1   :  { %v1640_v58 = vmul.f32 %v1629_v6, %v1606_v43 }
 0x6e2   :  { %v1633_v18 = vmul.f32 0.5, %v1632_v62 }
 0x6e3   :  { %v1645_v7 = vmul.f32 %v1984_v10, %v1640_v58 }
 0x6e4   :  { %v1634_v53 = vsub.f32 1.5, %v1633_v18 }
 0x6e5   :  { %v1650_v19 = vadd.f32 %v1985_v12, %v1645_v7 }
 0x6e6   :  { %v1635_v8 = vmul.f32 %v2029_v2, %v1634_v53 }
 0x6e8   :  { %v1639_v9 = vsel %vm1638_vm3, %v2029_v2, %v1635_v8  ;;  %v1987_v2 = vld [vmem:[%s2734_s12] ss:$0 sm:$0xff] }
 0x6e9   :  { %v1641_v4 = vmul.f32 %v1639_v9, %v1607_v20 }
 0x6eb   :  { %v1646_v17 = vmul.f32 %v1984_v10, %v1641_v4 }
 0x6ed   :  { %v1651_v21 = vadd.f32 %v1985_v12, %v1646_v17 }
 0x6ef   :  { %v1652_v13 = vpack.c.bf16 %v1651_v21, %v1650_v19 }
 0x6f1   :  { %1865 = vmatmul.msk.bf16.vlgmr.msra.gmra.mxu2 %vm49_vm0, %v1652_v13 }
 0x774   :  { %v1685_v24 = vpop.f32.mrf.mxu2 }
 0x775   :  { %v1686_v25 = vadd.f32 %v1986_v14, %v1685_v24 }
 0x777   :  { %v1866_v28 = vmul.f32 -1.702, %v1686_v25 }
 0x779   :  { %v1694_v63 = vmul.f32 1.442695, %v1866_v28 }
 0x77b   :  { %2030 = vpow2.f32 %v1694_v63 }
 0x77c   :  { %v1687_v31 = vpop.f32.mrf.mxu2 }
 0x77d   :  { %v1688_v56 = vadd.f32 %v1986_v14, %v1687_v31 }
 0x77f   :  { %v1867_v32 = vmul.f32 -1.702, %v1688_v56 }
 0x781   :  { %v2031_v35 = vpop.eup %2030  ;;  %v1696_v36 = vmul.f32 1.442695, %v1867_v32 }
 0x782   :  { %v1698_v37 = vadd.f32 1.0, %v2031_v35 }
 0x783   :  { %2032 = vpow2.f32 %v1696_v36 }
 0x784   :  { %2034 = vrcp.f32 %v1698_v37  ;;  %v1711_v20 = vand.u32 2147483648, %v1698_v37  ;;  %vm1705_vm5 = vweird.f32 %v1698_v37  ;;  %v1709_v49 = vand.u32 2147483647, %v1698_v37 }
 0x786   :  { %v1712_v59 = vor.u32 1.1754944e-38, %v1711_v20  ;;  %vm1710_vm8 = vcmp.eq.f32.partialorder %v1709_v49, 8.507059e+37 }
 0x789   :  { %v2033_v39 = vpop.eup %2032 }
 0x78a   :  { %v2035_v40 = vpop.eup %2034  ;;  %v1699_v42 = vadd.f32 1.0, %v2033_v39 }
 0x78b   :  { %v1701_v16 = vmul.f32 %v2035_v40, %v1698_v37  ;;  %vm1706_vm4 = vweird.f32 %v2035_v40 }
 0x78c   :  { %2036 = vrcp.f32 %v1699_v42  ;;  %vm1707_vm6 = vmor %vm1705_vm5, %vm1706_vm4  ;;  %v1726_v50 = vand.u32 2147483648, %v1699_v42  ;;  %v1724_v52 = vand.u32 2147483647, %v1699_v42  ;;  %vm1720_vm9 = vweird.f32 %v1699_v42 }
 0x78d   :  { %v1702_v43 = vsub.f32 1.0, %v1701_v16 }
 0x78e   :  { %v1727_v29 = vor.u32 1.1754944e-38, %v1726_v50  ;;  %vm1725_vm11 = vcmp.eq.f32.partialorder %v1724_v52, 8.507059e+37 }
 0x78f   :  { %v1703_v45 = vmul.f32 %v2035_v40, %v1702_v43 }
 0x791   :  { %v1704_v47 = vadd.f32 %v2035_v40, %v1703_v45 }
 0x792   :  { %v2037_v46 = vpop.eup %2036 }
 0x793   :  { %v1716_v48 = vmul.f32 %v2037_v46, %v1699_v42  ;;  %v1708_v27 = vsel %vm1707_vm6, %v2035_v40, %v1704_v47  ;;  %vm1721_vm7 = vweird.f32 %v2037_v46 }
 0x794   :  { %v1713_v55 = vsel %vm1710_vm8, %v1712_v59, %v1708_v27  ;;  %vm1722_vm10 = vmor %vm1720_vm9, %vm1721_vm7 }
 0x795   :  { %v1717_v44 = vsub.f32 1.0, %v1716_v48  ;;  %v1730_v57 = vmul.f32 %v1713_v55, %v1686_v25 }
 0x797   :  { %v1718_v51 = vmul.f32 %v2037_v46, %v1717_v44 }
 0x799   :  { %v1719_v54 = vadd.f32 %v2037_v46, %v1718_v51 }
 0x79b   :  { %v1723_v61 = vsel %vm1722_vm10, %v2037_v46, %v1719_v54 }
 0x79c   :  { %v1728_v1 = vsel %vm1725_vm11, %v1727_v29, %v1723_v61 }
 0x79d   :  { %v1731_v60 = vmul.f32 %v1728_v1, %v1688_v56 }
 0x79f   :  { %v1732_v0 = vpack.c.bf16 %v1731_v60, %v1730_v57 }
 0x7a1   :  { %1809 = vmatmul.bf16.vlgmr.msra.gmra.mxu3 %v1732_v0 }
 0x824   :  { %v1810_v3 = vpop.f32.mrf.mxu3 }
 0x825   :  { %v1811_v5 = vadd.f32 %v1987_v2, %v1810_v3 }
 0x827   :  { %v1815_v62 = vadd.f32 %v1811_v5, %v2651_v34 }
 0x829   :  { %1817 = vst.msk [vmem:[%s2736_s13] sm:$0xff] %vm49_vm0, %v1815_v62 }
 0x82c   :  { %v1812_v6 = vpop.f32.mrf.mxu3 }
 0x82d   :  { %v1813_v18 = vadd.f32 %v1987_v2, %v1812_v6 }
 0x82f   :  { %v1816_v53 = vadd.f32 %v1813_v18, %v2658_v41 }
 0x831   :  { %1818 = vst.msk [vmem:[%s2736_s13 + $0x8] sm:$0xff] %vm49_vm0, %v1816_v53 }

// kernel: transformer_forward.2
= control target key start
LH: loop header
LB: loop body
LE: loop exit
PB: predicated region body
PF: predicated region fallthrough
CT: control target
= control target key end

     0   :  { %vm49_vm0 = vcmask 261120   ;;  %v2040_v4 = vmov 32.0   ;;  %s2042_s21 = smov 120   ;;  %v2045_v60 = vmov 1983009808   ;;  %vm170_vm8 = vcmask 1047556   ;;  %s2723_s0 = inlined_call_operand.vmem [shape: f32[2,8,32], index: 0, kind: input, shape index: {}]   ;;  %s2724_s1 = inlined_call_operand.vmem [shape: f32[1,32], index: 1, kind: input, shape index: {}]   ;;  %s2725_s2 = inlined_call_operand.vmem [shape: f32[1,32], index: 2, kind: input, shape index: {}]   ;;  %s2726_s4 = inlined_call_operand.vmem [shape: f32[1,96], index: 4, kind: input, shape index: {}]   ;;  %s2727_s3 = inlined_call_operand.vmem [shape: bf16[32,96], index: 3, kind: input, shape index: {}]   ;;  %s2728_s6 = inlined_call_operand.vmem [shape: f32[1,32], index: 6, kind: input, shape index: {}]   ;;  %s2729_s5 = inlined_call_operand.vmem [shape: bf16[32,32], index: 5, kind: input, shape index: {}]   ;;  %s2730_s7 = inlined_call_operand.vmem [shape: f32[1,32], index: 7, kind: input, shape index: {}]   ;;  %s2731_s8 = inlined_call_operand.vmem [shape: f32[1,32], index: 8, kind: input, shape index: {}]   ;;  %s2732_s10 = inlined_call_operand.vmem [shape: f32[1,128], index: 10, kind: input, shape index: {}]   ;;  %s2733_s9 = inlined_call_operand.vmem [shape: bf16[32,128], index: 9, kind: input, shape index: {}]   ;;  %s2734_s12 = inlined_call_operand.vmem [shape: f32[1,32], index: 12, kind: input, shape index: {}]   ;;  %s2735_s11 = inlined_call_operand.vmem [shape: bf16[128,32], index: 11, kind: input, shape index: {}]   ;;  %s2736_s13 = inlined_call_operand.vmem [shape: f32[2,8,32], index: 13, kind: output, shape index: {}]  }
   0x1   :  { %v45_v0 = vld [vmem:[%s2723_s0] sm:$0xff]  ;;  %v46_v2 = vld [vmem:[%s2723_s0 + $0x8] sm:$0xff]  ;;  %1988 = vrcp.f32 %v2040_v4  ;;  %v175_v61 = vunpack.c.l.s4 %v2045_v60  ;;  %v2046_v4 = vmov 1934713408   ;;  %vm902_vm9 = vcmask 64512   ;;  %s2047_s22 = smov 64  }
   0x2   :  { %v50_v1 = vsel %vm49_vm0, %v45_v0, 0.0  ;;  %v53_v3 = vsel %vm49_vm0, %v46_v2, 0.0  ;;  %v1901_v21 = vld [vmem:[%s2727_s3 + $0x8] sm:$0xff]  ;;  %v1900_v23 = vld [vmem:[%s2727_s3] sm:$0xff]  ;;  %vm1154_vm10 = vcmask 1043456   ;;  %s2048_s23 = smov 16  }
   0x3   :  { %51 = vadd.xlane.f32.xlu0 %v50_v1  ;;  %141 = vmatpush.bf16.msra.mxu0 %v1901_v21  ;;  %v1980_v42 = vld [vmem:[%s2724_s1] ss:$0 sm:$0xff]  ;;  %s2041_s1 = smov 104   ;;  %v2164_v1 = vunpack.c.0.s8 %v175_v61  ;;  %s2049_s24 = smov 24   ;;  %vm1550_vm11 = vcmask 130048   ;;  %vm1553_vm12 = vcmask 195584  }
   0x4   :  { %v1981_v47 = vld [vmem:[%s2725_s2] ss:$0 sm:$0xff]  ;;  %s2043_s2 = smov 112   ;;  %s2050_s25 = smov 8  }
   0x5   :  { %v1982_v52 = vld [vmem:[%s2726_s4] ss:$0 sm:$0xff]  ;;  %s2044_s4 = smov 96  }
   0x7   :  { %v1989_v5 = vpop.eup %1988  ;;  %142 = vmatpush.bf16.msra.mxu0 %v1900_v23 }
   0x8   :  { %v57_v6 = vmul.f32 32.0, %v1989_v5  ;;  %vm61_vm1 = vweird.f32 %v1989_v5 }
   0xa   :  { %v58_v7 = vsub.f32 1.0, %v57_v6 }
   0xb   :  { %54 = vadd.xlane.f32.xlu0 %v53_v3 }
   0xc   :  { %v59_v8 = vmul.f32 %v1989_v5, %v58_v7 }
   0xe   :  { %v60_v9 = vadd.f32 %v1989_v5, %v59_v8 }
  0x10   :  { %v2129_v10 = vsel %vm61_vm1, %v1989_v5, %v60_v9  ;;  %v199_v5 = vunpack.c.l.s4 %v2046_v4 }
  0x76   :  { %v52_v11 = vpop.xlane.xlu0 %51 }
  0x77   :  { %v63_v12 = vmul.f32 %v2129_v10, %v52_v11 }
  0x79   :  { %v65_v13 = vsub.f32 %v45_v0, %v63_v12  ;;  %v2172_v12 = vunpack.c.0.s8 %v199_v5 }
  0x7b   :  { %v67_v14 = vmul.f32 %v65_v13, %v65_v13 }
  0x7d   :  { %v69_v15 = vsel %vm49_vm0, %v67_v14, 0.0 }
  0x7e   :  { %70 = vadd.xlane.f32.xlu1 %v69_v15  ;;  %v55_v16 = vpop.xlane.xlu0 %54 }
  0x7f   :  { %v64_v17 = vmul.f32 %v2129_v10, %v55_v16 }
  0x81   :  { %v66_v18 = vsub.f32 %v46_v2, %v64_v17 }
  0x83   :  { %v68_v19 = vmul.f32 %v66_v18, %v66_v18 }
  0x85   :  { %v72_v20 = vsel %vm49_vm0, %v68_v19, 0.0 }
  0x86   :  { %73 = vadd.xlane.f32.xlu1 %v72_v20 }
  0xf1   :  { %v71_v22 = vpop.xlane.xlu1 %70 }
  0xf2   :  { %v75_v24 = vmul.f32 %v71_v22, %v2129_v10 }
  0xf4   :  { %v77_v25 = vadd.f32 1e-05, %v75_v24 }
  0xf6   :  { %1990 = vrsqrt.f32 %v77_v25  ;;  %vm85_vm3 = vweird.f32 %v77_v25 }
  0xf9   :  { %v74_v26 = vpop.xlane.xlu1 %73 }
  0xfa   :  { %v76_v27 = vmul.f32 %v74_v26, %v2129_v10 }
  0xfc   :  { %v1991_v28 = vpop.eup %1990  ;;  %v78_v29 = vadd.f32 1e-05, %v76_v27 }
  0xfd   :  { %v80_v30 = vmul.f32 %v1991_v28, %v77_v25  ;;  %vm86_vm2 = vweird.f32 %v1991_v28 }
  0xfe   :  { %1992 = vrsqrt.f32 %v78_v29  ;;  %vm87_vm4 = vmor %vm85_vm3, %vm86_vm2  ;;  %vm95_vm6 = vweird.f32 %v78_v29 }
  0xff   :  { %v81_v31 = vmul.f32 %v1991_v28, %v80_v30 }
 0x101   :  { %v82_v32 = vmul.f32 0.5, %v81_v31 }
 0x103   :  { %v83_v33 = vsub.f32 1.5, %v82_v32 }
 0x104   :  { %v1993_v34 = vpop.eup %1992 }
 0x105   :  { %v84_v35 = vmul.f32 %v1991_v28, %v83_v33  ;;  %v90_v36 = vmul.f32 %v1993_v34, %v78_v29  ;;  %vm96_vm5 = vweird.f32 %v1993_v34 }
 0x106   :  { %vm97_vm7 = vmor %vm95_vm6, %vm96_vm5 }
 0x107   :  { %v91_v37 = vmul.f32 %v1993_v34, %v90_v36  ;;  %v88_v38 = vsel %vm87_vm4, %v1991_v28, %v84_v35 }
 0x108   :  { %v99_v41 = vmul.f32 %v88_v38, %v65_v13 }
 0x109   :  { %v92_v39 = vmul.f32 0.5, %v91_v37 }
 0x10a   :  { %v104_v46 = vmul.f32 %v1980_v42, %v99_v41 }
 0x10b   :  { %v93_v40 = vsub.f32 1.5, %v92_v39 }
 0x10c   :  { %v109_v49 = vadd.f32 %v1981_v47, %v104_v46 }
 0x10d   :  { %v94_v43 = vmul.f32 %v1993_v34, %v93_v40 }
 0x10f   :  { %v98_v44 = vsel %vm97_vm7, %v1993_v34, %v94_v43 }
 0x110   :  { %v100_v45 = vmul.f32 %v98_v44, %v66_v18 }
 0x112   :  { %v105_v48 = vmul.f32 %v1980_v42, %v100_v45 }
 0x114   :  { %v110_v50 = vadd.f32 %v1981_v47, %v105_v48 }
 0x116   :  { %v111_v51 = vpack.c.bf16 %v110_v50, %v109_v49 }
 0x118   :  { %1831 = vmatmul.msk.bf16.vlgmr.msra.gmra.mxu0 %vm49_vm0, %v111_v51 }
 0x195   :  { %v144_v53 = vpop.f32.mrf.mxu0 }
 0x196   :  { %v145_v54 = vadd.f32 %v1982_v52, %v144_v53 }
 0x198   :  { %163 = vrot.lane.b32.xlu0 %v145_v54, %s2041_s1  ;;  %151 = vrot.lane.b32.xlu2 %v145_v54, %s2042_s21  ;;  %v172_v0 = vrot.slane %v145_v54, 4 }
 0x19d   :  { %v146_v55 = vpop.f32.mrf.mxu0 }
 0x19e   :  { %v2153_v56 = vadd.f32 %v1982_v52, %v146_v55 }
 0x1a0   :  { %153 = vrot.lane.b32.xlu1 %v2153_v56, %s2042_s21  ;;  %157 = vrot.lane.b32.xlu2 %v145_v54, %s2043_s2 }
 0x1a8   :  { %159 = vrot.lane.b32.xlu2 %v2153_v56, %s2043_s2 }
 0x1b0   :  { %165 = vrot.lane.b32.xlu2 %v2153_v56, %s2041_s1 }
 0x1f2   :  { %v152_v57 = vpop.permute.xlu2 %151 }
 0x1f3   :  { %v2158_v58 = vpack.i.bf16 %v152_v57, %v145_v54  ;;  %v184_v7 = vrot.slane %v152_v57, 4 }
 0x1f5   :  { %1926 = vrot.lane.b32.xlu2 %v2158_v58, %s2044_s4 }
 0x1fa   :  { %v158_v59 = vpop.permute.xlu2 %157 }
 0x1fb   :  { %v169_v63 = vrot.slane %v158_v59, 4  ;;  %v173_v2 = vsel %vm170_vm8, %v158_v59, %v172_v0 }
 0x1fc   :  { %v181_v6 = vperm.slane %v173_v2, %v2164_v1 }
 0x1fd   :  { %v171_v3 = vsel %vm170_vm8, %v169_v63, %v145_v54 }
 0x1fe   :  { %v177_v8 = vperm.slane %v171_v3, %v2164_v1  ;;  %v208_v16 = vrot.slane %v181_v6, 4 }
 0x200   :  { %v196_v20 = vrot.slane %v177_v8, 4 }
 0x202   :  { %v2162_v62 = vpop.permute.xlu2 %159 }
 0x20a   :  { %v164_v9 = vpop.permute.xlu0 %163  ;;  %v2170_v11 = vpop.permute.xlu2 %165 }
 0x20b   :  { %v182_v13 = vrot.slane %v164_v9, 4  ;;  %v185_v14 = vsel %vm170_vm8, %v164_v9, %v184_v7  ;;  %v2175_v15 = vpack.i.bf16 %v164_v9, %v158_v59  ;;  %v2180_v18 = vpack.i.bf16 %v2170_v11, %v2162_v62 }
 0x20c   :  { %v193_v17 = vperm.slane %v185_v14, %v2164_v1 }
 0x20d   :  { %v183_v19 = vsel %vm170_vm8, %v182_v13, %v152_v57  ;;  %1931 = vrot.lane.b32.xlu0 %v2175_v15, %s2044_s4  ;;  %1941 = vrot.lane.b32.xlu1 %v2180_v18, %s2044_s4 }
 0x20e   :  { %v189_v21 = vperm.slane %v183_v19, %v2164_v1  ;;  %v206_v22 = vrot.slane %v193_v17, 4  ;;  %v209_v23 = vsel %vm170_vm8, %v193_v17, %v208_v16  ;;  %v226_v16 = vrot.slane %v2162_v62, 4 }
 0x20f   :  { %v217_v24 = vperm.slane %v209_v23, %v2172_v12  ;;  %v228_v17 = vrot.slane %v2153_v56, 4 }
 0x210   :  { %v194_v25 = vrot.slane %v189_v21, 4  ;;  %v197_v26 = vsel %vm170_vm8, %v189_v21, %v196_v20  ;;  %v207_v27 = vsel %vm170_vm8, %v206_v22, %v181_v6  ;;  %v238_v20 = vrot.slane %v2170_v11, 4 }
 0x211   :  { %v205_v28 = vperm.slane %v197_v26, %v2172_v12  ;;  %v213_v29 = vperm.slane %v207_v27, %v2172_v12  ;;  %v224_v30 = vrot.slane %v217_v24, 4  ;;  %v227_v21 = vsel %vm170_vm8, %v226_v16, %v2153_v56 }
 0x212   :  { %v195_v31 = vsel %vm170_vm8, %v194_v25, %v177_v8  ;;  %v154_v32 = vpop.permute.xlu1 %153  ;;  %v229_v22 = vsel %vm170_vm8, %v2162_v62, %v228_v17  ;;  %v233_v25 = vperm.slane %v227_v21, %v2164_v1 }
 0x213   :  { %v201_v33 = vperm.slane %v195_v31, %v2172_v12  ;;  %v220_v34 = vrot.slane %v205_v28, 4  ;;  %v222_v35 = vrot.slane %v213_v29, 4  ;;  %v225_v36 = vsel %vm170_vm8, 0.0, %v224_v30 }
 0x214   :  { %v293_v37 = vsel %vm170_vm8, %v224_v30, %v213_v29  ;;  %v298_v38 = vrot.slane %v225_v36, 4  ;;  %v2201_v41 = vpack.i.bf16 %v154_v32, %v2153_v56  ;;  %v240_v19 = vrot.slane %v154_v32, 4 }
 0x215   :  { %v221_v39 = vsel %vm170_vm8, 0.0, %v220_v34  ;;  %v223_v40 = vsel %vm170_vm8, 0.0, %v222_v35  ;;  %v218_v43 = vrot.slane %v201_v33, 4  ;;  %v282_v44 = vsel %vm170_vm8, %v220_v34, %v201_v33 }
 0x216   :  { %v287_v42 = vrot.slane %v221_v39, 4  ;;  %1936 = vrot.lane.b32.xlu2 %v2201_v41, %s2044_s4  ;;  %v286_v45 = vperm.slane %v282_v44, %v2164_v1  ;;  %v297_v47 = vperm.slane %v293_v37, %v2164_v1  ;;  %v299_v48 = vsel %vm170_vm8, %v298_v38, %v223_v40 }
 0x217   :  { %v219_v46 = vsel %vm170_vm8, 0.0, %v218_v43  ;;  %v303_v51 = vperm.slane %v299_v48, %v2164_v1  ;;  %v239_v23 = vsel %vm170_vm8, %v238_v20, %v154_v32  ;;  %v241_v24 = vsel %vm170_vm8, %v2170_v11, %v240_v19 }
 0x218   :  { %v288_v49 = vsel %vm170_vm8, %v287_v42, %v219_v46  ;;  %v306_v52 = vrot.slane %v286_v45, 4  ;;  %v318_v53 = vrot.slane %v297_v47, 4  ;;  %v237_v26 = vperm.slane %v229_v22, %v2164_v1 }
 0x219   :  { %v292_v50 = vperm.slane %v288_v49, %v2164_v1  ;;  %v316_v61 = vrot.slane %v303_v51, 4  ;;  %v245_v27 = vperm.slane %v239_v23, %v2164_v1  ;;  %v249_v28 = vperm.slane %v241_v24, %v2164_v1 }
 0x21a   :  { %v319_v55 = vsel %vm170_vm8, %v303_v51, %v318_v53  ;;  %v252_v29 = vrot.slane %v233_v25, 4  ;;  %v264_v30 = vrot.slane %v237_v26, 4 }
 0x21b   :  { %v307_v54 = vsel %vm170_vm8, %v292_v50, %v306_v52  ;;  %v327_v59 = vperm.slane %v319_v55, %v2172_v12  ;;  %v304_v60 = vrot.slane %v292_v50, 4  ;;  %v317_v3 = vsel %vm170_vm8, %v316_v61, %v297_v47 }
 0x21c   :  { %v315_v57 = vperm.slane %v307_v54, %v2172_v12  ;;  %v323_v6 = vperm.slane %v317_v3, %v2172_v12  ;;  %v250_v31 = vrot.slane %v245_v27, 4  ;;  %v253_v56 = vsel %vm170_vm8, %v245_v27, %v252_v29 }
 0x21d   :  { %v332_v63 = vrot.slane %v327_v59, 4  ;;  %v305_v2 = vsel %vm170_vm8, %v304_v60, %v286_v45  ;;  %v262_v33 = vrot.slane %v249_v28, 4  ;;  %v265_v62 = vsel %vm170_vm8, %v249_v28, %v264_v30 }
 0x21e   :  { %v334_v0 = vrot.slane %v315_v57, 4  ;;  %v311_v5 = vperm.slane %v305_v2, %v2172_v12  ;;  %v328_v8 = vrot.slane %v323_v6, 4  ;;  %v251_v32 = vsel %vm170_vm8, %v250_v31, %v233_v25 }
 0x21f   :  { %v2220_v4 = vsel %vm170_vm8, %v332_v63, %v315_v57  ;;  %v261_v11 = vperm.slane %v253_v56, %v2172_v12  ;;  %v273_v34 = vperm.slane %v265_v62, %v2172_v12  ;;  %v263_v35 = vsel %vm170_vm8, %v262_v33, %v237_v26 }
 0x220   :  { %v2225_v7 = vsel %vm170_vm8, %v327_v59, %v334_v0  ;;  %v330_v9 = vrot.slane %v311_v5, 4  ;;  %v2228_v13 = vsel %vm170_vm8, %v328_v8, %v311_v5  ;;  %v257_v37 = vperm.slane %v251_v32, %v2172_v12 }
 0x221   :  { %v269_v38 = vperm.slane %v263_v35, %v2172_v12  ;;  %v276_v39 = vrot.slane %v261_v11, 4  ;;  %v280_v40 = vrot.slane %v273_v34, 4 }
 0x222   :  { %v2231_v14 = vsel %vm170_vm8, %v323_v6, %v330_v9  ;;  %v274_v42 = vrot.slane %v257_v37, 4 }
 0x223   :  { %v277_v43 = vsel %vm170_vm8, 0.0, %v276_v39  ;;  %v278_v44 = vrot.slane %v269_v38, 4  ;;  %v281_v45 = vsel %vm170_vm8, 0.0, %v280_v40  ;;  %v336_v48 = vsel %vm170_vm8, %v276_v39, %v257_v37 }
 0x224   :  { %v275_v47 = vsel %vm170_vm8, 0.0, %v274_v42  ;;  %v341_v49 = vrot.slane %v277_v43, 4  ;;  %v352_v50 = vrot.slane %v281_v45, 4  ;;  %v347_v52 = vsel %vm170_vm8, %v280_v40, %v269_v38 }
 0x225   :  { %v279_v51 = vsel %vm170_vm8, 0.0, %v278_v44  ;;  %v2262_v59 = vperm.slane %v336_v48, %v2164_v1  ;;  %v2268_v63 = vperm.slane %v347_v52, %v2164_v1 }
 0x226   :  { %v2265_v61 = vsel %vm170_vm8, %v341_v49, %v275_v47  ;;  %v2271_v0 = vsel %vm170_vm8, %v352_v50, %v279_v51 }
 0x24f   :  { %v1927_v36 = vpop.permute.xlu2 %1926 }
 0x250   :  { %v1929_v53 = vunpack.i.h.bf16 %v1927_v36  ;;  %v1928_v54 = vunpack.i.l.bf16 %v1927_v36 }
 0x252   :  { %v436_v2 = vrot.slane %v1929_v53, 4  ;;  %v424_v3 = vrot.slane %v1928_v54, 4 }
 0x270   :  { %v1937_v46 = vpop.permute.xlu2 %1936 }
 0x271   :  { %v1939_v55 = vunpack.i.h.bf16 %v1937_v46  ;;  %v1938_v57 = vunpack.i.l.bf16 %v1937_v46 }
 0x273   :  { %v492_v9 = vrot.slane %v1939_v55, 4  ;;  %v480_v16 = vrot.slane %v1938_v57, 4 }
 0x27f   :  { %v1932_v60 = vpop.permute.xlu0 %1931  ;;  %v1942_v8 = vpop.permute.xlu1 %1941 }
 0x280   :  { %v1934_v5 = vunpack.i.h.bf16 %v1932_v60  ;;  %v1933_v6 = vunpack.i.l.bf16 %v1932_v60  ;;  %v1944_v17 = vunpack.i.h.bf16 %v1942_v8  ;;  %v1943_v19 = vunpack.i.l.bf16 %v1942_v8 }
 0x282   :  { %v434_v20 = vrot.slane %v1934_v5, 4  ;;  %v422_v21 = vrot.slane %v1933_v6, 4  ;;  %v425_v22 = vsel %vm170_vm8, %v1933_v6, %v424_v3  ;;  %v437_v23 = vsel %vm170_vm8, %v1934_v5, %v436_v2 }
 0x283   :  { %v433_v24 = vperm.slane %v425_v22, %v2164_v1  ;;  %v445_v25 = vperm.slane %v437_v23, %v2164_v1  ;;  %v490_v26 = vrot.slane %v1944_v17, 4  ;;  %v478_v27 = vrot.slane %v1943_v19, 4 }
 0x284   :  { %v423_v28 = vsel %vm170_vm8, %v422_v21, %v1928_v54  ;;  %v435_v29 = vsel %vm170_vm8, %v434_v20, %v1929_v53  ;;  %v481_v30 = vsel %vm170_vm8, %v1943_v19, %v480_v16  ;;  %v493_v31 = vsel %vm170_vm8, %v1944_v17, %v492_v9 }
 0x285   :  { %v429_v56 = vperm.slane %v423_v28, %v2164_v1  ;;  %v441_v33 = vperm.slane %v435_v29, %v2164_v1  ;;  %v458_v62 = vrot.slane %v445_v25, 4  ;;  %v460_v32 = vrot.slane %v433_v24, 4 }
 0x286   :  { %v479_v11 = vsel %vm170_vm8, %v478_v27, %v1938_v57  ;;  %v489_v34 = vperm.slane %v481_v30, %v2164_v1  ;;  %v491_v35 = vsel %vm170_vm8, %v490_v26, %v1939_v55  ;;  %v501_v36 = vperm.slane %v493_v31, %v2164_v1 }
 0x287   :  { %v446_v37 = vrot.slane %v441_v33, 4  ;;  %v448_v38 = vrot.slane %v429_v56, 4  ;;  %v459_v39 = vsel %vm170_vm8, %v458_v62, %v433_v24  ;;  %v461_v40 = vsel %vm170_vm8, %v445_v25, %v460_v32 }
 0x288   :  { %v465_v42 = vperm.slane %v459_v39, %v2172_v12  ;;  %v469_v43 = vperm.slane %v461_v40, %v2172_v12  ;;  %v485_v44 = vperm.slane %v479_v11, %v2164_v1  ;;  %v497_v45 = vperm.slane %v491_v35, %v2164_v1 }
 0x289   :  { %v447_v46 = vsel %vm170_vm8, %v446_v37, %v429_v56  ;;  %v449_v47 = vsel %vm170_vm8, %v441_v33, %v448_v38  ;;  %v514_v48 = vrot.slane %v501_v36, 4  ;;  %v516_v49 = vrot.slane %v489_v34, 4 }
 0x28a   :  { %v453_v50 = vperm.slane %v447_v46, %v2172_v12  ;;  %v457_v51 = vperm.slane %v449_v47, %v2172_v12  ;;  %v474_v52 = vrot.slane %v465_v42, 4  ;;  %v476_v53 = vrot.slane %v469_v43, 4 }
 0x28b   :  { %v502_v54 = vrot.slane %v497_v45, 4  ;;  %v504_v55 = vrot.slane %v485_v44, 4  ;;  %v515_v57 = vsel %vm170_vm8, %v514_v48, %v489_v34  ;;  %v517_v60 = vsel %vm170_vm8, %v501_v36, %v516_v49 }
 0x28c   :  { %v470_v2 = vrot.slane %v453_v50, 4  ;;  %v472_v3 = vrot.slane %v457_v51, 4  ;;  %v475_v5 = vsel %vm170_vm8, 0.0, %v474_v52  ;;  %v477_v6 = vsel %vm170_vm8, 0.0, %v476_v53 }
 0x28d   :  { %v550_v8 = vrot.slane %v477_v6, 4  ;;  %v503_v9 = vsel %vm170_vm8, %v502_v54, %v485_v44  ;;  %v505_v16 = vsel %vm170_vm8, %v497_v45, %v504_v55  ;;  %v521_v17 = vperm.slane %v515_v57, %v2172_v12 }
 0x28e   :  { %v473_v19 = vsel %vm170_vm8, 0.0, %v472_v3  ;;  %v509_v20 = vperm.slane %v503_v9, %v2172_v12  ;;  %v513_v21 = vperm.slane %v505_v16, %v2172_v12  ;;  %v525_v22 = vperm.slane %v517_v60, %v2172_v12 }
 0x28f   :  { %v530_v23 = vrot.slane %v521_v17, 4  ;;  %v471_v24 = vsel %vm170_vm8, 0.0, %v470_v2  ;;  %v534_v25 = vsel %vm170_vm8, %v472_v3, %v453_v50  ;;  %v539_v26 = vrot.slane %v473_v19, 4 }
 0x290   :  { %v526_v27 = vrot.slane %v509_v20, 4  ;;  %v528_v28 = vrot.slane %v513_v21, 4  ;;  %v532_v29 = vrot.slane %v525_v22, 4  ;;  %v538_v30 = vperm.slane %v534_v25, %v2164_v1 }
 0x291   :  { %v531_v31 = vsel %vm170_vm8, 0.0, %v530_v23  ;;  %v540_v56 = vsel %vm170_vm8, %v539_v26, %v471_v24  ;;  %v545_v33 = vsel %vm170_vm8, %v476_v53, %v465_v42  ;;  %v551_v62 = vsel %vm170_vm8, %v550_v8, %v475_v5 }
 0x292   :  { %v529_v32 = vsel %vm170_vm8, 0.0, %v528_v28  ;;  %v533_v11 = vsel %vm170_vm8, 0.0, %v532_v29  ;;  %v599_v34 = vsel %vm170_vm8, %v532_v29, %v521_v17  ;;  %v544_v35 = vperm.slane %v540_v56, %v2164_v1 }
 0x293   :  { %v593_v36 = vrot.slane %v529_v32, 4  ;;  %v604_v37 = vrot.slane %v533_v11, 4  ;;  %v549_v38 = vperm.slane %v545_v33, %v2164_v1  ;;  %v555_v39 = vperm.slane %v551_v62, %v2164_v1 }
 0x294   :  { %v558_v40 = vrot.slane %v538_v30, 4  ;;  %v527_v42 = vsel %vm170_vm8, 0.0, %v526_v27  ;;  %v588_v43 = vsel %vm170_vm8, %v528_v28, %v509_v20  ;;  %v603_v44 = vperm.slane %v599_v34, %v2164_v1 }
 0x295   :  { %v570_v45 = vrot.slane %v549_v38, 4  ;;  %v592_v46 = vperm.slane %v588_v43, %v2164_v1  ;;  %v594_v47 = vsel %vm170_vm8, %v593_v36, %v527_v42  ;;  %v605_v48 = vsel %vm170_vm8, %v604_v37, %v531_v31 }
 0x296   :  { %v559_v49 = vsel %vm170_vm8, %v544_v35, %v558_v40  ;;  %v598_v50 = vperm.slane %v594_v47, %v2164_v1  ;;  %v609_v51 = vperm.slane %v605_v48, %v2164_v1  ;;  %v624_v52 = vrot.slane %v603_v44, 4 }
 0x297   :  { %v567_v53 = vperm.slane %v559_v49, %v2172_v12  ;;  %v571_v54 = vsel %vm170_vm8, %v555_v39, %v570_v45  ;;  %v612_v55 = vrot.slane %v592_v46, 4  ;;  %v556_v57 = vrot.slane %v544_v35, 4 }
 0x298   :  { %v579_v60 = vperm.slane %v571_v54, %v2172_v12  ;;  %v625_v2 = vsel %vm170_vm8, %v609_v51, %v624_v52  ;;  %v568_v3 = vrot.slane %v555_v39, 4  ;;  %v610_v5 = vrot.slane %v598_v50, 4 }
 0x299   :  { %v613_v6 = vsel %vm170_vm8, %v598_v50, %v612_v55  ;;  %v633_v8 = vperm.slane %v625_v2, %v2172_v12  ;;  %v557_v9 = vsel %vm170_vm8, %v556_v57, %v538_v30  ;;  %v586_v16 = vrot.slane %v567_v53, 4 }
 0x29a   :  { %v584_v17 = vrot.slane %v579_v60, 4  ;;  %v621_v19 = vperm.slane %v613_v6, %v2172_v12  ;;  %v563_v20 = vperm.slane %v557_v9, %v2172_v12  ;;  %v569_v21 = vsel %vm170_vm8, %v568_v3, %v549_v38 }
 0x29b   :  { %v638_v22 = vrot.slane %v633_v8, 4  ;;  %v575_v23 = vperm.slane %v569_v21, %v2172_v12  ;;  %v587_v24 = vsel %vm170_vm8, %v579_v60, %v586_v16  ;;  %v611_v25 = vsel %vm170_vm8, %v610_v5, %v592_v46 }
 0x29c   :  { %v585_v26 = vsel %vm170_vm8, %v584_v17, %v567_v53  ;;  %v640_v27 = vrot.slane %v621_v19, 4  ;;  %v645_v28 = vpack.c.bf16 %v587_v24, %v587_v24  ;;  %v617_v29 = vperm.slane %v611_v25, %v2172_v12 }
 0x29d   :  { %v644_v30 = vpack.c.bf16 %v585_v26, %v585_v26  ;;  %v639_v31 = vsel %vm170_vm8, %v638_v22, %v621_v19  ;;  %v580_v56 = vrot.slane %v575_v23, 4  ;;  %v622_v33 = vrot.slane %v609_v51, 4 }
 0x29e   :  { %v648_v62 = vpack.c.bf16 %v639_v31, %v639_v31  ;;  %v964_v32 = vsel %vm902_vm9, %v645_v28, 0  ;;  %v641_v11 = vsel %vm170_vm8, %v633_v8, %v640_v27  ;;  %v582_v34 = vrot.slane %v563_v20, 4 }
 0x29f   :  { %v945_v35 = vsel %vm902_vm9, %v644_v30, 0  ;;  %v581_v36 = vsel %vm170_vm8, %v580_v56, %v563_v20  ;;  %973 = vmatpush.bf16.xpose.msrb.mxu0 %v964_v32  ;;  %v623_v37 = vsel %vm170_vm8, %v622_v33, %v603_v44  ;;  %v649_v38 = vpack.c.bf16 %v641_v11, %v641_v11 }
 0x2a0   :  { %954 = vmatpush.bf16.xpose.msra.mxu3 %v945_v35  ;;  %v1021_v39 = vsel %vm902_vm9, %v648_v62, 0  ;;  %v642_v40 = vpack.c.bf16 %v581_v36, %v581_v36  ;;  %v629_v42 = vperm.slane %v623_v37, %v2172_v12  ;;  %v583_v43 = vsel %vm170_vm8, %v575_v23, %v582_v34 }
 0x2a1   :  { %v1040_v45 = vsel %vm902_vm9, %v649_v38, 0  ;;  %v643_v46 = vpack.c.bf16 %v583_v43, %v583_v43  ;;  %v636_v47 = vrot.slane %v617_v29, 4  ;;  %v346_v48 = vperm.slane %v2265_v61, %v2164_v1 }
 0x2a2   :  { %v907_v49 = vsel %vm902_vm9, %v642_v40, 0  ;;  %v634_v44 = vrot.slane %v629_v42, 4  ;;  %v357_v50 = vperm.slane %v2271_v0, %v2164_v1  ;;  %v360_v51 = vrot.slane %v2262_v59, 4 }
 0x2a3   :  { %916 = vmatpush.bf16.xpose.msra.mxu1 %v907_v49  ;;  %v926_v52 = vsel %vm902_vm9, %v643_v46, 0  ;;  %v637_v53 = vsel %vm170_vm8, %v629_v42, %v636_v47  ;;  %v372_v54 = vrot.slane %v2268_v63, 4  ;;  %v393_v57 = vpack.c.bf16 %v2225_v7, %v2225_v7 }
 0x2a4   :  { %v635_v55 = vsel %vm170_vm8, %v634_v44, %v617_v29  ;;  %935 = vmatpush.bf16.xpose.msra.mxu2 %v926_v52  ;;  %v647_v61 = vpack.c.bf16 %v637_v53, %v637_v53  ;;  %v392_v0 = vpack.c.bf16 %v2220_v4, %v2220_v4  ;;  %v361_v3 = vsel %vm170_vm8, %v346_v48, %v360_v51 }
 0x2a5   :  { %v646_v60 = vpack.c.bf16 %v635_v55, %v635_v55  ;;  %v370_v5 = vrot.slane %v357_v50, 4  ;;  %v373_v8 = vsel %vm170_vm8, %v357_v50, %v372_v54  ;;  %v358_v9 = vrot.slane %v346_v48, 4 }
 0x2a6   :  { %v1002_v2 = vsel %vm902_vm9, %v647_v61, 0  ;;  %1835 = vmatmul.msk.bf16.vlgmr.msrb.gmra.mxu0 %vm902_vm9, %v393_v57  ;;  %v390_v7 = vpack.c.bf16 %v2228_v13, %v2228_v13  ;;  %v391_v4 = vpack.c.bf16 %v2231_v14, %v2231_v14  ;;  %v369_v16 = vperm.slane %v361_v3, %v2172_v12 }
 0x2a7   :  { %1049 = vmatpush.bf16.xpose.msra.mxu0 %v1040_v45  ;;  %v983_v6 = vsel %vm902_vm9, %v646_v60, 0  ;;  %1834 = vmatmul.msk.bf16.vlgmr.msra.gmra.mxu3 %vm902_vm9, %v392_v0  ;;  %v381_v17 = vperm.slane %v373_v8, %v2172_v12  ;;  %v371_v19 = vsel %vm170_vm8, %v370_v5, %v2268_v63  ;;  %v359_v20 = vsel %vm170_vm8, %v358_v9, %v2262_v59 }
 0x2a8   :  { %1030 = vmatpush.bf16.xpose.msrb.mxu3 %v1021_v39  ;;  %v388_v21 = vrot.slane %v369_v16, 4  ;;  %v377_v13 = vperm.slane %v371_v19, %v2172_v12  ;;  %v365_v14 = vperm.slane %v359_v20, %v2172_v12 }
 0x2a9   :  { %v386_v22 = vrot.slane %v381_v17, 4 }
 0x2aa   :  { %1832 = vmatmul.msk.bf16.vlgmr.msra.gmra.mxu1 %vm902_vm9, %v390_v7  ;;  %v382_v23 = vrot.slane %v377_v13, 4  ;;  %v389_v24 = vsel %vm170_vm8, %v381_v17, %v388_v21  ;;  %v384_v26 = vrot.slane %v365_v14, 4 }
 0x2ab   :  { %992 = vmatpush.bf16.xpose.msrb.mxu1 %v983_v6  ;;  %1833 = vmatmul.msk.bf16.vlgmr.msra.gmra.mxu2 %vm902_vm9, %v391_v4  ;;  %v387_v25 = vsel %vm170_vm8, %v386_v22, %v369_v16  ;;  %v397_v27 = vpack.c.bf16 %v389_v24, %v389_v24 }
 0x2ac   :  { %1011 = vmatpush.bf16.xpose.msrb.mxu2 %v1002_v2  ;;  %v396_v28 = vpack.c.bf16 %v387_v25, %v387_v25  ;;  %v383_v63 = vsel %vm170_vm8, %v382_v23, %v365_v14  ;;  %v385_v59 = vsel %vm170_vm8, %v377_v13, %v384_v26 }
 0x2ad   :  { %v394_v29 = vpack.c.bf16 %v383_v63, %v383_v63  ;;  %v395_v30 = vpack.c.bf16 %v385_v59, %v385_v59 }
 0x2b6   :  { %1839 = vmatmul.msk.bf16.vlgmr.msra.gmra.mxu0 %vm902_vm9, %v397_v27 }
 0x2b7   :  { %1838 = vmatmul.msk.bf16.vlgmr.msrb.gmra.mxu3 %vm902_vm9, %v396_v28 }
 0x2ba   :  { %1836 = vmatmul.msk.bf16.vlgmr.msrb.gmra.mxu1 %vm902_vm9, %v394_v29 }
 0x2bb   :  { %1837 = vmatmul.msk.bf16.vlgmr.msrb.gmra.mxu2 %vm902_vm9, %v395_v30 }
 0x323   :  { %v975_v31 = vpop.f32.mrf.mxu0 }
 0x324   :  { %v1064_v56 = vsel %vm902_vm9, %v975_v31, -inf }
 0x325   :  { %1065 = vmax.xlane.f32.xlu0 %v1064_v56 }
 0x327   :  { %v918_v33 = vpop.f32.mrf.mxu1 }
 0x328   :  { %v1055_v62 = vsel %vm902_vm9, %v918_v33, -inf }
 0x329   :  { %1056 = vmax.xlane.f32.xlu1 %v1055_v62 }
 0x32a   :  { %v956_v32 = vpop.f32.mrf.mxu3 }
 0x32b   :  { %v977_v11 = vpop.f32.mrf.mxu0  ;;  %v1061_v34 = vsel %vm902_vm9, %v956_v32, -inf }
 0x32d   :  { %1062 = vmax.xlane.f32.xlu0 %v1061_v34 }
 0x32e   :  { %v937_v35 = vpop.f32.mrf.mxu2 }
 0x32f   :  { %v920_v36 = vpop.f32.mrf.mxu1  ;;  %v1058_v37 = vsel %vm902_vm9, %v937_v35, -inf }
 0x330   :  { %1059 = vmax.xlane.f32.xlu2 %v1058_v37 }
 0x332   :  { %v958_v38 = vpop.f32.mrf.mxu3 }
 0x333   :  { %v2401_v39 = vpop.f32.mrf.mxu0 }
 0x334   :  { %v1076_v40 = vsel %vm902_vm9, %v2401_v39, -inf }
 0x336   :  { %v939_v42 = vpop.f32.mrf.mxu2 }
 0x337   :  { %v994_v43 = vpop.f32.mrf.mxu1 }
 0x338   :  { %1077 = vmax.xlane.f32.xlu2 %v1076_v40  ;;  %v1067_v45 = vsel %vm902_vm9, %v994_v43, -inf }
 0x339   :  { %1068 = vmax.xlane.f32.xlu0 %v1067_v45 }
 0x33a   :  { %v1032_v46 = vpop.f32.mrf.mxu3 }
 0x33b   :  { %v1053_v47 = vpop.f32.mrf.mxu0  ;;  %v1073_v44 = vsel %vm902_vm9, %v1032_v46, -inf }
 0x33e   :  { %v1013_v48 = vpop.f32.mrf.mxu2 }
 0x33f   :  { %v996_v49 = vpop.f32.mrf.mxu1  ;;  %v1070_v50 = vsel %vm902_vm9, %v1013_v48, -inf }
 0x340   :  { %1074 = vmax.xlane.f32.xlu2 %v1073_v44  ;;  %1071 = vmax.xlane.f32.xlu1 %v1070_v50 }
 0x342   :  { %v1034_v51 = vpop.f32.mrf.mxu3 }
 0x346   :  { %v1015_v52 = vpop.f32.mrf.mxu2 }
 0x34d   :  { %1951 = vrot.lane.b32.xlu0 %v2175_v15, %s2047_s22 }
 0x355   :  { %1961 = vrot.lane.b32.xlu0 %v2180_v18, %s2047_s22 }
 0x358   :  { %1956 = vrot.lane.b32.xlu2 %v2201_v41, %s2047_s22 }
 0x359   :  { %1946 = vrot.lane.b32.xlu1 %v2158_v58, %s2047_s22 }
 0x398   :  { %v1066_v53 = vpop.xlane.xlu0 %1065 }
 0x399   :  { %v1082_v0 = vsub.f32 %v975_v31, %v1066_v53 }
 0x39b   :  { %v1093_v18 = vmul.f32 1.442695, %v1082_v0 }
 0x39c   :  { %v1057_v54 = vpop.xlane.xlu1 %1056 }
 0x39d   :  { %v1079_v55 = vsub.f32 %v918_v33, %v1057_v54 }
 0x39f   :  { %v1087_v61 = vmul.f32 1.442695, %v1079_v55 }
 0x3a0   :  { %v1063_v57 = vpop.xlane.xlu0 %1062 }
 0x3a1   :  { %1994 = vpow2.f32 %v1087_v61  ;;  %v1081_v60 = vsub.f32 %v956_v32, %v1063_v57 }
 0x3a3   :  { %v1091_v2 = vmul.f32 1.442695, %v1081_v60  ;;  %v1060_v3 = vpop.xlane.xlu2 %1059 }
 0x3a4   :  { %v1080_v5 = vsub.f32 %v937_v35, %v1060_v3 }
 0x3a5   :  { %1996 = vpow2.f32 %v1091_v2 }
 0x3a6   :  { %v1089_v6 = vmul.f32 1.442695, %v1080_v5 }
 0x3a7   :  { %v2412_v15 = vpop.eup %1994 }
 0x3a8   :  { %1998 = vpow2.f32 %v1089_v6  ;;  %v1103_v58 = vsel %vm902_vm9, %v2412_v15, 0.0 }
 0x3a9   :  { %1104 = vadd.xlane.f32.xlu0 %v1103_v58  ;;  %2000 = vpow2.f32 %v1093_v18 }
 0x3ab   :  { %v2416_v41 = vpop.eup %1996  ;;  %v1078_v8 = vpop.xlane.xlu2 %1077 }
 0x3ac   :  { %v1069_v9 = vpop.xlane.xlu0 %1068  ;;  %v1109_v7 = vsel %vm902_vm9, %v2416_v41, 0.0  ;;  %v1086_v24 = vsub.f32 %v2401_v39, %v1078_v8 }
 0x3ad   :  { %v1083_v4 = vsub.f32 %v994_v43, %v1069_v9  ;;  %1110 = vadd.xlane.f32.xlu1 %v1109_v7 }
 0x3ae   :  { %v2420_v16 = vpop.eup %1998  ;;  %v1101_v28 = vmul.f32 1.442695, %v1086_v24 }
 0x3af   :  { %v1095_v17 = vmul.f32 1.442695, %v1083_v4  ;;  %v1106_v19 = vsel %vm902_vm9, %v2420_v16, 0.0  ;;  %v2424_v20 = vpop.eup %2000 }
 0x3b0   :  { %1107 = vadd.xlane.f32.xlu2 %v1106_v19  ;;  %v1112_v23 = vsel %vm902_vm9, %v2424_v20, 0.0 }
 0x3b1   :  { %2002 = vpow2.f32 %v1095_v17 }
 0x3b3   :  { %v1075_v21 = vpop.xlane.xlu2 %1074  ;;  %v1072_v13 = vpop.xlane.xlu1 %1071 }
 0x3b4   :  { %v1085_v22 = vsub.f32 %v1032_v46, %v1075_v21  ;;  %v1084_v14 = vsub.f32 %v1013_v48, %v1072_v13 }
 0x3b5   :  { %1113 = vadd.xlane.f32.xlu1 %v1112_v23 }
 0x3b6   :  { %v1099_v25 = vmul.f32 1.442695, %v1085_v22  ;;  %v1097_v26 = vmul.f32 1.442695, %v1084_v14 }
 0x3b7   :  { %v2429_v27 = vpop.eup %2002 }
 0x3b8   :  { %2004 = vpow2.f32 %v1099_v25  ;;  %v1115_v63 = vsel %vm902_vm9, %v2429_v27, 0.0 }
 0x3b9   :  { %2006 = vpow2.f32 %v1097_v26 }
 0x3ba   :  { %2008 = vpow2.f32 %v1101_v28 }
 0x3bb   :  { %v1957_v33 = vpop.permute.xlu2 %1956 }
 0x3bc   :  { %v1959_v32 = vunpack.i.h.bf16 %v1957_v33  ;;  %v1958_v11 = vunpack.i.l.bf16 %v1957_v33 }
 0x3bd   :  { %1116 = vadd.xlane.f32.xlu1 %v1115_v63 }
 0x3be   :  { %v2433_v59 = vpop.eup %2004  ;;  %v744_v38 = vrot.slane %v1959_v32, 4  ;;  %v732_v39 = vrot.slane %v1958_v11, 4 }
 0x3bf   :  { %v2435_v29 = vpop.eup %2006  ;;  %v1952_v30 = vpop.permute.xlu0 %1951  ;;  %v1121_v31 = vsel %vm902_vm9, %v2433_v59, 0.0 }
 0x3c0   :  { %1122 = vadd.xlane.f32.xlu2 %v1121_v31  ;;  %v1118_v56 = vsel %vm902_vm9, %v2435_v29, 0.0  ;;  %v2441_v62 = vpop.eup %2008  ;;  %v1954_v34 = vunpack.i.h.bf16 %v1952_v30  ;;  %v1953_v35 = vunpack.i.l.bf16 %v1952_v30 }
 0x3c1   :  { %1119 = vadd.xlane.f32.xlu0 %v1118_v56  ;;  %v1124_v37 = vsel %vm902_vm9, %v2441_v62, 0.0 }
 0x3c2   :  { %v686_v48 = vrot.slane %v1954_v34, 4  ;;  %v674_v49 = vrot.slane %v1953_v35, 4 }
 0x3c7   :  { %v1962_v36 = vpop.permute.xlu0 %1961 }
 0x3c8   :  { %v1964_v40 = vunpack.i.h.bf16 %v1962_v36  ;;  %v1963_v42 = vunpack.i.l.bf16 %v1962_v36  ;;  %1125 = vadd.xlane.f32.xlu2 %v1124_v37 }
 0x3ca   :  { %v742_v43 = vrot.slane %v1964_v40, 4  ;;  %v745_v45 = vsel %vm170_vm8, %v1964_v40, %v744_v38  ;;  %v730_v46 = vrot.slane %v1963_v42, 4  ;;  %v733_v47 = vsel %vm170_vm8, %v1963_v42, %v732_v39 }
 0x3cb   :  { %v753_v44 = vperm.slane %v745_v45, %v2164_v1  ;;  %v741_v50 = vperm.slane %v733_v47, %v2164_v1  ;;  %v1947_v51 = vpop.permute.xlu1 %1946 }
 0x3cc   :  { %v743_v52 = vsel %vm170_vm8, %v742_v43, %v1959_v32  ;;  %v731_v53 = vsel %vm170_vm8, %v730_v46, %v1958_v11  ;;  %v1949_v54 = vunpack.i.h.bf16 %v1947_v51  ;;  %v1948_v55 = vunpack.i.l.bf16 %v1947_v51 }
 0x3cd   :  { %v749_v61 = vperm.slane %v743_v52, %v2164_v1  ;;  %v766_v57 = vrot.slane %v753_v44, 4  ;;  %v737_v60 = vperm.slane %v731_v53, %v2164_v1  ;;  %v768_v0 = vrot.slane %v741_v50, 4 }
 0x3ce   :  { %v688_v2 = vrot.slane %v1949_v54, 4  ;;  %v675_v3 = vsel %vm170_vm8, %v674_v49, %v1948_v55  ;;  %v676_v5 = vrot.slane %v1948_v55, 4  ;;  %v687_v6 = vsel %vm170_vm8, %v686_v48, %v1949_v54 }
 0x3cf   :  { %v754_v18 = vrot.slane %v749_v61, 4  ;;  %v756_v58 = vrot.slane %v737_v60, 4  ;;  %v767_v8 = vsel %vm170_vm8, %v766_v57, %v741_v50  ;;  %v769_v9 = vsel %vm170_vm8, %v753_v44, %v768_v0 }
 0x3d0   :  { %v773_v7 = vperm.slane %v767_v8, %v2172_v12  ;;  %v777_v4 = vperm.slane %v769_v9, %v2172_v12  ;;  %v677_v17 = vsel %vm170_vm8, %v1953_v35, %v676_v5  ;;  %v681_v19 = vperm.slane %v675_v3, %v2164_v1 }
 0x3d1   :  { %v755_v21 = vsel %vm170_vm8, %v754_v18, %v737_v60  ;;  %v757_v13 = vsel %vm170_vm8, %v749_v61, %v756_v58  ;;  %v685_v22 = vperm.slane %v677_v17, %v2164_v1  ;;  %v689_v14 = vsel %vm170_vm8, %v1954_v34, %v688_v2 }
 0x3d2   :  { %v761_v23 = vperm.slane %v755_v21, %v2172_v12  ;;  %v765_v24 = vperm.slane %v757_v13, %v2172_v12  ;;  %v782_v25 = vrot.slane %v773_v7, 4  ;;  %v784_v26 = vrot.slane %v777_v4, 4 }
 0x3d3   :  { %v693_v28 = vperm.slane %v687_v6, %v2164_v1  ;;  %v697_v63 = vperm.slane %v689_v14, %v2164_v1  ;;  %v700_v30 = vrot.slane %v681_v19, 4  ;;  %v712_v31 = vrot.slane %v685_v22, 4 }
 0x3d4   :  { %v778_v56 = vrot.slane %v761_v23, 4  ;;  %v780_v33 = vrot.slane %v765_v24, 4  ;;  %v783_v32 = vsel %vm170_vm8, 0.0, %v782_v25  ;;  %v785_v11 = vsel %vm170_vm8, 0.0, %v784_v26 }
 0x3d5   :  { %v851_v34 = vsel %vm170_vm8, %v784_v26, %v773_v7  ;;  %v856_v35 = vrot.slane %v785_v11, 4  ;;  %v698_v36 = vrot.slane %v693_v28, 4  ;;  %v701_v37 = vsel %vm170_vm8, %v693_v28, %v700_v30 }
 0x3d6   :  { %v779_v38 = vsel %vm170_vm8, 0.0, %v778_v56  ;;  %v781_v39 = vsel %vm170_vm8, 0.0, %v780_v33  ;;  %v840_v40 = vsel %vm170_vm8, %v780_v33, %v761_v23  ;;  %v709_v42 = vperm.slane %v701_v37, %v2172_v12 }
 0x3d7   :  { %v845_v43 = vrot.slane %v781_v39, 4  ;;  %v699_v45 = vsel %vm170_vm8, %v698_v36, %v681_v19  ;;  %v710_v46 = vrot.slane %v697_v63, 4  ;;  %v713_v47 = vsel %vm170_vm8, %v697_v63, %v712_v31 }
 0x3d8   :  { %v705_v48 = vperm.slane %v699_v45, %v2172_v12  ;;  %v721_v49 = vperm.slane %v713_v47, %v2172_v12  ;;  %v724_v44 = vrot.slane %v709_v42, 4  ;;  %v844_v50 = vperm.slane %v840_v40, %v2164_v1 }
 0x3d9   :  { %v711_v51 = vsel %vm170_vm8, %v710_v46, %v685_v22  ;;  %v846_v52 = vsel %vm170_vm8, %v845_v43, %v779_v38  ;;  %v855_v53 = vperm.slane %v851_v34, %v2164_v1  ;;  %v857_v54 = vsel %vm170_vm8, %v856_v35, %v783_v32 }
 0x3da   :  { %v717_v55 = vperm.slane %v711_v51, %v2172_v12  ;;  %v722_v61 = vrot.slane %v705_v48, 4  ;;  %v725_v57 = vsel %vm170_vm8, 0.0, %v724_v44  ;;  %v728_v60 = vrot.slane %v721_v49, 4 }
 0x3db   :  { %v786_v0 = vsel %vm170_vm8, %v724_v44, %v705_v48  ;;  %v791_v2 = vrot.slane %v725_v57, 4  ;;  %v850_v3 = vperm.slane %v846_v52, %v2164_v1  ;;  %v861_v5 = vperm.slane %v857_v54, %v2164_v1 }
 0x3dc   :  { %v723_v6 = vsel %vm170_vm8, 0.0, %v722_v61  ;;  %v726_v18 = vrot.slane %v717_v55, 4  ;;  %v729_v58 = vsel %vm170_vm8, 0.0, %v728_v60  ;;  %v790_v8 = vperm.slane %v786_v0, %v2164_v1 }
 0x3dd   :  { %v802_v9 = vrot.slane %v729_v58, 4  ;;  %v792_v7 = vsel %vm170_vm8, %v791_v2, %v723_v6  ;;  %v797_v4 = vsel %vm170_vm8, %v728_v60, %v717_v55  ;;  %v864_v17 = vrot.slane %v844_v50, 4 }
 0x3de   :  { %v727_v19 = vsel %vm170_vm8, 0.0, %v726_v18  ;;  %v796_v21 = vperm.slane %v792_v7, %v2164_v1  ;;  %v801_v13 = vperm.slane %v797_v4, %v2164_v1  ;;  %v810_v22 = vrot.slane %v790_v8, 4 }
 0x3df   :  { %v803_v14 = vsel %vm170_vm8, %v802_v9, %v727_v19  ;;  %v865_v23 = vsel %vm170_vm8, %v850_v3, %v864_v17  ;;  %v876_v24 = vrot.slane %v855_v53, 4  ;;  %v862_v25 = vrot.slane %v850_v3, 4 }
 0x3e0   :  { %v807_v26 = vperm.slane %v803_v14, %v2164_v1  ;;  %v811_v28 = vsel %vm170_vm8, %v796_v21, %v810_v22  ;;  %v822_v63 = vrot.slane %v801_v13, 4  ;;  %v873_v30 = vperm.slane %v865_v23, %v2172_v12 }
 0x3e1   :  { %v819_v31 = vperm.slane %v811_v28, %v2172_v12  ;;  %v877_v56 = vsel %vm170_vm8, %v861_v5, %v876_v24  ;;  %v808_v33 = vrot.slane %v796_v21, 4  ;;  %v863_v32 = vsel %vm170_vm8, %v862_v25, %v844_v50 }
 0x3e2   :  { %v823_v11 = vsel %vm170_vm8, %v807_v26, %v822_v63  ;;  %v885_v34 = vperm.slane %v877_v56, %v2172_v12  ;;  %v892_v35 = vrot.slane %v873_v30, 4  ;;  %v820_v36 = vrot.slane %v807_v26, 4 }
 0x3e3   :  { %v831_v37 = vperm.slane %v823_v11, %v2172_v12  ;;  %v838_v38 = vrot.slane %v819_v31, 4  ;;  %v809_v39 = vsel %vm170_vm8, %v808_v33, %v790_v8  ;;  %v869_v40 = vperm.slane %v863_v32, %v2172_v12 }
 0x3e4   :  { %v893_v42 = vsel %vm170_vm8, %v885_v34, %v892_v35  ;;  %v815_v43 = vperm.slane %v809_v39, %v2172_v12  ;;  %v821_v45 = vsel %vm170_vm8, %v820_v36, %v801_v13  ;;  %v874_v46 = vrot.slane %v861_v5, 4 }
 0x3e5   :  { %v839_v47 = vsel %vm170_vm8, %v831_v37, %v838_v38  ;;  %v901_v48 = vpack.c.bf16 %v893_v42, %v893_v42  ;;  %v827_v49 = vperm.slane %v821_v45, %v2172_v12  ;;  %v836_v44 = vrot.slane %v831_v37, 4 }
 0x3e6   :  { %v897_v50 = vpack.c.bf16 %v839_v47, %v839_v47  ;;  %v834_v51 = vrot.slane %v815_v43, 4  ;;  %v875_v52 = vsel %vm170_vm8, %v874_v46, %v855_v53  ;;  %v888_v54 = vrot.slane %v869_v40, 4 }
 0x3e7   :  { %v1289_v55 = vsel %vm1154_vm10, %v901_v48, 0  ;;  %v837_v61 = vsel %vm170_vm8, %v836_v44, %v819_v31  ;;  %v881_v57 = vperm.slane %v875_v52, %v2172_v12  ;;  %v890_v60 = vrot.slane %v885_v34, 4 }
 0x3e8   :  { %v1213_v0 = vsel %vm1154_vm10, %v897_v50, 0  ;;  %v835_v2 = vsel %vm170_vm8, %v827_v49, %v834_v51  ;;  %v896_v3 = vpack.c.bf16 %v837_v61, %v837_v61  ;;  %v832_v5 = vrot.slane %v827_v49, 4 }
 0x3e9   :  { %1222 = vmatpush.bf16.msrb.mxu0 %v1213_v0  ;;  %v895_v6 = vpack.c.bf16 %v835_v2, %v835_v2  ;;  %v889_v18 = vsel %vm170_vm8, %v881_v57, %v888_v54  ;;  %v891_v53 = vsel %vm170_vm8, %v890_v60, %v873_v30  ;;  %v886_v58 = vrot.slane %v881_v57, 4 }
 0x3ea   :  { %v1194_v8 = vsel %vm1154_vm10, %v896_v3, 0  ;;  %v899_v9 = vpack.c.bf16 %v889_v18, %v889_v18  ;;  %v900_v7 = vpack.c.bf16 %v891_v53, %v891_v53  ;;  %v833_v4 = vsel %vm170_vm8, %v832_v5, %v815_v43 }
 0x3eb   :  { %v1175_v17 = vsel %vm1154_vm10, %v895_v6, 0  ;;  %1203 = vmatpush.bf16.msra.mxu3 %v1194_v8  ;;  %v894_v19 = vpack.c.bf16 %v833_v4, %v833_v4  ;;  %v887_v21 = vsel %vm170_vm8, %v886_v58, %v869_v40 }
 0x3ec   :  { %1184 = vmatpush.bf16.msra.mxu2 %v1175_v17  ;;  %v1251_v13 = vsel %vm1154_vm10, %v899_v9, 0  ;;  %v1270_v22 = vsel %vm1154_vm10, %v900_v7, 0  ;;  %v898_v14 = vpack.c.bf16 %v887_v21, %v887_v21 }
 0x3ed   :  { %1298 = vmatpush.bf16.msra.mxu0 %v1289_v55  ;;  %v1156_v23 = vsel %vm1154_vm10, %v894_v19, 0 }
 0x3ee   :  { %1165 = vmatpush.bf16.msra.mxu1 %v1156_v23  ;;  %v1232_v24 = vsel %vm1154_vm10, %v898_v14, 0 }
 0x3ef   :  { %1279 = vmatpush.bf16.msrb.mxu3 %v1270_v22 }
 0x3f0   :  { %1260 = vmatpush.bf16.msrb.mxu2 %v1251_v13 }
 0x3f2   :  { %1241 = vmatpush.bf16.msrb.mxu1 %v1232_v24 }
 0x41c   :  { %v1105_v25 = vpop.xlane.xlu0 %1104 }
 0x41d   :  { %2010 = vrcp.f32 %v1105_v25 }
 0x420   :  { %v1111_v26 = vpop.xlane.xlu1 %1110 }
 0x421   :  { %2012 = vrcp.f32 %v1111_v26 }
 0x423   :  { %v2011_v28 = vpop.eup %2010  ;;  %v1108_v63 = vpop.xlane.xlu2 %1107 }
 0x424   :  { %v1135_v30 = vmul.f32 %v2011_v28, %v2412_v15  ;;  %2014 = vrcp.f32 %v1108_v63 }
 0x426   :  { %v1143_v31 = vpack.c.bf16 %v1135_v30, %v1135_v30 }
 0x427   :  { %v2013_v56 = vpop.eup %2012 }
 0x428   :  { %v1137_v33 = vmul.f32 %v2013_v56, %v2416_v41  ;;  %1840 = vmatmul.msk.bf16.vlgmr.msra.gmra.mxu1 %vm902_vm9, %v1143_v31  ;;  %v1114_v32 = vpop.xlane.xlu1 %1113 }
 0x429   :  { %2016 = vrcp.f32 %v1114_v32 }
 0x42a   :  { %v2015_v11 = vpop.eup %2014  ;;  %v1145_v34 = vpack.c.bf16 %v1137_v33, %v1137_v33 }
 0x42b   :  { %v1136_v35 = vmul.f32 %v2015_v11, %v2420_v16 }
 0x42c   :  { %1842 = vmatmul.msk.bf16.vlgmr.msra.gmra.mxu3 %vm902_vm9, %v1145_v34 }
 0x42d   :  { %v1144_v36 = vpack.c.bf16 %v1136_v35, %v1136_v35 }
 0x42f   :  { %v2017_v37 = vpop.eup %2016  ;;  %1841 = vmatmul.msk.bf16.vlgmr.msra.gmra.mxu2 %vm902_vm9, %v1144_v36 }
 0x430   :  { %v1138_v15 = vmul.f32 %v2017_v37, %v2424_v20  ;;  %v1117_v38 = vpop.xlane.xlu1 %1116 }
 0x431   :  { %2018 = vrcp.f32 %v1117_v38 }
 0x432   :  { %v1146_v39 = vpack.c.bf16 %v1138_v15, %v1138_v15 }
 0x433   :  { %v1123_v41 = vpop.xlane.xlu2 %1122 }
 0x434   :  { %2020 = vrcp.f32 %v1123_v41  ;;  %v1120_v40 = vpop.xlane.xlu0 %1119  ;;  %1843 = vmatmul.msk.bf16.vlgmr.msrb.gmra.mxu0 %vm902_vm9, %v1146_v39 }
 0x435   :  { %2022 = vrcp.f32 %v1120_v40 }
 0x437   :  { %v2019_v42 = vpop.eup %2018 }
 0x438   :  { %v1139_v16 = vmul.f32 %v2019_v42, %v2429_v27 }
 0x43a   :  { %v2021_v43 = vpop.eup %2020  ;;  %v1147_v45 = vpack.c.bf16 %v1139_v16, %v1139_v16 }
 0x43b   :  { %v2023_v46 = vpop.eup %2022  ;;  %v1141_v47 = vmul.f32 %v2021_v43, %v2433_v59  ;;  %v1126_v48 = vpop.xlane.xlu2 %1125 }
 0x43c   :  { %v1140_v20 = vmul.f32 %v2023_v46, %v2435_v29  ;;  %2024 = vrcp.f32 %v1126_v48  ;;  %1844 = vmatmul.msk.bf16.vlgmr.msrb.gmra.mxu1 %vm902_vm9, %v1147_v45 }
 0x43d   :  { %v1149_v49 = vpack.c.bf16 %v1141_v47, %v1141_v47 }
 0x43e   :  { %v1148_v44 = vpack.c.bf16 %v1140_v20, %v1140_v20 }
 0x43f   :  { %1846 = vmatmul.msk.bf16.vlgmr.msrb.gmra.mxu3 %vm902_vm9, %v1149_v49 }
 0x440   :  { %1845 = vmatmul.msk.bf16.vlgmr.msrb.gmra.mxu2 %vm902_vm9, %v1148_v44 }
 0x442   :  { %v2025_v50 = vpop.eup %2024 }
 0x443   :  { %v1142_v27 = vmul.f32 %v2025_v50, %v2441_v62 }
 0x445   :  { %v1150_v51 = vpack.c.bf16 %v1142_v27, %v1142_v27 }
 0x447   :  { %1847 = vmatmul.msk.bf16.vlgmr.msra.gmra.mxu0 %vm902_vm9, %v1150_v51 }
 0x4a5   :  { %v1167_v52 = vpop.f32.mrf.mxu1 }
 0x4a6   :  { %v1306_v54 = vrot.slane %v1167_v52, 4 }
 0x4ad   :  { %v1169_v59 = vpop.f32.mrf.mxu1 }
 0x4af   :  { %v1205_v55 = vpop.f32.mrf.mxu3 }
 0x4b0   :  { %v1304_v29 = vrot.slane %v1205_v55, 4  ;;  %v1307_v61 = vsel %vm170_vm8, %v1205_v55, %v1306_v54 }
 0x4b1   :  { %v1315_v57 = vperm.slane %v1307_v61, %v2164_v1  ;;  %v1224_v60 = vpop.f32.mrf.mxu0 }
 0x4b2   :  { %v1186_v0 = vpop.f32.mrf.mxu2  ;;  %v1305_v2 = vsel %vm170_vm8, %v1304_v29, %v1167_v52  ;;  %v1316_v3 = vrot.slane %v1224_v60, 4 }
 0x4b3   :  { %v1318_v5 = vrot.slane %v1186_v0, 4  ;;  %v1311_v62 = vperm.slane %v1305_v2, %v2164_v1  ;;  %v1342_v6 = vrot.slane %v1315_v57, 4 }
 0x4b4   :  { %v1317_v18 = vsel %vm170_vm8, %v1316_v3, %v1186_v0 }
 0x4b5   :  { %v1330_v53 = vrot.slane %v1311_v62, 4  ;;  %v1319_v58 = vsel %vm170_vm8, %v1224_v60, %v1318_v5  ;;  %v1323_v8 = vperm.slane %v1317_v18, %v2164_v1 }
 0x4b6   :  { %v1327_v9 = vperm.slane %v1319_v58, %v2164_v1 }
 0x4b7   :  { %v1328_v7 = vrot.slane %v1323_v8, 4  ;;  %v1331_v4 = vsel %vm170_vm8, %v1323_v8, %v1330_v53  ;;  %v1207_v17 = vpop.f32.mrf.mxu3 }
 0x4b8   :  { %v1339_v19 = vperm.slane %v1331_v4, %v2172_v12  ;;  %v1340_v21 = vrot.slane %v1327_v9, 4  ;;  %v1343_v13 = vsel %vm170_vm8, %v1327_v9, %v1342_v6 }
 0x4b9   :  { %v1329_v22 = vsel %vm170_vm8, %v1328_v7, %v1311_v62  ;;  %v1351_v14 = vperm.slane %v1343_v13, %v2172_v12  ;;  %v1226_v23 = vpop.f32.mrf.mxu0  ;;  %v1243_v24 = vpop.f32.mrf.mxu1 }
 0x4ba   :  { %v1335_v25 = vperm.slane %v1329_v22, %v2172_v12  ;;  %v1341_v26 = vsel %vm170_vm8, %v1340_v21, %v1315_v57  ;;  %v1354_v28 = vrot.slane %v1339_v19, 4  ;;  %v1188_v63 = vpop.f32.mrf.mxu2  ;;  %v1362_v43 = vrot.slane %v1243_v24, 4 }
 0x4bb   :  { %v1347_v30 = vperm.slane %v1341_v26, %v2172_v12  ;;  %v1358_v31 = vrot.slane %v1351_v14, 4 }
 0x4bc   :  { %v1352_v56 = vrot.slane %v1335_v25, 4  ;;  %v1355_v33 = vsel %vm170_vm8, 0.0, %v1354_v28  ;;  %v1416_v32 = vsel %vm170_vm8, %v1354_v28, %v1335_v25 }
 0x4bd   :  { %v1356_v11 = vrot.slane %v1347_v30, 4  ;;  %v1359_v34 = vsel %vm170_vm8, 0.0, %v1358_v31  ;;  %v1421_v35 = vrot.slane %v1355_v33, 4  ;;  %v1427_v36 = vsel %vm170_vm8, %v1358_v31, %v1347_v30 }
 0x4be   :  { %v1432_v37 = vrot.slane %v1359_v34, 4  ;;  %v1353_v15 = vsel %vm170_vm8, 0.0, %v1352_v56  ;;  %v1431_v41 = vperm.slane %v1427_v36, %v2164_v1  ;;  %v1420_v42 = vperm.slane %v1416_v32, %v2164_v1 }
 0x4bf   :  { %v1357_v38 = vsel %vm170_vm8, 0.0, %v1356_v11  ;;  %v1422_v39 = vsel %vm170_vm8, %v1421_v35, %v1353_v15 }
 0x4c0   :  { %v1433_v40 = vsel %vm170_vm8, %v1432_v37, %v1357_v38  ;;  %v1426_v16 = vperm.slane %v1422_v39, %v2164_v1  ;;  %v1452_v50 = vrot.slane %v1431_v41, 4  ;;  %v1440_v59 = vrot.slane %v1420_v42, 4 }
 0x4c1   :  { %v1245_v45 = vpop.f32.mrf.mxu1  ;;  %v1437_v48 = vperm.slane %v1433_v40, %v2164_v1 }
 0x4c2   :  { %v1281_v46 = vpop.f32.mrf.mxu3  ;;  %v1438_v47 = vrot.slane %v1426_v16, 4  ;;  %v1441_v6 = vsel %vm170_vm8, %v1426_v16, %v1440_v59 }
 0x4c3   :  { %v1262_v20 = vpop.f32.mrf.mxu2  ;;  %v1360_v49 = vrot.slane %v1281_v46, 4  ;;  %v1363_v44 = vsel %vm170_vm8, %v1281_v46, %v1362_v43  ;;  %v1450_v3 = vrot.slane %v1437_v48, 4  ;;  %v1453_v18 = vsel %vm170_vm8, %v1437_v48, %v1452_v50 }
 0x4c4   :  { %v1374_v27 = vrot.slane %v1262_v20, 4  ;;  %v1371_v51 = vperm.slane %v1363_v44, %v2164_v1  ;;  %v1300_v52 = vpop.f32.mrf.mxu0  ;;  %v1439_v60 = vsel %vm170_vm8, %v1438_v47, %v1420_v42  ;;  %v1449_v31 = vperm.slane %v1441_v6, %v2172_v12 }
 0x4c5   :  { %v1361_v54 = vsel %vm170_vm8, %v1360_v49, %v1243_v24  ;;  %v1372_v55 = vrot.slane %v1300_v52, 4  ;;  %v2590_v8 = vperm.slane %v1439_v60, %v2172_v12  ;;  %v1451_v9 = vsel %vm170_vm8, %v1450_v3, %v1431_v41 }
 0x4c6   :  { %v1367_v29 = vperm.slane %v1361_v54, %v2164_v1  ;;  %v1398_v61 = vrot.slane %v1371_v51, 4  ;;  %v1375_v57 = vsel %vm170_vm8, %v1300_v52, %v1374_v27  ;;  %v1457_v21 = vperm.slane %v1451_v9, %v2172_v12 }
 0x4c7   :  { %v1373_v0 = vsel %vm170_vm8, %v1372_v55, %v1262_v20  ;;  %v1383_v2 = vperm.slane %v1375_v57, %v2164_v1  ;;  %v1461_v56 = vperm.slane %v1453_v18, %v2172_v12  ;;  %v1468_v49 = vrot.slane %v1449_v31, 4 }
 0x4c8   :  { %v1386_v5 = vrot.slane %v1367_v29, 4  ;;  %v1379_v62 = vperm.slane %v1373_v0, %v2164_v1  ;;  %v1462_v28 = vrot.slane %v1457_v21, 4  ;;  %v1464_v54 = vrot.slane %v2590_v8, 4 }
 0x4c9   :  { %v1396_v53 = vrot.slane %v1383_v2, 4  ;;  %v1399_v58 = vsel %vm170_vm8, %v1383_v2, %v1398_v61  ;;  %v1466_v20 = vrot.slane %v1461_v56, 4  ;;  %v1469_v2 = vsel %vm170_vm8, %v1461_v56, %v1468_v49 }
 0x4ca   :  { %v1384_v7 = vrot.slane %v1379_v62, 4  ;;  %v1387_v4 = vsel %vm170_vm8, %v1379_v62, %v1386_v5  ;;  %v1407_v17 = vperm.slane %v1399_v58, %v2172_v12  ;;  %v1283_v19 = vpop.f32.mrf.mxu3  ;;  %v2607_v34 = vsel %vm170_vm8, %v1462_v28, %v2590_v8 }
 0x4cb   :  { %v1395_v13 = vperm.slane %v1387_v4, %v2172_v12  ;;  %v1397_v22 = vsel %vm170_vm8, %v1396_v53, %v1371_v51  ;;  %v1264_v14 = vpop.f32.mrf.mxu2  ;;  %v1467_v0 = vsel %vm170_vm8, %v1466_v20, %v1449_v31  ;;  %v1465_v58 = vsel %vm170_vm8, %v1457_v21, %v1464_v54  ;;  %v1902_v4 = vld [vmem:[%s2729_s5] sm:$0xff] }
 0x4cc   :  { %v1385_v23 = vsel %vm170_vm8, %v1384_v7, %v1367_v29  ;;  %v1403_v24 = vperm.slane %v1397_v22, %v2172_v12  ;;  %v1414_v25 = vrot.slane %v1407_v17, 4  ;;  %v1302_v26 = vpop.f32.mrf.mxu0  ;;  %v1903_v7 = vld [vmem:[%s2729_s5 + $0x8] sm:$0xff] }
 0x4cd   :  { %v1391_v63 = vperm.slane %v1385_v23, %v2172_v12  ;;  %v1410_v30 = vrot.slane %v1395_v13, 4  ;;  %1586 = vmatpush.bf16.msra.mxu1 %v1903_v7 }
 0x4ce   :  { %v1412_v33 = vrot.slane %v1403_v24, 4  ;;  %v1415_v32 = vsel %vm170_vm8, 0.0, %v1414_v25  ;;  %v1481_v11 = vsel %vm170_vm8, %v1414_v25, %v1403_v24 }
 0x4cf   :  { %v1408_v35 = vrot.slane %v1391_v63, 4  ;;  %v1411_v36 = vsel %vm170_vm8, 0.0, %v1410_v30  ;;  %v1470_v37 = vsel %vm170_vm8, %v1410_v30, %v1391_v63  ;;  %v1485_v15 = vperm.slane %v1481_v11, %v2164_v1 }
 0x4d0   :  { %v1413_v38 = vsel %vm170_vm8, 0.0, %v1412_v33  ;;  %v1475_v39 = vrot.slane %v1411_v36, 4  ;;  %v1486_v41 = vrot.slane %v1415_v32, 4  ;;  %v1474_v40 = vperm.slane %v1470_v37, %v2164_v1  ;;  %v1983_v32 = vld [vmem:[%s2728_s6] ss:$0 sm:$0xff] }
 0x4d1   :  { %v1506_v42 = vrot.slane %v1485_v15, 4  ;;  %v1409_v16 = vsel %vm170_vm8, 0.0, %v1408_v35  ;;  %1587 = vmatpush.bf16.msra.mxu1 %v1902_v4  ;;  %v2038_v36 = vld [vmem:[%s2723_s0] sm:$0xff] }
 0x4d2   :  { %v1487_v43 = vsel %vm170_vm8, %v1486_v41, %v1413_v38  ;;  %v1476_v45 = vsel %vm170_vm8, %v1475_v39, %v1409_v16  ;;  %v1494_v46 = vrot.slane %v1474_v40, 4  ;;  %v2039_v39 = vld [vmem:[%s2723_s0 + $0x8] sm:$0xff] }
 0x4d3   :  { %v1491_v47 = vperm.slane %v1487_v43, %v2164_v1  ;;  %v1480_v48 = vperm.slane %v1476_v45, %v2164_v1 }
 0x4d5   :  { %v1495_v44 = vsel %vm170_vm8, %v1480_v48, %v1494_v46  ;;  %v1507_v50 = vsel %vm170_vm8, %v1491_v47, %v1506_v42  ;;  %v1492_v27 = vrot.slane %v1480_v48, 4  ;;  %v1504_v51 = vrot.slane %v1491_v47, 4 }
 0x4d6   :  { %v1503_v52 = vperm.slane %v1495_v44, %v2172_v12  ;;  %v1515_v59 = vperm.slane %v1507_v50, %v2172_v12 }
 0x4d7   :  { %v1493_v55 = vsel %vm170_vm8, %v1492_v27, %v1474_v40  ;;  %v1505_v29 = vsel %vm170_vm8, %v1504_v51, %v1485_v15 }
 0x4d8   :  { %v1520_v61 = vrot.slane %v1515_v59, 4  ;;  %v1522_v1 = vrot.slane %v1503_v52, 4  ;;  %v1499_v57 = vperm.slane %v1493_v55, %v2172_v12  ;;  %v1511_v60 = vperm.slane %v1505_v29, %v2172_v12 }
 0x4da   :  { %v1521_v3 = vsel %vm170_vm8, %v1520_v61, %v1503_v52  ;;  %v1523_v5 = vsel %vm170_vm8, %v1515_v59, %v1522_v1  ;;  %v1516_v62 = vrot.slane %v1511_v60, 4  ;;  %v1518_v6 = vrot.slane %v1499_v57, 4  ;;  %v1905_v52 = vld [vmem:[%s2733_s9 + $0x8] sm:$0xff]  ;;  %v1904_v59 = vld [vmem:[%s2733_s9] sm:$0xff] }
 0x4db   :  { %v1970_v18 = vpack.i.bf16 %v1521_v3, %v1467_v0  ;;  %v1975_v53 = vpack.i.bf16 %v1523_v5, %v1469_v2  ;;  %1682 = vmatpush.bf16.msra.mxu2 %v1905_v52 }
 0x4dc   :  { %v1519_v8 = vsel %vm170_vm8, %v1511_v60, %v1518_v6  ;;  %v1517_v9 = vsel %vm170_vm8, %v1516_v62, %v1499_v57 }
 0x4dd   :  { %1971 = vrot.lane.b32.xlu1 %v1970_v18, %s2048_s23  ;;  %1976 = vrot.lane.b32.xlu2 %v1975_v53, %s2049_s24  ;;  %v1965_v12 = vpack.i.bf16 %v1519_v8, %v1465_v58 }
 0x4df   :  { %1966 = vrot.lane.b32.xlu0 %v1965_v12, %s2050_s25  ;;  %1683 = vmatpush.bf16.msra.mxu2 %v1904_v59  ;;  %v1985_v12 = vld [vmem:[%s2731_s8] ss:$0 sm:$0xff] }
 0x537   :  { %v1977_v19 = vpop.permute.xlu2 %1976 }
 0x538   :  { %v1979_v24 = vunpack.i.h.bf16 %v1977_v19  ;;  %v1978_v25 = vunpack.i.l.bf16 %v1977_v19 }
 0x54f   :  { %v1972_v17 = vpop.permute.xlu1 %1971 }
 0x550   :  { %v1974_v14 = vunpack.i.h.bf16 %v1972_v17  ;;  %v1973_v23 = vunpack.i.l.bf16 %v1972_v17 }
 0x551   :  { %v1967_v21 = vpop.permute.xlu0 %1966 }
 0x552   :  { %v1969_v13 = vunpack.i.h.bf16 %v1967_v21  ;;  %v1968_v22 = vunpack.i.l.bf16 %v1967_v21 }
 0x554   :  { %v1548_v26 = vsel %vm902_vm9, %v2607_v34, %v1968_v22  ;;  %v1549_v28 = vsel %vm902_vm9, %v1517_v9, %v1969_v13  ;;  %v1913_v22 = vld [vmem:[%s2735_s11 + $0x38] sm:$0xff] }
 0x555   :  { %v1551_v63 = vsel %vm1550_vm11, %v1548_v26, %v1973_v23  ;;  %v1552_v30 = vsel %vm1550_vm11, %v1549_v28, %v1974_v14  ;;  %1801 = vmatpush.bf16.msra.mxu3 %v1913_v22  ;;  %v1986_v14 = vld [vmem:[%s2732_s10] ss:$0 sm:$0xff]  ;;  %v1912_v23 = vld [vmem:[%s2735_s11 + $0x30] sm:$0xff]  ;;  %v1911_v26 = vld [vmem:[%s2735_s11 + $0x28] sm:$0xff] }
 0x556   :  { %v1554_v31 = vsel %vm1553_vm12, %v1551_v63, %v1978_v25  ;;  %v1555_v56 = vsel %vm1553_vm12, %v1552_v30, %v1979_v24  ;;  %v1910_v30 = vld [vmem:[%s2735_s11 + $0x20] sm:$0xff] }
 0x557   :  { %v1556_v33 = vpack.c.bf16 %v1555_v56, %v1554_v31 }
 0x559   :  { %1856 = vmatmul.msk.bf16.vlgmr.msra.gmra.mxu1 %vm49_vm0, %v1556_v33  ;;  %1802 = vmatpush.bf16.msra.mxu3 %v1912_v23  ;;  %v1909_v33 = vld [vmem:[%s2735_s11 + $0x18] sm:$0xff] }
 0x55d   :  { %1803 = vmatpush.bf16.msra.mxu3 %v1911_v26 }
 0x561   :  { %1804 = vmatpush.bf16.msra.mxu3 %v1910_v30 }
 0x565   :  { %1805 = vmatpush.bf16.msra.mxu3 %v1909_v33 }
 0x5d6   :  { %v1589_v11 = vpop.f32.mrf.mxu1 }
 0x5d7   :  { %v1590_v35 = vadd.f32 %v1983_v32, %v1589_v11  ;;  %v1908_v11 = vld [vmem:[%s2735_s11 + $0x10] sm:$0xff] }
 0x5d8   :  { %1806 = vmatpush.bf16.msra.mxu3 %v1908_v11 }
 0x5d9   :  { %v2651_v34 = vadd.f32 %v2038_v36, %v1590_v35 }
 0x5db   :  { %v1598_v37 = vsel %vm49_vm0, %v2651_v34, 0.0 }
 0x5dc   :  { %1599 = vadd.xlane.f32.xlu0 %v1598_v37 }
 0x5de   :  { %v1591_v15 = vpop.f32.mrf.mxu1 }
 0x5df   :  { %v1592_v38 = vadd.f32 %v1983_v32, %v1591_v15  ;;  %v1907_v15 = vld [vmem:[%s2735_s11 + $0x8] sm:$0xff] }
 0x5e0   :  { %1807 = vmatpush.bf16.msra.mxu3 %v1907_v15 }
 0x5e1   :  { %v2658_v41 = vadd.f32 %v2039_v39, %v1592_v38  ;;  %v1906_v38 = vld [vmem:[%s2735_s11] sm:$0xff] }
 0x5e3   :  { %v1601_v40 = vsel %vm49_vm0, %v2658_v41, 0.0 }
 0x5e4   :  { %1602 = vadd.xlane.f32.xlu1 %v1601_v40  ;;  %1808 = vmatpush.bf16.msra.mxu3 %v1906_v38 }
 0x64f   :  { %v1600_v42 = vpop.xlane.xlu0 %1599 }
 0x650   :  { %v1604_v16 = vmul.f32 %v1600_v42, %v2129_v10 }
 0x652   :  { %v1606_v43 = vsub.f32 %v2651_v34, %v1604_v16 }
 0x654   :  { %v1608_v45 = vmul.f32 %v1606_v43, %v1606_v43 }
 0x656   :  { %v1610_v46 = vsel %vm49_vm0, %v1608_v45, 0.0 }
 0x657   :  { %v1603_v47 = vpop.xlane.xlu1 %1602  ;;  %1611 = vadd.xlane.f32.xlu2 %v1610_v46 }
 0x658   :  { %v1605_v48 = vmul.f32 %v1603_v47, %v2129_v10 }
 0x65a   :  { %v1607_v20 = vsub.f32 %v2658_v41, %v1605_v48 }
 0x65c   :  { %v1609_v49 = vmul.f32 %v1607_v20, %v1607_v20 }
 0x65e   :  { %v1613_v44 = vsel %vm49_vm0, %v1609_v49, 0.0 }
 0x65f   :  { %1614 = vadd.xlane.f32.xlu0 %v1613_v44 }
 0x6ca   :  { %v1612_v50 = vpop.xlane.xlu2 %1611 }
 0x6cb   :  { %v1616_v27 = vmul.f32 %v1612_v50, %v2129_v10 }
 0x6cd   :  { %v1618_v51 = vadd.f32 1e-05, %v1616_v27 }
 0x6cf   :  { %2026 = vrsqrt.f32 %v1618_v51  ;;  %vm1626_vm14 = vweird.f32 %v1618_v51 }
 0x6d2   :  { %v1615_v54 = vpop.xlane.xlu0 %1614 }
 0x6d3   :  { %v1617_v55 = vmul.f32 %v1615_v54, %v2129_v10  ;;  %v1984_v10 = vld [vmem:[%s2730_s7] ss:$0 sm:$0xff] }
 0x6d5   :  { %v2027_v29 = vpop.eup %2026  ;;  %v1619_v61 = vadd.f32 1e-05, %v1617_v55 }
 0x6d6   :  { %v1621_v1 = vmul.f32 %v2027_v29, %v1618_v51  ;;  %vm1627_vm13 = vweird.f32 %v2027_v29 }
 0x6d7   :  { %2028 = vrsqrt.f32 %v1619_v61  ;;  %vm1628_vm15 = vmor %vm1626_vm14, %vm1627_vm13  ;;  %vm1636_vm2 = vweird.f32 %v1619_v61 }
 0x6d8   :  { %v1622_v57 = vmul.f32 %v2027_v29, %v1621_v1 }
 0x6da   :  { %v1623_v60 = vmul.f32 0.5, %v1622_v57 }
 0x6dc   :  { %v1624_v0 = vsub.f32 1.5, %v1623_v60 }
 0x6dd   :  { %v2029_v2 = vpop.eup %2028 }
 0x6de   :  { %v1625_v3 = vmul.f32 %v2027_v29, %v1624_v0  ;;  %v1631_v5 = vmul.f32 %v2029_v2, %v1619_v61  ;;  %vm1637_vm1 = vweird.f32 %v2029_v2 }
 0x6df   :  { %vm1638_vm3 = vmor %vm1636_vm2, %vm1637_vm1 }
 0x6e0   :  { %v1632_v62 = vmul.f32 %v2029_v2, %v1631_v5  ;;  %v1629_v6 = vsel %vm1628_vm15, %v2027_v29, %v1625_v3 }
 0x6e1   :  { %v1640_v58 = vmul.f32 %v1629_v6, %v1606_v43 }
 0x6e2   :  { %v1633_v18 = vmul.f32 0.5, %v1632_v62 }
 0x6e3   :  { %v1645_v7 = vmul.f32 %v1984_v10, %v1640_v58 }
 0x6e4   :  { %v1634_v53 = vsub.f32 1.5, %v1633_v18 }
 0x6e5   :  { %v1650_v19 = vadd.f32 %v1985_v12, %v1645_v7 }
 0x6e6   :  { %v1635_v8 = vmul.f32 %v2029_v2, %v1634_v53 }
 0x6e8   :  { %v1639_v9 = vsel %vm1638_vm3, %v2029_v2, %v1635_v8  ;;  %v1987_v2 = vld [vmem:[%s2734_s12] ss:$0 sm:$0xff] }
 0x6e9   :  { %v1641_v4 = vmul.f32 %v1639_v9, %v1607_v20 }
 0x6eb   :  { %v1646_v17 = vmul.f32 %v1984_v10, %v1641_v4 }
 0x6ed   :  { %v1651_v21 = vadd.f32 %v1985_v12, %v1646_v17 }
 0x6ef   :  { %v1652_v13 = vpack.c.bf16 %v1651_v21, %v1650_v19 }
 0x6f1   :  { %1865 = vmatmul.msk.bf16.vlgmr.msra.gmra.mxu2 %vm49_vm0, %v1652_v13 }
 0x774   :  { %v1685_v24 = vpop.f32.mrf.mxu2 }
 0x775   :  { %v1686_v25 = vadd.f32 %v1986_v14, %v1685_v24 }
 0x777   :  { %v1866_v28 = vmul.f32 -1.702, %v1686_v25 }
 0x779   :  { %v1694_v63 = vmul.f32 1.442695, %v1866_v28 }
 0x77b   :  { %2030 = vpow2.f32 %v1694_v63 }
 0x77c   :  { %v1687_v31 = vpop.f32.mrf.mxu2 }
 0x77d   :  { %v1688_v56 = vadd.f32 %v1986_v14, %v1687_v31 }
 0x77f   :  { %v1867_v32 = vmul.f32 -1.702, %v1688_v56 }
 0x781   :  { %v2031_v35 = vpop.eup %2030  ;;  %v1696_v36 = vmul.f32 1.442695, %v1867_v32 }
 0x782   :  { %v1698_v37 = vadd.f32 1.0, %v2031_v35 }
 0x783   :  { %2032 = vpow2.f32 %v1696_v36 }
 0x784   :  { %2034 = vrcp.f32 %v1698_v37  ;;  %v1711_v20 = vand.u32 2147483648, %v1698_v37  ;;  %vm1705_vm5 = vweird.f32 %v1698_v37  ;;  %v1709_v49 = vand.u32 2147483647, %v1698_v37 }
 0x786   :  { %v1712_v59 = vor.u32 1.1754944e-38, %v1711_v20  ;;  %vm1710_vm8 = vcmp.eq.f32.partialorder %v1709_v49, 8.507059e+37 }
 0x789   :  { %v2033_v39 = vpop.eup %2032 }
 0x78a   :  { %v2035_v40 = vpop.eup %2034  ;;  %v1699_v42 = vadd.f32 1.0, %v2033_v39 }
 0x78b   :  { %v1701_v16 = vmul.f32 %v2035_v40, %v1698_v37  ;;  %vm1706_vm4 = vweird.f32 %v2035_v40 }
 0x78c   :  { %2036 = vrcp.f32 %v1699_v42  ;;  %vm1707_vm6 = vmor %vm1705_vm5, %vm1706_vm4  ;;  %v1726_v50 = vand.u32 2147483648, %v1699_v42  ;;  %v1724_v52 = vand.u32 2147483647, %v1699_v42  ;;  %vm1720_vm9 = vweird.f32 %v1699_v42 }
 0x78d   :  { %v1702_v43 = vsub.f32 1.0, %v1701_v16 }
 0x78e   :  { %v1727_v29 = vor.u32 1.1754944e-38, %v1726_v50  ;;  %vm1725_vm11 = vcmp.eq.f32.partialorder %v1724_v52, 8.507059e+37 }
 0x78f   :  { %v1703_v45 = vmul.f32 %v2035_v40, %v1702_v43 }
 0x791   :  { %v1704_v47 = vadd.f32 %v2035_v40, %v1703_v45 }
 0x792   :  { %v2037_v46 = vpop.eup %2036 }
 0x793   :  { %v1716_v48 = vmul.f32 %v2037_v46, %v1699_v42  ;;  %v1708_v27 = vsel %vm1707_vm6, %v2035_v40, %v1704_v47  ;;  %vm1721_vm7 = vweird.f32 %v2037_v46 }
 0x794   :  { %v1713_v55 = vsel %vm1710_vm8, %v1712_v59, %v1708_v27  ;;  %vm1722_vm10 = vmor %vm1720_vm9, %vm1721_vm7 }
 0x795   :  { %v1717_v44 = vsub.f32 1.0, %v1716_v48  ;;  %v1730_v57 = vmul.f32 %v1713_v55, %v1686_v25 }
 0x797   :  { %v1718_v51 = vmul.f32 %v2037_v46, %v1717_v44 }
 0x799   :  { %v1719_v54 = vadd.f32 %v2037_v46, %v1718_v51 }
 0x79b   :  { %v1723_v61 = vsel %vm1722_vm10, %v2037_v46, %v1719_v54 }
 0x79c   :  { %v1728_v1 = vsel %vm1725_vm11, %v1727_v29, %v1723_v61 }
 0x79d   :  { %v1731_v60 = vmul.f32 %v1728_v1, %v1688_v56 }
 0x79f   :  { %v1732_v0 = vpack.c.bf16 %v1731_v60, %v1730_v57 }
 0x7a1   :  { %1809 = vmatmul.bf16.vlgmr.msra.gmra.mxu3 %v1732_v0 }
 0x824   :  { %v1810_v3 = vpop.f32.mrf.mxu3 }
 0x825   :  { %v1811_v5 = vadd.f32 %v1987_v2, %v1810_v3 }
 0x827   :  { %v1815_v62 = vadd.f32 %v1811_v5, %v2651_v34 }
 0x829   :  { %1817 = vst.msk [vmem:[%s2736_s13] sm:$0xff] %vm49_vm0, %v1815_v62 }
 0x82c   :  { %v1812_v6 = vpop.f32.mrf.mxu3 }
 0x82d   :  { %v1813_v18 = vadd.f32 %v1987_v2, %v1812_v6 }
 0x82f   :  { %v1816_v53 = vadd.f32 %v1813_v18, %v2658_v41 }
 0x831   :  { %1818 = vst.msk [vmem:[%s2736_s13 + $0x8] sm:$0xff] %vm49_vm0, %v1816_v53 }

</bundles_post_ra>
